<compile_context>
chip_gen: v7x
topology: tpu7x:2x2x1
jax: 0.10.0
libtpu: 0.0.40
codegen_flags: <defaults>
</compile_context>

<pallas_src>
import functools

import jax
import jax.numpy as jnp
from jax.experimental import pallas as pl
from jax.experimental.pallas import tpu as pltpu

# ----------------------------- config -------------------------------------
B = 2            # batch
S_ENC = 8        # encoder sequence length
S_DEC = 8        # decoder sequence length
D = 32           # hidden size
H = 4            # attention heads
DH = D // H      # head dim
FF = 64          # FFN inner size
V = 128          # vocab size (padded to a full 128-lane vreg -> lane-dense logits)
LANES = 128      # slab lane width
NEG = -1e9
EPS = 1e-6
SCALE = 1.0 / float(DH) ** 0.5

assert S_ENC == S_DEC, "token/mask slab packing assumes equal enc/dec lengths"
assert V == LANES


# ------------------------- in-kernel helpers -------------------------------
def _layernorm(x, g, b):
    mu = jnp.mean(x, axis=-1, keepdims=True)
    xc = x - mu
    var = jnp.mean(xc * xc, axis=-1, keepdims=True)
    return xc * jax.lax.rsqrt(var + EPS) * g + b


def _linear(x, w, b, relu=False):
    y = jnp.dot(x, w, preferred_element_type=jnp.float32) + b
    return jnp.maximum(y, 0.0) if relu else y


def _softmax(s):
    m = jnp.max(s, axis=-1, keepdims=True)
    p = jnp.exp(s - m)
    return p * pl.reciprocal(jnp.sum(p, axis=-1, keepdims=True), approx=True)


def _split_heads(x, s):
    """(B*s, H*DH) -> (H*B, s, DH), head-major along the stacked batch axis.

    Heads are interleaved along lanes after the projection; a (.., H, DH)
    reshape would be a lane-splitting relayout, so instead we take H static
    8-lane slices (cheap in-vreg selects) and stack them along the leading
    axis (free tile re-index).  This yields a single batch dim for the
    head-batched attention einsums.
    """
    return jnp.concatenate(
        [x[:, h * DH:(h + 1) * DH].reshape(B, s, DH) for h in range(H)],
        axis=0)


def _attention(x_q, x_kv, a, bias, sq, sk):
    """Multi-head attention; all (batch, head) pairs batched in single einsums.

    bias: additive score bias already tiled to the stacked (H*B, ., sk) batch.
    """
    # Separate, lane-aligned Q/K/V projections (no fused-qkv sub-lane splits).
    q = _linear(x_q, a["wq"], a["bq"])            # (B*sq, D)
    k = _linear(x_kv, a["wk"], a["bk"])           # (B*sk, D)
    v = _linear(x_kv, a["wv"], a["bv"])           # (B*sk, D)
    qs, ks, vs = _split_heads(q, sq), _split_heads(k, sk), _split_heads(v, sk)

    # One scores einsum + one softmax + one PV einsum for ALL heads & batches.
    s = jnp.einsum("bqd,bkd->bqk", qs, ks,
                   preferred_element_type=jnp.float32) * SCALE + bias
    probs = _softmax(s)                           # (H*B, sq, sk)
    o = jnp.einsum("bqk,bkd->bqd", probs, vs,
                   preferred_element_type=jnp.float32)   # (H*B, sq, DH)

    # merge_heads + Wo: sum_h O_h @ Wo[h*DH:(h+1)*DH, :] == concat(O_h) @ Wo.
    # The fold avoids an unaligned minor-dim concatenate and uses only
    # 8-row (sublane-aligned) weight slices.
    out = a["bo"]                                  # (1, D) broadcasts
    for h in range(H):
        out = out + jnp.dot(o[h * B:(h + 1) * B].reshape(B * sq, DH),
                            a["wo"][h * DH:(h + 1) * DH, :],
                            preferred_element_type=jnp.float32)
    return out


# --------------------------- the fused kernel -------------------------------
def _fused_seq2seq_kernel(treedef, layout, tok_ref, mask_ref, slab_ref,
                          logits_ref, loss_ref):
    # Unpack the single (R, 128) parameter slab via static pl.ds windows
    # (8-row-aligned offsets, lanes 0:cols).
    p = jax.tree_util.tree_unflatten(
        treedef,
        [slab_ref[pl.ds(off, r), pl.ds(0, c)] for (off, r, c) in layout])

    tok = tok_ref[...]                            # (B*S, 4) int32
    enc_ids = tok[:, 0:1]                         # (B*S_ENC, 1)
    dec_ids = tok[:, 1:2]                         # (B*S_DEC, 1)
    labels = tok[:, 2:3]                          # (B*S_DEC, 1)
    dm_flat = tok[:, 3:4].astype(jnp.float32)     # (B*S_DEC, 1) loss mask

    masks = mask_ref[...]                         # (B, 2, S) f32
    am = masks[:, 0:1, :]                         # (B, 1, S_ENC)
    dm = masks[:, 1:2, :]                         # (B, 1, S_DEC)

    def embed(ids, pos):
        # One-hot @ table: MXU-friendly embedding gather, fine while V == 128.
        # TODO(synk): scalar-prefetch row gather for real (32k) vocab sizes.
        oh = (jax.lax.broadcasted_iota(jnp.int32, (ids.shape[0], V), 1) == ids)
        return jnp.dot(oh.astype(jnp.float32), p["tok_emb"],
                       preferred_element_type=jnp.float32) + pos

    # Additive attention biases built from the tiny masks, tiled once over the
    # stacked head axis (h-major, matching _split_heads ordering).
    enc_bias = jnp.concatenate([(1.0 - am) * NEG] * H, axis=0)   # (H*B,1,S_ENC)
    rows = jax.lax.broadcasted_iota(jnp.int32, (S_DEC, S_DEC), 0)
    cols = jax.lax.broadcasted_iota(jnp.int32, (S_DEC, S_DEC), 1)
    causal = (cols <= rows).astype(jnp.float32)                  # (S_DEC,S_DEC)
    self_bias = jnp.concatenate(
        [(1.0 - causal[None, :, :] * dm) * NEG] * H, axis=0)     # (H*B,S,S)

    # --------------------------------- encoder ------------------------------
    e = p["enc"]
    x = embed(enc_ids, p["pos_enc"])                             # (B*S_ENC, D)
    xn = _layernorm(x, e["ln1_g"], e["ln1_b"])
    x = x + _attention(xn, xn, e["attn"], enc_bias, S_ENC, S_ENC)
    xn = _layernorm(x, e["ln2_g"], e["ln2_b"])
    x = x + _linear(_linear(xn, e["w1"], e["b1"], relu=True), e["w2"], e["b2"])
    enc_out = _layernorm(x, e["lnf_g"], e["lnf_b"])              # (B*S_ENC, D)

    # --------------------------------- decoder ------------------------------
    d = p["dec"]
    y = embed(dec_ids, p["pos_dec"])                             # (B*S_DEC, D)
    yn = _layernorm(y, d["ln1_g"], d["ln1_b"])
    y = y + _attention(yn, yn, d["self_attn"], self_bias, S_DEC, S_DEC)
    yn = _layernorm(y, d["ln2_g"], d["ln2_b"])
    y = y + _attention(yn, enc_out, d["cross_attn"], enc_bias, S_DEC, S_ENC)
    yn = _layernorm(y, d["ln3_g"], d["ln3_b"])
    y = y + _linear(_linear(yn, d["w1"], d["b1"], relu=True), d["w2"], d["b2"])
    dec_out = _layernorm(y, d["lnf_g"], d["lnf_b"])              # (B*S_DEC, D)

    # -------------------------- LM head + masked CE --------------------------
    logits = _linear(dec_out, p["lm_w"], p["lm_b"])              # (B*S_DEC, 128)
    logits_ref[...] = logits                                     # lane-dense

    m = jnp.max(logits, axis=-1, keepdims=True)
    z = logits - m
    lse = jnp.log(jnp.sum(jnp.exp(z), axis=-1, keepdims=True))
    onehot = (jax.lax.broadcasted_iota(jnp.int32, (B * S_DEC, V), 1)
              == labels).astype(jnp.float32)
    nll = (lse - jnp.sum(z * onehot, axis=-1, keepdims=True)) * dm_flat
    loss_ref[...] = (jnp.sum(nll)
                     / jnp.maximum(jnp.sum(dm_flat), 1.0)).reshape(1, 1)


# ----------------------------- parameters -----------------------------------
def init_params(key):
    keys = iter(jax.random.split(key, 64))

    def nrm(shape, scale=0.02):
        return jax.random.normal(next(keys), shape, jnp.float32) * scale

    def zeros(n):
        return jnp.zeros((1, n), jnp.float32)

    def ones(n):
        return jnp.ones((1, n), jnp.float32)

    def attn():
        return {"wq": nrm((D, D)), "bq": zeros(D),
                "wk": nrm((D, D)), "bk": zeros(D),
                "wv": nrm((D, D)), "bv": zeros(D),
                "wo": nrm((D, D)), "bo": zeros(D)}

    enc = {"ln1_g": ones(D), "ln1_b": zeros(D), "attn": attn(),
           "ln2_g": ones(D), "ln2_b": zeros(D),
           "w1": nrm((D, FF)), "b1": zeros(FF),
           "w2": nrm((FF, D)), "b2": zeros(D),
           "lnf_g": ones(D), "lnf_b": zeros(D)}
    dec = {"ln1_g": ones(D), "ln1_b": zeros(D), "self_attn": attn(),
           "ln2_g": ones(D), "ln2_b": zeros(D), "cross_attn": attn(),
           "ln3_g": ones(D), "ln3_b": zeros(D),
           "w1": nrm((D, FF)), "b1": zeros(FF),
           "w2": nrm((FF, D)), "b2": zeros(D),
           "lnf_g": ones(D), "lnf_b": zeros(D)}
    return {"tok_emb": nrm((V, D)), "pos_enc": nrm((S_ENC, D)),
            "pos_dec": nrm((S_DEC, D)), "enc": enc, "dec": dec,
            "lm_w": nrm((D, V)), "lm_b": zeros(V)}


def pack_params(params):
    """Pack every parameter leaf into ONE lane-dense (R, 128) f32 slab.

    Positional embeddings are pre-expanded over the batch so the kernel adds
    them with a plain `+`.  Each leaf is zero-padded to 128 lanes and an
    8-row-aligned row window, so all in-kernel slab slices are aligned static
    views.  Returns (slab, (treedef, layout)) with layout a static tuple of
    (row_offset, rows, cols) in tree_flatten order.
    """
    p = dict(params)
    p["pos_enc"] = jnp.tile(params["pos_enc"], (B, 1))   # (B*S_ENC, D)
    p["pos_dec"] = jnp.tile(params["pos_dec"], (B, 1))   # (B*S_DEC, D)
    leaves, treedef = jax.tree_util.tree_flatten(p)

    blocks, layout, off = [], [], 0
    for leaf in leaves:
        r, c = leaf.shape
        rpad = (r + 7) // 8 * 8
        layout.append((off, r, c))
        blocks.append(jnp.pad(leaf.astype(jnp.float32),
                              ((0, rpad - r), (0, LANES - c))))
        off += rpad
    slab = jnp.concatenate(blocks, axis=0)               # (R, 128)
    return slab, (treedef, tuple(layout))


# ------------------------------- wrapper -------------------------------------
def seq2seq_forward(param_slab, input_ids, attention_mask, labels,
                    decoder_attention_mask, *, param_meta):
    """Training forward: returns (masked LM loss, logits (B, S_DEC, V))."""
    treedef, layout = param_meta
    kernel = functools.partial(_fused_seq2seq_kernel, treedef, layout)

    # Teacher forcing: decoder inputs = labels shifted right, start id 0.
    dec_in_ids = jnp.concatenate(
        [jnp.zeros((B, 1), labels.dtype), labels[:, :-1]], axis=1)

    # All tiny per-example inputs packed into two slabs (one int32, one f32):
    #   tok_slab  = [enc_ids | dec_ids | labels | dec_mask]   (B*S, 4) i32
    #   mask_slab = [attention_mask ; decoder_attention_mask] (B, 2, S) f32
    tok_slab = jnp.stack(
        [input_ids.astype(jnp.int32), dec_in_ids.astype(jnp.int32),
         labels.astype(jnp.int32), decoder_attention_mask.astype(jnp.int32)],
        axis=-1).reshape(B * S_DEC, 4)
    mask_slab = jnp.stack(
        [attention_mask.astype(jnp.float32),
         decoder_attention_mask.astype(jnp.float32)], axis=1)    # (B, 2, S)

    vspec = pl.BlockSpec(memory_space=pltpu.MemorySpace.VMEM)
    logits, loss = pl.pallas_call(
        kernel,
        out_shape=(jax.ShapeDtypeStruct((B * S_DEC, V), jnp.float32),
                   jax.ShapeDtypeStruct((1, 1), jnp.float32)),
        in_specs=[vspec, vspec, vspec],
        out_specs=(vspec, vspec),
        # No grid: single invocation, 3 inputs, everything VMEM-resident.
        # TODO(synk): at real CodeT5 sizes add a ("parallel", ...) grid over
        # (batch, seq) blocks for v7x's 2 TensorCores and bf16 MXU operands.
    )(tok_slab, mask_slab, param_slab)

    return loss[0, 0], logits.reshape(B, S_DEC, V)


# ------------------------------- main ----------------------------------------
if __name__ == "__main__":
    key = jax.random.PRNGKey(0)
    kp, k1, k2 = jax.random.split(key, 3)
    params = init_params(kp)
    param_slab, param_meta = pack_params(params)      # one-time packing

    input_ids = jax.random.randint(k1, (B, S_ENC), 0, V, dtype=jnp.int32)
    labels = jax.random.randint(k2, (B, S_DEC), 0, V, dtype=jnp.int32)
    attention_mask = jnp.ones((B, S_ENC), jnp.int32).at[:, 6:].set(0)
    decoder_attention_mask = jnp.ones((B, S_DEC), jnp.int32).at[:, 7:].set(0)

    fwd = jax.jit(functools.partial(seq2seq_forward, param_meta=param_meta))
    loss, logits = fwd(param_slab, input_ids, attention_mask, labels,
                       decoder_attention_mask)
    jax.block_until_ready((loss, logits))

    assert logits.shape == (B, S_DEC, V), logits.shape
    assert bool(jnp.isfinite(loss)), loss
    print("KERNEL_OK")
</pallas_src>

<mosaic_0001>
module attributes {stable_mosaic.version = 11 : i64} {
  func.func @_fused_seq2seq_kernel(%arg0: memref<16x4xi32, #tpu.memory_space<vmem>>, %arg1: memref<2x2x8xf32, #tpu.memory_space<vmem>>, %arg2: memref<1016x128xf32, #tpu.memory_space<vmem>>, %arg3: memref<16x128xf32, #tpu.memory_space<vmem>>, %arg4: memref<1x1xf32, #tpu.memory_space<vmem>>) attributes {dimension_semantics = [], scalar_prefetch = 0 : i64, scratch_operands = 0 : i64, tpu.core_type = #tpu.core_type<tc>} {
    %c0 = arith.constant 0 : index
    %c0_0 = arith.constant 0 : index
    %0 = vector.load %arg2[%c0, %c0_0] : memref<1016x128xf32, #tpu.memory_space<vmem>>, vector<1x64xf32>
    %c8 = arith.constant 8 : index
    %c0_1 = arith.constant 0 : index
    %1 = vector.load %arg2[%c8, %c0_1] : memref<1016x128xf32, #tpu.memory_space<vmem>>, vector<1x32xf32>
    %c16 = arith.constant 16 : index
    %c0_2 = arith.constant 0 : index
    %2 = vector.load %arg2[%c16, %c0_2] : memref<1016x128xf32, #tpu.memory_space<vmem>>, vector<1x32xf32>
    %c24 = arith.constant 24 : index
    %c0_3 = arith.constant 0 : index
    %3 = vector.load %arg2[%c24, %c0_3] : memref<1016x128xf32, #tpu.memory_space<vmem>>, vector<1x32xf32>
    %c32 = arith.constant 32 : index
    %c0_4 = arith.constant 0 : index
    %4 = vector.load %arg2[%c32, %c0_4] : memref<1016x128xf32, #tpu.memory_space<vmem>>, vector<1x32xf32>
    %c40 = arith.constant 40 : index
    %c0_5 = arith.constant 0 : index
    %5 = vector.load %arg2[%c40, %c0_5] : memref<1016x128xf32, #tpu.memory_space<vmem>>, vector<1x32xf32>
    %c48 = arith.constant 48 : index
    %c0_6 = arith.constant 0 : index
    %6 = vector.load %arg2[%c48, %c0_6] : memref<1016x128xf32, #tpu.memory_space<vmem>>, vector<32x32xf32>
    %c80 = arith.constant 80 : index
    %c0_7 = arith.constant 0 : index
    %7 = vector.load %arg2[%c80, %c0_7] : memref<1016x128xf32, #tpu.memory_space<vmem>>, vector<32x32xf32>
    %c112 = arith.constant 112 : index
    %c0_8 = arith.constant 0 : index
    %8 = vector.load %arg2[%c112, %c0_8] : memref<1016x128xf32, #tpu.memory_space<vmem>>, vector<32x32xf32>
    %c144 = arith.constant 144 : index
    %c0_9 = arith.constant 0 : index
    %9 = vector.load %arg2[%c144, %c0_9] : memref<1016x128xf32, #tpu.memory_space<vmem>>, vector<32x32xf32>
    %c176 = arith.constant 176 : index
    %c0_10 = arith.constant 0 : index
    %10 = vector.load %arg2[%c176, %c0_10] : memref<1016x128xf32, #tpu.memory_space<vmem>>, vector<1x32xf32>
    %c184 = arith.constant 184 : index
    %c0_11 = arith.constant 0 : index
    %11 = vector.load %arg2[%c184, %c0_11] : memref<1016x128xf32, #tpu.memory_space<vmem>>, vector<1x32xf32>
    %c192 = arith.constant 192 : index
    %c0_12 = arith.constant 0 : index
    %12 = vector.load %arg2[%c192, %c0_12] : memref<1016x128xf32, #tpu.memory_space<vmem>>, vector<1x32xf32>
    %c200 = arith.constant 200 : index
    %c0_13 = arith.constant 0 : index
    %13 = vector.load %arg2[%c200, %c0_13] : memref<1016x128xf32, #tpu.memory_space<vmem>>, vector<1x32xf32>
    %c208 = arith.constant 208 : index
    %c0_14 = arith.constant 0 : index
    %14 = vector.load %arg2[%c208, %c0_14] : memref<1016x128xf32, #tpu.memory_space<vmem>>, vector<1x32xf32>
    %c216 = arith.constant 216 : index
    %c0_15 = arith.constant 0 : index
    %15 = vector.load %arg2[%c216, %c0_15] : memref<1016x128xf32, #tpu.memory_space<vmem>>, vector<1x32xf32>
    %c224 = arith.constant 224 : index
    %c0_16 = arith.constant 0 : index
    %16 = vector.load %arg2[%c224, %c0_16] : memref<1016x128xf32, #tpu.memory_space<vmem>>, vector<1x32xf32>
    %c232 = arith.constant 232 : index
    %c0_17 = arith.constant 0 : index
    %17 = vector.load %arg2[%c232, %c0_17] : memref<1016x128xf32, #tpu.memory_space<vmem>>, vector<1x32xf32>
    %c240 = arith.constant 240 : index
    %c0_18 = arith.constant 0 : index
    %18 = vector.load %arg2[%c240, %c0_18] : memref<1016x128xf32, #tpu.memory_space<vmem>>, vector<1x32xf32>
    %c248 = arith.constant 248 : index
    %c0_19 = arith.constant 0 : index
    %19 = vector.load %arg2[%c248, %c0_19] : memref<1016x128xf32, #tpu.memory_space<vmem>>, vector<1x32xf32>
    %c256 = arith.constant 256 : index
    %c0_20 = arith.constant 0 : index
    %20 = vector.load %arg2[%c256, %c0_20] : memref<1016x128xf32, #tpu.memory_space<vmem>>, vector<1x32xf32>
    %c264 = arith.constant 264 : index
    %c0_21 = arith.constant 0 : index
    %21 = vector.load %arg2[%c264, %c0_21] : memref<1016x128xf32, #tpu.memory_space<vmem>>, vector<1x32xf32>
    %c272 = arith.constant 272 : index
    %c0_22 = arith.constant 0 : index
    %22 = vector.load %arg2[%c272, %c0_22] : memref<1016x128xf32, #tpu.memory_space<vmem>>, vector<32x32xf32>
    %c304 = arith.constant 304 : index
    %c0_23 = arith.constant 0 : index
    %23 = vector.load %arg2[%c304, %c0_23] : memref<1016x128xf32, #tpu.memory_space<vmem>>, vector<32x32xf32>
    %c336 = arith.constant 336 : index
    %c0_24 = arith.constant 0 : index
    %24 = vector.load %arg2[%c336, %c0_24] : memref<1016x128xf32, #tpu.memory_space<vmem>>, vector<32x32xf32>
    %c368 = arith.constant 368 : index
    %c0_25 = arith.constant 0 : index
    %25 = vector.load %arg2[%c368, %c0_25] : memref<1016x128xf32, #tpu.memory_space<vmem>>, vector<32x32xf32>
    %c400 = arith.constant 400 : index
    %c0_26 = arith.constant 0 : index
    %26 = vector.load %arg2[%c400, %c0_26] : memref<1016x128xf32, #tpu.memory_space<vmem>>, vector<32x64xf32>
    %c432 = arith.constant 432 : index
    %c0_27 = arith.constant 0 : index
    %27 = vector.load %arg2[%c432, %c0_27] : memref<1016x128xf32, #tpu.memory_space<vmem>>, vector<64x32xf32>
    %c496 = arith.constant 496 : index
    %c0_28 = arith.constant 0 : index
    %28 = vector.load %arg2[%c496, %c0_28] : memref<1016x128xf32, #tpu.memory_space<vmem>>, vector<1x32xf32>
    %c504 = arith.constant 504 : index
    %c0_29 = arith.constant 0 : index
    %29 = vector.load %arg2[%c504, %c0_29] : memref<1016x128xf32, #tpu.memory_space<vmem>>, vector<1x32xf32>
    %c512 = arith.constant 512 : index
    %c0_30 = arith.constant 0 : index
    %30 = vector.load %arg2[%c512, %c0_30] : memref<1016x128xf32, #tpu.memory_space<vmem>>, vector<1x32xf32>
    %c520 = arith.constant 520 : index
    %c0_31 = arith.constant 0 : index
    %31 = vector.load %arg2[%c520, %c0_31] : memref<1016x128xf32, #tpu.memory_space<vmem>>, vector<1x32xf32>
    %c528 = arith.constant 528 : index
    %c0_32 = arith.constant 0 : index
    %32 = vector.load %arg2[%c528, %c0_32] : memref<1016x128xf32, #tpu.memory_space<vmem>>, vector<32x32xf32>
    %c560 = arith.constant 560 : index
    %c0_33 = arith.constant 0 : index
    %33 = vector.load %arg2[%c560, %c0_33] : memref<1016x128xf32, #tpu.memory_space<vmem>>, vector<32x32xf32>
    %c592 = arith.constant 592 : index
    %c0_34 = arith.constant 0 : index
    %34 = vector.load %arg2[%c592, %c0_34] : memref<1016x128xf32, #tpu.memory_space<vmem>>, vector<32x32xf32>
    %c624 = arith.constant 624 : index
    %c0_35 = arith.constant 0 : index
    %35 = vector.load %arg2[%c624, %c0_35] : memref<1016x128xf32, #tpu.memory_space<vmem>>, vector<32x32xf32>
    %c656 = arith.constant 656 : index
    %c0_36 = arith.constant 0 : index
    %36 = vector.load %arg2[%c656, %c0_36] : memref<1016x128xf32, #tpu.memory_space<vmem>>, vector<1x64xf32>
    %c664 = arith.constant 664 : index
    %c0_37 = arith.constant 0 : index
    %37 = vector.load %arg2[%c664, %c0_37] : memref<1016x128xf32, #tpu.memory_space<vmem>>, vector<1x32xf32>
    %c672 = arith.constant 672 : index
    %c0_38 = arith.constant 0 : index
    %38 = vector.load %arg2[%c672, %c0_38] : memref<1016x128xf32, #tpu.memory_space<vmem>>, vector<1x32xf32>
    %c680 = arith.constant 680 : index
    %c0_39 = arith.constant 0 : index
    %39 = vector.load %arg2[%c680, %c0_39] : memref<1016x128xf32, #tpu.memory_space<vmem>>, vector<1x32xf32>
    %c688 = arith.constant 688 : index
    %c0_40 = arith.constant 0 : index
    %40 = vector.load %arg2[%c688, %c0_40] : memref<1016x128xf32, #tpu.memory_space<vmem>>, vector<1x32xf32>
    %c696 = arith.constant 696 : index
    %c0_41 = arith.constant 0 : index
    %41 = vector.load %arg2[%c696, %c0_41] : memref<1016x128xf32, #tpu.memory_space<vmem>>, vector<1x32xf32>
    %c704 = arith.constant 704 : index
    %c0_42 = arith.constant 0 : index
    %42 = vector.load %arg2[%c704, %c0_42] : memref<1016x128xf32, #tpu.memory_space<vmem>>, vector<1x32xf32>
    %c712 = arith.constant 712 : index
    %c0_43 = arith.constant 0 : index
    %43 = vector.load %arg2[%c712, %c0_43] : memref<1016x128xf32, #tpu.memory_space<vmem>>, vector<1x32xf32>
    %c720 = arith.constant 720 : index
    %c0_44 = arith.constant 0 : index
    %44 = vector.load %arg2[%c720, %c0_44] : memref<1016x128xf32, #tpu.memory_space<vmem>>, vector<32x64xf32>
    %c752 = arith.constant 752 : index
    %c0_45 = arith.constant 0 : index
    %45 = vector.load %arg2[%c752, %c0_45] : memref<1016x128xf32, #tpu.memory_space<vmem>>, vector<64x32xf32>
    %c816 = arith.constant 816 : index
    %c0_46 = arith.constant 0 : index
    %46 = vector.load %arg2[%c816, %c0_46] : memref<1016x128xf32, #tpu.memory_space<vmem>>, vector<1x128xf32>
    %c824 = arith.constant 824 : index
    %c0_47 = arith.constant 0 : index
    %47 = vector.load %arg2[%c824, %c0_47] : memref<1016x128xf32, #tpu.memory_space<vmem>>, vector<32x128xf32>
    %c856 = arith.constant 856 : index
    %c0_48 = arith.constant 0 : index
    %48 = vector.load %arg2[%c856, %c0_48] : memref<1016x128xf32, #tpu.memory_space<vmem>>, vector<16x32xf32>
    %c872 = arith.constant 872 : index
    %c0_49 = arith.constant 0 : index
    %49 = vector.load %arg2[%c872, %c0_49] : memref<1016x128xf32, #tpu.memory_space<vmem>>, vector<16x32xf32>
    %c888 = arith.constant 888 : index
    %c0_50 = arith.constant 0 : index
    %50 = vector.load %arg2[%c888, %c0_50] : memref<1016x128xf32, #tpu.memory_space<vmem>>, vector<128x32xf32>
    %c0_51 = arith.constant 0 : index
    %c0_52 = arith.constant 0 : index
    %51 = vector.load %arg0[%c0_51, %c0_52] : memref<16x4xi32, #tpu.memory_space<vmem>>, vector<16x4xi32>
    %52 = vector.extract_strided_slice %51 {offsets = [0, 0], sizes = [16, 1], strides = [1, 1]} : vector<16x4xi32> to vector<16x1xi32>
    %53 = vector.extract_strided_slice %51 {offsets = [0, 1], sizes = [16, 1], strides = [1, 1]} : vector<16x4xi32> to vector<16x1xi32>
    %54 = vector.extract_strided_slice %51 {offsets = [0, 2], sizes = [16, 1], strides = [1, 1]} : vector<16x4xi32> to vector<16x1xi32>
    %55 = vector.extract_strided_slice %51 {offsets = [0, 3], sizes = [16, 1], strides = [1, 1]} : vector<16x4xi32> to vector<16x1xi32>
    %56 = arith.sitofp %55 : vector<16x1xi32> to vector<16x1xf32>
    %c0_53 = arith.constant 0 : index
    %c0_54 = arith.constant 0 : index
    %c0_55 = arith.constant 0 : index
    %57 = vector.load %arg1[%c0_53, %c0_54, %c0_55] : memref<2x2x8xf32, #tpu.memory_space<vmem>>, vector<2x2x8xf32>
    %58 = vector.extract_strided_slice %57 {offsets = [0, 0, 0], sizes = [2, 1, 8], strides = [1, 1, 1]} : vector<2x2x8xf32> to vector<2x1x8xf32>
    %59 = vector.extract_strided_slice %57 {offsets = [0, 1, 0], sizes = [2, 1, 8], strides = [1, 1, 1]} : vector<2x2x8xf32> to vector<2x1x8xf32>
    %cst = arith.constant 1.000000e+00 : f32
    %60 = vector.broadcast %cst : f32 to vector<2x1x8xf32>
    %61 = arith.subf %60, %58 : vector<2x1x8xf32>
    %cst_56 = arith.constant -1.000000e+09 : f32
    %62 = vector.broadcast %cst_56 : f32 to vector<2x1x8xf32>
    %63 = arith.mulf %61, %62 : vector<2x1x8xf32>
    %64 = tpu.concatenate %63, %63, %63, %63 in 0 : vector<2x1x8xf32>, vector<2x1x8xf32>, vector<2x1x8xf32>, vector<2x1x8xf32> -> vector<8x1x8xf32>
    %65 = tpu.iota {dimensions = array<i32: 0>} : vector<8x8xi32>
    %66 = tpu.iota {dimensions = array<i32: 1>} : vector<8x8xi32>
    %67 = arith.cmpi sle, %66, %65 : vector<8x8xi32>
    %68 = arith.extui %67 : vector<8x8xi1> to vector<8x8xi32>
    %69 = arith.sitofp %68 : vector<8x8xi32> to vector<8x8xf32>
    %70 = vector.shape_cast %69 : vector<8x8xf32> to vector<1x8x8xf32>
    %71 = vector.broadcast %70 : vector<1x8x8xf32> to vector<2x8x8xf32>
    %72 = vector.broadcast %59 : vector<2x1x8xf32> to vector<2x8x8xf32>
    %73 = arith.mulf %71, %72 : vector<2x8x8xf32>
    %cst_57 = arith.constant 1.000000e+00 : f32
    %74 = vector.broadcast %cst_57 : f32 to vector<2x8x8xf32>
    %75 = arith.subf %74, %73 : vector<2x8x8xf32>
    %cst_58 = arith.constant -1.000000e+09 : f32
    %76 = vector.broadcast %cst_58 : f32 to vector<2x8x8xf32>
    %77 = arith.mulf %75, %76 : vector<2x8x8xf32>
    %78 = tpu.concatenate %77, %77, %77, %77 in 0 : vector<2x8x8xf32>, vector<2x8x8xf32>, vector<2x8x8xf32>, vector<2x8x8xf32> -> vector<8x8x8xf32>
    %79 = tpu.iota {dimensions = array<i32: 1>} : vector<16x128xi32>
    %80 = vector.broadcast %52 : vector<16x1xi32> to vector<16x128xi32>
    %81 = arith.cmpi eq, %79, %80 : vector<16x128xi32>
    %82 = arith.extui %81 : vector<16x128xi1> to vector<16x128xi32>
    %83 = arith.sitofp %82 : vector<16x128xi32> to vector<16x128xf32>
    %cst_59 = arith.constant dense<0.000000e+00> : vector<16x32xf32>
    %84 = tpu.matmul %83, %50, %cst_59 {dimension_numbers = #tpu.dot_dimension_numbers<[1], [0], [0], [1], [0, 0, 1, 1], [], []>} : vector<16x128xf32>, vector<128x32xf32>, vector<16x32xf32> -> vector<16x32xf32>
    %85 = arith.addf %84, %49 : vector<16x32xf32>
    %cst_60 = arith.constant dense<0.000000e+00> : vector<16xf32>
    %86 = vector.multi_reduction <add>, %85, %cst_60 [1] : vector<16x32xf32> to vector<16xf32>
    %87 = vector.shape_cast %86 : vector<16xf32> to vector<16x1xf32>
    %cst_61 = arith.constant 3.200000e+01 : f32
    %88 = vector.broadcast %cst_61 : f32 to vector<16x1xf32>
    %89 = arith.divf %87, %88 : vector<16x1xf32>
    %90 = vector.broadcast %89 : vector<16x1xf32> to vector<16x32xf32>
    %91 = arith.subf %85, %90 : vector<16x32xf32>
    %92 = arith.mulf %91, %91 : vector<16x32xf32>
    %cst_62 = arith.constant dense<0.000000e+00> : vector<16xf32>
    %93 = vector.multi_reduction <add>, %92, %cst_62 [1] : vector<16x32xf32> to vector<16xf32>
    %94 = vector.shape_cast %93 : vector<16xf32> to vector<16x1xf32>
    %cst_63 = arith.constant 3.200000e+01 : f32
    %95 = vector.broadcast %cst_63 : f32 to vector<16x1xf32>
    %96 = arith.divf %94, %95 : vector<16x1xf32>
    %cst_64 = arith.constant 9.99999997E-7 : f32
    %97 = vector.broadcast %cst_64 : f32 to vector<16x1xf32>
    %98 = arith.addf %96, %97 : vector<16x1xf32>
    %99 = math.rsqrt %98 : vector<16x1xf32>
    %100 = vector.broadcast %99 : vector<16x1xf32> to vector<16x32xf32>
    %101 = arith.mulf %91, %100 : vector<16x32xf32>
    %102 = vector.broadcast %39 : vector<1x32xf32> to vector<16x32xf32>
    %103 = arith.mulf %101, %102 : vector<16x32xf32>
    %104 = vector.broadcast %38 : vector<1x32xf32> to vector<16x32xf32>
    %105 = arith.addf %103, %104 : vector<16x32xf32>
    %cst_65 = arith.constant dense<0.000000e+00> : vector<16x32xf32>
    %106 = tpu.matmul %105, %34, %cst_65 {dimension_numbers = #tpu.dot_dimension_numbers<[1], [0], [0], [1], [0, 0, 1, 1], [], []>} : vector<16x32xf32>, vector<32x32xf32>, vector<16x32xf32> -> vector<16x32xf32>
    %107 = vector.broadcast %30 : vector<1x32xf32> to vector<16x32xf32>
    %108 = arith.addf %106, %107 : vector<16x32xf32>
    %cst_66 = arith.constant dense<0.000000e+00> : vector<16x32xf32>
    %109 = tpu.matmul %105, %32, %cst_66 {dimension_numbers = #tpu.dot_dimension_numbers<[1], [0], [0], [1], [0, 0, 1, 1], [], []>} : vector<16x32xf32>, vector<32x32xf32>, vector<16x32xf32> -> vector<16x32xf32>
    %110 = vector.broadcast %28 : vector<1x32xf32> to vector<16x32xf32>
    %111 = arith.addf %109, %110 : vector<16x32xf32>
    %cst_67 = arith.constant dense<0.000000e+00> : vector<16x32xf32>
    %112 = tpu.matmul %105, %35, %cst_67 {dimension_numbers = #tpu.dot_dimension_numbers<[1], [0], [0], [1], [0, 0, 1, 1], [], []>} : vector<16x32xf32>, vector<32x32xf32>, vector<16x32xf32> -> vector<16x32xf32>
    %113 = vector.broadcast %31 : vector<1x32xf32> to vector<16x32xf32>
    %114 = arith.addf %112, %113 : vector<16x32xf32>
    %115 = vector.extract_strided_slice %108 {offsets = [0, 0], sizes = [16, 8], strides = [1, 1]} : vector<16x32xf32> to vector<16x8xf32>
    %116 = vector.shape_cast %115 : vector<16x8xf32> to vector<2x8x8xf32>
    %117 = vector.extract_strided_slice %108 {offsets = [0, 8], sizes = [16, 8], strides = [1, 1]} : vector<16x32xf32> to vector<16x8xf32>
    %118 = vector.shape_cast %117 : vector<16x8xf32> to vector<2x8x8xf32>
    %119 = vector.extract_strided_slice %108 {offsets = [0, 16], sizes = [16, 8], strides = [1, 1]} : vector<16x32xf32> to vector<16x8xf32>
    %120 = vector.shape_cast %119 : vector<16x8xf32> to vector<2x8x8xf32>
    %121 = vector.extract_strided_slice %108 {offsets = [0, 24], sizes = [16, 8], strides = [1, 1]} : vector<16x32xf32> to vector<16x8xf32>
    %122 = vector.shape_cast %121 : vector<16x8xf32> to vector<2x8x8xf32>
    %123 = tpu.concatenate %116, %118, %120, %122 in 0 : vector<2x8x8xf32>, vector<2x8x8xf32>, vector<2x8x8xf32>, vector<2x8x8xf32> -> vector<8x8x8xf32>
    %124 = vector.extract_strided_slice %111 {offsets = [0, 0], sizes = [16, 8], strides = [1, 1]} : vector<16x32xf32> to vector<16x8xf32>
    %125 = vector.shape_cast %124 : vector<16x8xf32> to vector<2x8x8xf32>
    %126 = vector.extract_strided_slice %111 {offsets = [0, 8], sizes = [16, 8], strides = [1, 1]} : vector<16x32xf32> to vector<16x8xf32>
    %127 = vector.shape_cast %126 : vector<16x8xf32> to vector<2x8x8xf32>
    %128 = vector.extract_strided_slice %111 {offsets = [0, 16], sizes = [16, 8], strides = [1, 1]} : vector<16x32xf32> to vector<16x8xf32>
    %129 = vector.shape_cast %128 : vector<16x8xf32> to vector<2x8x8xf32>
    %130 = vector.extract_strided_slice %111 {offsets = [0, 24], sizes = [16, 8], strides = [1, 1]} : vector<16x32xf32> to vector<16x8xf32>
    %131 = vector.shape_cast %130 : vector<16x8xf32> to vector<2x8x8xf32>
    %132 = tpu.concatenate %125, %127, %129, %131 in 0 : vector<2x8x8xf32>, vector<2x8x8xf32>, vector<2x8x8xf32>, vector<2x8x8xf32> -> vector<8x8x8xf32>
    %133 = vector.extract_strided_slice %114 {offsets = [0, 0], sizes = [16, 8], strides = [1, 1]} : vector<16x32xf32> to vector<16x8xf32>
    %134 = vector.shape_cast %133 : vector<16x8xf32> to vector<2x8x8xf32>
    %135 = vector.extract_strided_slice %114 {offsets = [0, 8], sizes = [16, 8], strides = [1, 1]} : vector<16x32xf32> to vector<16x8xf32>
    %136 = vector.shape_cast %135 : vector<16x8xf32> to vector<2x8x8xf32>
    %137 = vector.extract_strided_slice %114 {offsets = [0, 16], sizes = [16, 8], strides = [1, 1]} : vector<16x32xf32> to vector<16x8xf32>
    %138 = vector.shape_cast %137 : vector<16x8xf32> to vector<2x8x8xf32>
    %139 = vector.extract_strided_slice %114 {offsets = [0, 24], sizes = [16, 8], strides = [1, 1]} : vector<16x32xf32> to vector<16x8xf32>
    %140 = vector.shape_cast %139 : vector<16x8xf32> to vector<2x8x8xf32>
    %141 = tpu.concatenate %134, %136, %138, %140 in 0 : vector<2x8x8xf32>, vector<2x8x8xf32>, vector<2x8x8xf32>, vector<2x8x8xf32> -> vector<8x8x8xf32>
    "tpu.trace_start"() <{level = 10 : i32, message = "bqd,bkd->bqk"}> : () -> ()
    %cst_68 = arith.constant dense<0.000000e+00> : vector<8x8x8xf32>
    %142 = tpu.matmul %123, %132, %cst_68 {dimension_numbers = #tpu.dot_dimension_numbers<[2], [2], [1], [1], [0, 0, 0, 1, 1, 1], [0], [0]>} : vector<8x8x8xf32>, vector<8x8x8xf32>, vector<8x8x8xf32> -> vector<8x8x8xf32>
    "tpu.trace_stop"() : () -> ()
    %cst_69 = arith.constant 0.353553385 : f32
    %143 = vector.broadcast %cst_69 : f32 to vector<8x8x8xf32>
    %144 = arith.mulf %142, %143 : vector<8x8x8xf32>
    %145 = vector.broadcast %64 : vector<8x1x8xf32> to vector<8x8x8xf32>
    %146 = arith.addf %144, %145 : vector<8x8x8xf32>
    %cst_70 = arith.constant dense<0xFF800000> : vector<8x8xf32>
    %147 = vector.multi_reduction <maximumf>, %146, %cst_70 [2] : vector<8x8x8xf32> to vector<8x8xf32>
    %148 = vector.shape_cast %147 : vector<8x8xf32> to vector<8x8x1xf32>
    %149 = vector.broadcast %148 : vector<8x8x1xf32> to vector<8x8x8xf32>
    %150 = arith.subf %146, %149 : vector<8x8x8xf32>
    %151 = math.exp %150 : vector<8x8x8xf32>
    %cst_71 = arith.constant dense<0.000000e+00> : vector<8x8xf32>
    %152 = vector.multi_reduction <add>, %151, %cst_71 [2] : vector<8x8x8xf32> to vector<8x8xf32>
    %153 = vector.shape_cast %152 : vector<8x8xf32> to vector<8x8x1xf32>
    %154 = tpu.reciprocal %153 {approx = true} : vector<8x8x1xf32> -> vector<8x8x1xf32>
    %155 = vector.broadcast %154 : vector<8x8x1xf32> to vector<8x8x8xf32>
    %156 = arith.mulf %151, %155 : vector<8x8x8xf32>
    "tpu.trace_start"() <{level = 10 : i32, message = "bqk,bkd->bqd"}> : () -> ()
    %cst_72 = arith.constant dense<0.000000e+00> : vector<8x8x8xf32>
    %157 = tpu.matmul %156, %141, %cst_72 {dimension_numbers = #tpu.dot_dimension_numbers<[2], [1], [1], [2], [0, 0, 0, 1, 1, 2], [0], [0]>} : vector<8x8x8xf32>, vector<8x8x8xf32>, vector<8x8x8xf32> -> vector<8x8x8xf32>
    "tpu.trace_stop"() : () -> ()
    %158 = vector.extract_strided_slice %157 {offsets = [0, 0, 0], sizes = [2, 8, 8], strides = [1, 1, 1]} : vector<8x8x8xf32> to vector<2x8x8xf32>
    %159 = vector.shape_cast %158 : vector<2x8x8xf32> to vector<16x8xf32>
    %160 = vector.extract_strided_slice %33 {offsets = [0, 0], sizes = [8, 32], strides = [1, 1]} : vector<32x32xf32> to vector<8x32xf32>
    %cst_73 = arith.constant dense<0.000000e+00> : vector<16x32xf32>
    %161 = tpu.matmul %159, %160, %cst_73 {dimension_numbers = #tpu.dot_dimension_numbers<[1], [0], [0], [1], [0, 0, 1, 1], [], []>} : vector<16x8xf32>, vector<8x32xf32>, vector<16x32xf32> -> vector<16x32xf32>
    %162 = vector.broadcast %29 : vector<1x32xf32> to vector<16x32xf32>
    %163 = arith.addf %162, %161 : vector<16x32xf32>
    %164 = vector.extract_strided_slice %157 {offsets = [2, 0, 0], sizes = [2, 8, 8], strides = [1, 1, 1]} : vector<8x8x8xf32> to vector<2x8x8xf32>
    %165 = vector.shape_cast %164 : vector<2x8x8xf32> to vector<16x8xf32>
    %166 = vector.extract_strided_slice %33 {offsets = [8, 0], sizes = [8, 32], strides = [1, 1]} : vector<32x32xf32> to vector<8x32xf32>
    %cst_74 = arith.constant dense<0.000000e+00> : vector<16x32xf32>
    %167 = tpu.matmul %165, %166, %cst_74 {dimension_numbers = #tpu.dot_dimension_numbers<[1], [0], [0], [1], [0, 0, 1, 1], [], []>} : vector<16x8xf32>, vector<8x32xf32>, vector<16x32xf32> -> vector<16x32xf32>
    %168 = arith.addf %163, %167 : vector<16x32xf32>
    %169 = vector.extract_strided_slice %157 {offsets = [4, 0, 0], sizes = [2, 8, 8], strides = [1, 1, 1]} : vector<8x8x8xf32> to vector<2x8x8xf32>
    %170 = vector.shape_cast %169 : vector<2x8x8xf32> to vector<16x8xf32>
    %171 = vector.extract_strided_slice %33 {offsets = [16, 0], sizes = [8, 32], strides = [1, 1]} : vector<32x32xf32> to vector<8x32xf32>
    %cst_75 = arith.constant dense<0.000000e+00> : vector<16x32xf32>
    %172 = tpu.matmul %170, %171, %cst_75 {dimension_numbers = #tpu.dot_dimension_numbers<[1], [0], [0], [1], [0, 0, 1, 1], [], []>} : vector<16x8xf32>, vector<8x32xf32>, vector<16x32xf32> -> vector<16x32xf32>
    %173 = arith.addf %168, %172 : vector<16x32xf32>
    %174 = vector.extract_strided_slice %157 {offsets = [6, 0, 0], sizes = [2, 8, 8], strides = [1, 1, 1]} : vector<8x8x8xf32> to vector<2x8x8xf32>
    %175 = vector.shape_cast %174 : vector<2x8x8xf32> to vector<16x8xf32>
    %176 = vector.extract_strided_slice %33 {offsets = [24, 0], sizes = [8, 32], strides = [1, 1]} : vector<32x32xf32> to vector<8x32xf32>
    %cst_76 = arith.constant dense<0.000000e+00> : vector<16x32xf32>
    %177 = tpu.matmul %175, %176, %cst_76 {dimension_numbers = #tpu.dot_dimension_numbers<[1], [0], [0], [1], [0, 0, 1, 1], [], []>} : vector<16x8xf32>, vector<8x32xf32>, vector<16x32xf32> -> vector<16x32xf32>
    %178 = arith.addf %173, %177 : vector<16x32xf32>
    %179 = arith.addf %85, %178 : vector<16x32xf32>
    %cst_77 = arith.constant dense<0.000000e+00> : vector<16xf32>
    %180 = vector.multi_reduction <add>, %179, %cst_77 [1] : vector<16x32xf32> to vector<16xf32>
    %181 = vector.shape_cast %180 : vector<16xf32> to vector<16x1xf32>
    %cst_78 = arith.constant 3.200000e+01 : f32
    %182 = vector.broadcast %cst_78 : f32 to vector<16x1xf32>
    %183 = arith.divf %181, %182 : vector<16x1xf32>
    %184 = vector.broadcast %183 : vector<16x1xf32> to vector<16x32xf32>
    %185 = arith.subf %179, %184 : vector<16x32xf32>
    %186 = arith.mulf %185, %185 : vector<16x32xf32>
    %cst_79 = arith.constant dense<0.000000e+00> : vector<16xf32>
    %187 = vector.multi_reduction <add>, %186, %cst_79 [1] : vector<16x32xf32> to vector<16xf32>
    %188 = vector.shape_cast %187 : vector<16xf32> to vector<16x1xf32>
    %cst_80 = arith.constant 3.200000e+01 : f32
    %189 = vector.broadcast %cst_80 : f32 to vector<16x1xf32>
    %190 = arith.divf %188, %189 : vector<16x1xf32>
    %cst_81 = arith.constant 9.99999997E-7 : f32
    %191 = vector.broadcast %cst_81 : f32 to vector<16x1xf32>
    %192 = arith.addf %190, %191 : vector<16x1xf32>
    %193 = math.rsqrt %192 : vector<16x1xf32>
    %194 = vector.broadcast %193 : vector<16x1xf32> to vector<16x32xf32>
    %195 = arith.mulf %185, %194 : vector<16x32xf32>
    %196 = vector.broadcast %41 : vector<1x32xf32> to vector<16x32xf32>
    %197 = arith.mulf %195, %196 : vector<16x32xf32>
    %198 = vector.broadcast %40 : vector<1x32xf32> to vector<16x32xf32>
    %199 = arith.addf %197, %198 : vector<16x32xf32>
    %cst_82 = arith.constant dense<0.000000e+00> : vector<16x64xf32>
    %200 = tpu.matmul %199, %44, %cst_82 {dimension_numbers = #tpu.dot_dimension_numbers<[1], [0], [0], [1], [0, 0, 1, 1], [], []>} : vector<16x32xf32>, vector<32x64xf32>, vector<16x64xf32> -> vector<16x64xf32>
    %201 = vector.broadcast %36 : vector<1x64xf32> to vector<16x64xf32>
    %202 = arith.addf %200, %201 : vector<16x64xf32>
    %cst_83 = arith.constant 0.000000e+00 : f32
    %203 = vector.broadcast %cst_83 : f32 to vector<16x64xf32>
    %204 = arith.maximumf %202, %203 : vector<16x64xf32>
    %cst_84 = arith.constant dense<0.000000e+00> : vector<16x32xf32>
    %205 = tpu.matmul %204, %45, %cst_84 {dimension_numbers = #tpu.dot_dimension_numbers<[1], [0], [0], [1], [0, 0, 1, 1], [], []>} : vector<16x64xf32>, vector<64x32xf32>, vector<16x32xf32> -> vector<16x32xf32>
    %206 = vector.broadcast %37 : vector<1x32xf32> to vector<16x32xf32>
    %207 = arith.addf %205, %206 : vector<16x32xf32>
    %208 = arith.addf %179, %207 : vector<16x32xf32>
    %cst_85 = arith.constant dense<0.000000e+00> : vector<16xf32>
    %209 = vector.multi_reduction <add>, %208, %cst_85 [1] : vector<16x32xf32> to vector<16xf32>
    %210 = vector.shape_cast %209 : vector<16xf32> to vector<16x1xf32>
    %cst_86 = arith.constant 3.200000e+01 : f32
    %211 = vector.broadcast %cst_86 : f32 to vector<16x1xf32>
    %212 = arith.divf %210, %211 : vector<16x1xf32>
    %213 = vector.broadcast %212 : vector<16x1xf32> to vector<16x32xf32>
    %214 = arith.subf %208, %213 : vector<16x32xf32>
    %215 = arith.mulf %214, %214 : vector<16x32xf32>
    %cst_87 = arith.constant dense<0.000000e+00> : vector<16xf32>
    %216 = vector.multi_reduction <add>, %215, %cst_87 [1] : vector<16x32xf32> to vector<16xf32>
    %217 = vector.shape_cast %216 : vector<16xf32> to vector<16x1xf32>
    %cst_88 = arith.constant 3.200000e+01 : f32
    %218 = vector.broadcast %cst_88 : f32 to vector<16x1xf32>
    %219 = arith.divf %217, %218 : vector<16x1xf32>
    %cst_89 = arith.constant 9.99999997E-7 : f32
    %220 = vector.broadcast %cst_89 : f32 to vector<16x1xf32>
    %221 = arith.addf %219, %220 : vector<16x1xf32>
    %222 = math.rsqrt %221 : vector<16x1xf32>
    %223 = vector.broadcast %222 : vector<16x1xf32> to vector<16x32xf32>
    %224 = arith.mulf %214, %223 : vector<16x32xf32>
    %225 = vector.broadcast %43 : vector<1x32xf32> to vector<16x32xf32>
    %226 = arith.mulf %224, %225 : vector<16x32xf32>
    %227 = vector.broadcast %42 : vector<1x32xf32> to vector<16x32xf32>
    %228 = arith.addf %226, %227 : vector<16x32xf32>
    %229 = tpu.iota {dimensions = array<i32: 1>} : vector<16x128xi32>
    %230 = vector.broadcast %53 : vector<16x1xi32> to vector<16x128xi32>
    %231 = arith.cmpi eq, %229, %230 : vector<16x128xi32>
    %232 = arith.extui %231 : vector<16x128xi1> to vector<16x128xi32>
    %233 = arith.sitofp %232 : vector<16x128xi32> to vector<16x128xf32>
    %cst_90 = arith.constant dense<0.000000e+00> : vector<16x32xf32>
    %234 = tpu.matmul %233, %50, %cst_90 {dimension_numbers = #tpu.dot_dimension_numbers<[1], [0], [0], [1], [0, 0, 1, 1], [], []>} : vector<16x128xf32>, vector<128x32xf32>, vector<16x32xf32> -> vector<16x32xf32>
    %235 = arith.addf %234, %48 : vector<16x32xf32>
    %cst_91 = arith.constant dense<0.000000e+00> : vector<16xf32>
    %236 = vector.multi_reduction <add>, %235, %cst_91 [1] : vector<16x32xf32> to vector<16xf32>
    %237 = vector.shape_cast %236 : vector<16xf32> to vector<16x1xf32>
    %cst_92 = arith.constant 3.200000e+01 : f32
    %238 = vector.broadcast %cst_92 : f32 to vector<16x1xf32>
    %239 = arith.divf %237, %238 : vector<16x1xf32>
    %240 = vector.broadcast %239 : vector<16x1xf32> to vector<16x32xf32>
    %241 = arith.subf %235, %240 : vector<16x32xf32>
    %242 = arith.mulf %241, %241 : vector<16x32xf32>
    %cst_93 = arith.constant dense<0.000000e+00> : vector<16xf32>
    %243 = vector.multi_reduction <add>, %242, %cst_93 [1] : vector<16x32xf32> to vector<16xf32>
    %244 = vector.shape_cast %243 : vector<16xf32> to vector<16x1xf32>
    %cst_94 = arith.constant 3.200000e+01 : f32
    %245 = vector.broadcast %cst_94 : f32 to vector<16x1xf32>
    %246 = arith.divf %244, %245 : vector<16x1xf32>
    %cst_95 = arith.constant 9.99999997E-7 : f32
    %247 = vector.broadcast %cst_95 : f32 to vector<16x1xf32>
    %248 = arith.addf %246, %247 : vector<16x1xf32>
    %249 = math.rsqrt %248 : vector<16x1xf32>
    %250 = vector.broadcast %249 : vector<16x1xf32> to vector<16x32xf32>
    %251 = arith.mulf %241, %250 : vector<16x32xf32>
    %252 = vector.broadcast %11 : vector<1x32xf32> to vector<16x32xf32>
    %253 = arith.mulf %251, %252 : vector<16x32xf32>
    %254 = vector.broadcast %10 : vector<1x32xf32> to vector<16x32xf32>
    %255 = arith.addf %253, %254 : vector<16x32xf32>
    %cst_96 = arith.constant dense<0.000000e+00> : vector<16x32xf32>
    %256 = tpu.matmul %255, %24, %cst_96 {dimension_numbers = #tpu.dot_dimension_numbers<[1], [0], [0], [1], [0, 0, 1, 1], [], []>} : vector<16x32xf32>, vector<32x32xf32>, vector<16x32xf32> -> vector<16x32xf32>
    %257 = vector.broadcast %20 : vector<1x32xf32> to vector<16x32xf32>
    %258 = arith.addf %256, %257 : vector<16x32xf32>
    %cst_97 = arith.constant dense<0.000000e+00> : vector<16x32xf32>
    %259 = tpu.matmul %255, %22, %cst_97 {dimension_numbers = #tpu.dot_dimension_numbers<[1], [0], [0], [1], [0, 0, 1, 1], [], []>} : vector<16x32xf32>, vector<32x32xf32>, vector<16x32xf32> -> vector<16x32xf32>
    %260 = vector.broadcast %18 : vector<1x32xf32> to vector<16x32xf32>
    %261 = arith.addf %259, %260 : vector<16x32xf32>
    %cst_98 = arith.constant dense<0.000000e+00> : vector<16x32xf32>
    %262 = tpu.matmul %255, %25, %cst_98 {dimension_numbers = #tpu.dot_dimension_numbers<[1], [0], [0], [1], [0, 0, 1, 1], [], []>} : vector<16x32xf32>, vector<32x32xf32>, vector<16x32xf32> -> vector<16x32xf32>
    %263 = vector.broadcast %21 : vector<1x32xf32> to vector<16x32xf32>
    %264 = arith.addf %262, %263 : vector<16x32xf32>
    %265 = vector.extract_strided_slice %258 {offsets = [0, 0], sizes = [16, 8], strides = [1, 1]} : vector<16x32xf32> to vector<16x8xf32>
    %266 = vector.shape_cast %265 : vector<16x8xf32> to vector<2x8x8xf32>
    %267 = vector.extract_strided_slice %258 {offsets = [0, 8], sizes = [16, 8], strides = [1, 1]} : vector<16x32xf32> to vector<16x8xf32>
    %268 = vector.shape_cast %267 : vector<16x8xf32> to vector<2x8x8xf32>
    %269 = vector.extract_strided_slice %258 {offsets = [0, 16], sizes = [16, 8], strides = [1, 1]} : vector<16x32xf32> to vector<16x8xf32>
    %270 = vector.shape_cast %269 : vector<16x8xf32> to vector<2x8x8xf32>
    %271 = vector.extract_strided_slice %258 {offsets = [0, 24], sizes = [16, 8], strides = [1, 1]} : vector<16x32xf32> to vector<16x8xf32>
    %272 = vector.shape_cast %271 : vector<16x8xf32> to vector<2x8x8xf32>
    %273 = tpu.concatenate %266, %268, %270, %272 in 0 : vector<2x8x8xf32>, vector<2x8x8xf32>, vector<2x8x8xf32>, vector<2x8x8xf32> -> vector<8x8x8xf32>
    %274 = vector.extract_strided_slice %261 {offsets = [0, 0], sizes = [16, 8], strides = [1, 1]} : vector<16x32xf32> to vector<16x8xf32>
    %275 = vector.shape_cast %274 : vector<16x8xf32> to vector<2x8x8xf32>
    %276 = vector.extract_strided_slice %261 {offsets = [0, 8], sizes = [16, 8], strides = [1, 1]} : vector<16x32xf32> to vector<16x8xf32>
    %277 = vector.shape_cast %276 : vector<16x8xf32> to vector<2x8x8xf32>
    %278 = vector.extract_strided_slice %261 {offsets = [0, 16], sizes = [16, 8], strides = [1, 1]} : vector<16x32xf32> to vector<16x8xf32>
    %279 = vector.shape_cast %278 : vector<16x8xf32> to vector<2x8x8xf32>
    %280 = vector.extract_strided_slice %261 {offsets = [0, 24], sizes = [16, 8], strides = [1, 1]} : vector<16x32xf32> to vector<16x8xf32>
    %281 = vector.shape_cast %280 : vector<16x8xf32> to vector<2x8x8xf32>
    %282 = tpu.concatenate %275, %277, %279, %281 in 0 : vector<2x8x8xf32>, vector<2x8x8xf32>, vector<2x8x8xf32>, vector<2x8x8xf32> -> vector<8x8x8xf32>
    %283 = vector.extract_strided_slice %264 {offsets = [0, 0], sizes = [16, 8], strides = [1, 1]} : vector<16x32xf32> to vector<16x8xf32>
    %284 = vector.shape_cast %283 : vector<16x8xf32> to vector<2x8x8xf32>
    %285 = vector.extract_strided_slice %264 {offsets = [0, 8], sizes = [16, 8], strides = [1, 1]} : vector<16x32xf32> to vector<16x8xf32>
    %286 = vector.shape_cast %285 : vector<16x8xf32> to vector<2x8x8xf32>
    %287 = vector.extract_strided_slice %264 {offsets = [0, 16], sizes = [16, 8], strides = [1, 1]} : vector<16x32xf32> to vector<16x8xf32>
    %288 = vector.shape_cast %287 : vector<16x8xf32> to vector<2x8x8xf32>
    %289 = vector.extract_strided_slice %264 {offsets = [0, 24], sizes = [16, 8], strides = [1, 1]} : vector<16x32xf32> to vector<16x8xf32>
    %290 = vector.shape_cast %289 : vector<16x8xf32> to vector<2x8x8xf32>
    %291 = tpu.concatenate %284, %286, %288, %290 in 0 : vector<2x8x8xf32>, vector<2x8x8xf32>, vector<2x8x8xf32>, vector<2x8x8xf32> -> vector<8x8x8xf32>
    "tpu.trace_start"() <{level = 10 : i32, message = "bqd,bkd->bqk"}> : () -> ()
    %cst_99 = arith.constant dense<0.000000e+00> : vector<8x8x8xf32>
    %292 = tpu.matmul %273, %282, %cst_99 {dimension_numbers = #tpu.dot_dimension_numbers<[2], [2], [1], [1], [0, 0, 0, 1, 1, 1], [0], [0]>} : vector<8x8x8xf32>, vector<8x8x8xf32>, vector<8x8x8xf32> -> vector<8x8x8xf32>
    "tpu.trace_stop"() : () -> ()
    %cst_100 = arith.constant 0.353553385 : f32
    %293 = vector.broadcast %cst_100 : f32 to vector<8x8x8xf32>
    %294 = arith.mulf %292, %293 : vector<8x8x8xf32>
    %295 = arith.addf %294, %78 : vector<8x8x8xf32>
    %cst_101 = arith.constant dense<0xFF800000> : vector<8x8xf32>
    %296 = vector.multi_reduction <maximumf>, %295, %cst_101 [2] : vector<8x8x8xf32> to vector<8x8xf32>
    %297 = vector.shape_cast %296 : vector<8x8xf32> to vector<8x8x1xf32>
    %298 = vector.broadcast %297 : vector<8x8x1xf32> to vector<8x8x8xf32>
    %299 = arith.subf %295, %298 : vector<8x8x8xf32>
    %300 = math.exp %299 : vector<8x8x8xf32>
    %cst_102 = arith.constant dense<0.000000e+00> : vector<8x8xf32>
    %301 = vector.multi_reduction <add>, %300, %cst_102 [2] : vector<8x8x8xf32> to vector<8x8xf32>
    %302 = vector.shape_cast %301 : vector<8x8xf32> to vector<8x8x1xf32>
    %303 = tpu.reciprocal %302 {approx = true} : vector<8x8x1xf32> -> vector<8x8x1xf32>
    %304 = vector.broadcast %303 : vector<8x8x1xf32> to vector<8x8x8xf32>
    %305 = arith.mulf %300, %304 : vector<8x8x8xf32>
    "tpu.trace_start"() <{level = 10 : i32, message = "bqk,bkd->bqd"}> : () -> ()
    %cst_103 = arith.constant dense<0.000000e+00> : vector<8x8x8xf32>
    %306 = tpu.matmul %305, %291, %cst_103 {dimension_numbers = #tpu.dot_dimension_numbers<[2], [1], [1], [2], [0, 0, 0, 1, 1, 2], [0], [0]>} : vector<8x8x8xf32>, vector<8x8x8xf32>, vector<8x8x8xf32> -> vector<8x8x8xf32>
    "tpu.trace_stop"() : () -> ()
    %307 = vector.extract_strided_slice %306 {offsets = [0, 0, 0], sizes = [2, 8, 8], strides = [1, 1, 1]} : vector<8x8x8xf32> to vector<2x8x8xf32>
    %308 = vector.shape_cast %307 : vector<2x8x8xf32> to vector<16x8xf32>
    %309 = vector.extract_strided_slice %23 {offsets = [0, 0], sizes = [8, 32], strides = [1, 1]} : vector<32x32xf32> to vector<8x32xf32>
    %cst_104 = arith.constant dense<0.000000e+00> : vector<16x32xf32>
    %310 = tpu.matmul %308, %309, %cst_104 {dimension_numbers = #tpu.dot_dimension_numbers<[1], [0], [0], [1], [0, 0, 1, 1], [], []>} : vector<16x8xf32>, vector<8x32xf32>, vector<16x32xf32> -> vector<16x32xf32>
    %311 = vector.broadcast %19 : vector<1x32xf32> to vector<16x32xf32>
    %312 = arith.addf %311, %310 : vector<16x32xf32>
    %313 = vector.extract_strided_slice %306 {offsets = [2, 0, 0], sizes = [2, 8, 8], strides = [1, 1, 1]} : vector<8x8x8xf32> to vector<2x8x8xf32>
    %314 = vector.shape_cast %313 : vector<2x8x8xf32> to vector<16x8xf32>
    %315 = vector.extract_strided_slice %23 {offsets = [8, 0], sizes = [8, 32], strides = [1, 1]} : vector<32x32xf32> to vector<8x32xf32>
    %cst_105 = arith.constant dense<0.000000e+00> : vector<16x32xf32>
    %316 = tpu.matmul %314, %315, %cst_105 {dimension_numbers = #tpu.dot_dimension_numbers<[1], [0], [0], [1], [0, 0, 1, 1], [], []>} : vector<16x8xf32>, vector<8x32xf32>, vector<16x32xf32> -> vector<16x32xf32>
    %317 = arith.addf %312, %316 : vector<16x32xf32>
    %318 = vector.extract_strided_slice %306 {offsets = [4, 0, 0], sizes = [2, 8, 8], strides = [1, 1, 1]} : vector<8x8x8xf32> to vector<2x8x8xf32>
    %319 = vector.shape_cast %318 : vector<2x8x8xf32> to vector<16x8xf32>
    %320 = vector.extract_strided_slice %23 {offsets = [16, 0], sizes = [8, 32], strides = [1, 1]} : vector<32x32xf32> to vector<8x32xf32>
    %cst_106 = arith.constant dense<0.000000e+00> : vector<16x32xf32>
    %321 = tpu.matmul %319, %320, %cst_106 {dimension_numbers = #tpu.dot_dimension_numbers<[1], [0], [0], [1], [0, 0, 1, 1], [], []>} : vector<16x8xf32>, vector<8x32xf32>, vector<16x32xf32> -> vector<16x32xf32>
    %322 = arith.addf %317, %321 : vector<16x32xf32>
    %323 = vector.extract_strided_slice %306 {offsets = [6, 0, 0], sizes = [2, 8, 8], strides = [1, 1, 1]} : vector<8x8x8xf32> to vector<2x8x8xf32>
    %324 = vector.shape_cast %323 : vector<2x8x8xf32> to vector<16x8xf32>
    %325 = vector.extract_strided_slice %23 {offsets = [24, 0], sizes = [8, 32], strides = [1, 1]} : vector<32x32xf32> to vector<8x32xf32>
    %cst_107 = arith.constant dense<0.000000e+00> : vector<16x32xf32>
    %326 = tpu.matmul %324, %325, %cst_107 {dimension_numbers = #tpu.dot_dimension_numbers<[1], [0], [0], [1], [0, 0, 1, 1], [], []>} : vector<16x8xf32>, vector<8x32xf32>, vector<16x32xf32> -> vector<16x32xf32>
    %327 = arith.addf %322, %326 : vector<16x32xf32>
    %328 = arith.addf %235, %327 : vector<16x32xf32>
    %cst_108 = arith.constant dense<0.000000e+00> : vector<16xf32>
    %329 = vector.multi_reduction <add>, %328, %cst_108 [1] : vector<16x32xf32> to vector<16xf32>
    %330 = vector.shape_cast %329 : vector<16xf32> to vector<16x1xf32>
    %cst_109 = arith.constant 3.200000e+01 : f32
    %331 = vector.broadcast %cst_109 : f32 to vector<16x1xf32>
    %332 = arith.divf %330, %331 : vector<16x1xf32>
    %333 = vector.broadcast %332 : vector<16x1xf32> to vector<16x32xf32>
    %334 = arith.subf %328, %333 : vector<16x32xf32>
    %335 = arith.mulf %334, %334 : vector<16x32xf32>
    %cst_110 = arith.constant dense<0.000000e+00> : vector<16xf32>
    %336 = vector.multi_reduction <add>, %335, %cst_110 [1] : vector<16x32xf32> to vector<16xf32>
    %337 = vector.shape_cast %336 : vector<16xf32> to vector<16x1xf32>
    %cst_111 = arith.constant 3.200000e+01 : f32
    %338 = vector.broadcast %cst_111 : f32 to vector<16x1xf32>
    %339 = arith.divf %337, %338 : vector<16x1xf32>
    %cst_112 = arith.constant 9.99999997E-7 : f32
    %340 = vector.broadcast %cst_112 : f32 to vector<16x1xf32>
    %341 = arith.addf %339, %340 : vector<16x1xf32>
    %342 = math.rsqrt %341 : vector<16x1xf32>
    %343 = vector.broadcast %342 : vector<16x1xf32> to vector<16x32xf32>
    %344 = arith.mulf %334, %343 : vector<16x32xf32>
    %345 = vector.broadcast %13 : vector<1x32xf32> to vector<16x32xf32>
    %346 = arith.mulf %344, %345 : vector<16x32xf32>
    %347 = vector.broadcast %12 : vector<1x32xf32> to vector<16x32xf32>
    %348 = arith.addf %346, %347 : vector<16x32xf32>
    %cst_113 = arith.constant dense<0.000000e+00> : vector<16x32xf32>
    %349 = tpu.matmul %348, %8, %cst_113 {dimension_numbers = #tpu.dot_dimension_numbers<[1], [0], [0], [1], [0, 0, 1, 1], [], []>} : vector<16x32xf32>, vector<32x32xf32>, vector<16x32xf32> -> vector<16x32xf32>
    %350 = vector.broadcast %4 : vector<1x32xf32> to vector<16x32xf32>
    %351 = arith.addf %349, %350 : vector<16x32xf32>
    %cst_114 = arith.constant dense<0.000000e+00> : vector<16x32xf32>
    %352 = tpu.matmul %228, %6, %cst_114 {dimension_numbers = #tpu.dot_dimension_numbers<[1], [0], [0], [1], [0, 0, 1, 1], [], []>} : vector<16x32xf32>, vector<32x32xf32>, vector<16x32xf32> -> vector<16x32xf32>
    %353 = vector.broadcast %2 : vector<1x32xf32> to vector<16x32xf32>
    %354 = arith.addf %352, %353 : vector<16x32xf32>
    %cst_115 = arith.constant dense<0.000000e+00> : vector<16x32xf32>
    %355 = tpu.matmul %228, %9, %cst_115 {dimension_numbers = #tpu.dot_dimension_numbers<[1], [0], [0], [1], [0, 0, 1, 1], [], []>} : vector<16x32xf32>, vector<32x32xf32>, vector<16x32xf32> -> vector<16x32xf32>
    %356 = vector.broadcast %5 : vector<1x32xf32> to vector<16x32xf32>
    %357 = arith.addf %355, %356 : vector<16x32xf32>
    %358 = vector.extract_strided_slice %351 {offsets = [0, 0], sizes = [16, 8], strides = [1, 1]} : vector<16x32xf32> to vector<16x8xf32>
    %359 = vector.shape_cast %358 : vector<16x8xf32> to vector<2x8x8xf32>
    %360 = vector.extract_strided_slice %351 {offsets = [0, 8], sizes = [16, 8], strides = [1, 1]} : vector<16x32xf32> to vector<16x8xf32>
    %361 = vector.shape_cast %360 : vector<16x8xf32> to vector<2x8x8xf32>
    %362 = vector.extract_strided_slice %351 {offsets = [0, 16], sizes = [16, 8], strides = [1, 1]} : vector<16x32xf32> to vector<16x8xf32>
    %363 = vector.shape_cast %362 : vector<16x8xf32> to vector<2x8x8xf32>
    %364 = vector.extract_strided_slice %351 {offsets = [0, 24], sizes = [16, 8], strides = [1, 1]} : vector<16x32xf32> to vector<16x8xf32>
    %365 = vector.shape_cast %364 : vector<16x8xf32> to vector<2x8x8xf32>
    %366 = tpu.concatenate %359, %361, %363, %365 in 0 : vector<2x8x8xf32>, vector<2x8x8xf32>, vector<2x8x8xf32>, vector<2x8x8xf32> -> vector<8x8x8xf32>
    %367 = vector.extract_strided_slice %354 {offsets = [0, 0], sizes = [16, 8], strides = [1, 1]} : vector<16x32xf32> to vector<16x8xf32>
    %368 = vector.shape_cast %367 : vector<16x8xf32> to vector<2x8x8xf32>
    %369 = vector.extract_strided_slice %354 {offsets = [0, 8], sizes = [16, 8], strides = [1, 1]} : vector<16x32xf32> to vector<16x8xf32>
    %370 = vector.shape_cast %369 : vector<16x8xf32> to vector<2x8x8xf32>
    %371 = vector.extract_strided_slice %354 {offsets = [0, 16], sizes = [16, 8], strides = [1, 1]} : vector<16x32xf32> to vector<16x8xf32>
    %372 = vector.shape_cast %371 : vector<16x8xf32> to vector<2x8x8xf32>
    %373 = vector.extract_strided_slice %354 {offsets = [0, 24], sizes = [16, 8], strides = [1, 1]} : vector<16x32xf32> to vector<16x8xf32>
    %374 = vector.shape_cast %373 : vector<16x8xf32> to vector<2x8x8xf32>
    %375 = tpu.concatenate %368, %370, %372, %374 in 0 : vector<2x8x8xf32>, vector<2x8x8xf32>, vector<2x8x8xf32>, vector<2x8x8xf32> -> vector<8x8x8xf32>
    %376 = vector.extract_strided_slice %357 {offsets = [0, 0], sizes = [16, 8], strides = [1, 1]} : vector<16x32xf32> to vector<16x8xf32>
    %377 = vector.shape_cast %376 : vector<16x8xf32> to vector<2x8x8xf32>
    %378 = vector.extract_strided_slice %357 {offsets = [0, 8], sizes = [16, 8], strides = [1, 1]} : vector<16x32xf32> to vector<16x8xf32>
    %379 = vector.shape_cast %378 : vector<16x8xf32> to vector<2x8x8xf32>
    %380 = vector.extract_strided_slice %357 {offsets = [0, 16], sizes = [16, 8], strides = [1, 1]} : vector<16x32xf32> to vector<16x8xf32>
    %381 = vector.shape_cast %380 : vector<16x8xf32> to vector<2x8x8xf32>
    %382 = vector.extract_strided_slice %357 {offsets = [0, 24], sizes = [16, 8], strides = [1, 1]} : vector<16x32xf32> to vector<16x8xf32>
    %383 = vector.shape_cast %382 : vector<16x8xf32> to vector<2x8x8xf32>
    %384 = tpu.concatenate %377, %379, %381, %383 in 0 : vector<2x8x8xf32>, vector<2x8x8xf32>, vector<2x8x8xf32>, vector<2x8x8xf32> -> vector<8x8x8xf32>
    "tpu.trace_start"() <{level = 10 : i32, message = "bqd,bkd->bqk"}> : () -> ()
    %cst_116 = arith.constant dense<0.000000e+00> : vector<8x8x8xf32>
    %385 = tpu.matmul %366, %375, %cst_116 {dimension_numbers = #tpu.dot_dimension_numbers<[2], [2], [1], [1], [0, 0, 0, 1, 1, 1], [0], [0]>} : vector<8x8x8xf32>, vector<8x8x8xf32>, vector<8x8x8xf32> -> vector<8x8x8xf32>
    "tpu.trace_stop"() : () -> ()
    %cst_117 = arith.constant 0.353553385 : f32
    %386 = vector.broadcast %cst_117 : f32 to vector<8x8x8xf32>
    %387 = arith.mulf %385, %386 : vector<8x8x8xf32>
    %388 = vector.broadcast %64 : vector<8x1x8xf32> to vector<8x8x8xf32>
    %389 = arith.addf %387, %388 : vector<8x8x8xf32>
    %cst_118 = arith.constant dense<0xFF800000> : vector<8x8xf32>
    %390 = vector.multi_reduction <maximumf>, %389, %cst_118 [2] : vector<8x8x8xf32> to vector<8x8xf32>
    %391 = vector.shape_cast %390 : vector<8x8xf32> to vector<8x8x1xf32>
    %392 = vector.broadcast %391 : vector<8x8x1xf32> to vector<8x8x8xf32>
    %393 = arith.subf %389, %392 : vector<8x8x8xf32>
    %394 = math.exp %393 : vector<8x8x8xf32>
    %cst_119 = arith.constant dense<0.000000e+00> : vector<8x8xf32>
    %395 = vector.multi_reduction <add>, %394, %cst_119 [2] : vector<8x8x8xf32> to vector<8x8xf32>
    %396 = vector.shape_cast %395 : vector<8x8xf32> to vector<8x8x1xf32>
    %397 = tpu.reciprocal %396 {approx = true} : vector<8x8x1xf32> -> vector<8x8x1xf32>
    %398 = vector.broadcast %397 : vector<8x8x1xf32> to vector<8x8x8xf32>
    %399 = arith.mulf %394, %398 : vector<8x8x8xf32>
    "tpu.trace_start"() <{level = 10 : i32, message = "bqk,bkd->bqd"}> : () -> ()
    %cst_120 = arith.constant dense<0.000000e+00> : vector<8x8x8xf32>
    %400 = tpu.matmul %399, %384, %cst_120 {dimension_numbers = #tpu.dot_dimension_numbers<[2], [1], [1], [2], [0, 0, 0, 1, 1, 2], [0], [0]>} : vector<8x8x8xf32>, vector<8x8x8xf32>, vector<8x8x8xf32> -> vector<8x8x8xf32>
    "tpu.trace_stop"() : () -> ()
    %401 = vector.extract_strided_slice %400 {offsets = [0, 0, 0], sizes = [2, 8, 8], strides = [1, 1, 1]} : vector<8x8x8xf32> to vector<2x8x8xf32>
    %402 = vector.shape_cast %401 : vector<2x8x8xf32> to vector<16x8xf32>
    %403 = vector.extract_strided_slice %7 {offsets = [0, 0], sizes = [8, 32], strides = [1, 1]} : vector<32x32xf32> to vector<8x32xf32>
    %cst_121 = arith.constant dense<0.000000e+00> : vector<16x32xf32>
    %404 = tpu.matmul %402, %403, %cst_121 {dimension_numbers = #tpu.dot_dimension_numbers<[1], [0], [0], [1], [0, 0, 1, 1], [], []>} : vector<16x8xf32>, vector<8x32xf32>, vector<16x32xf32> -> vector<16x32xf32>
    %405 = vector.broadcast %3 : vector<1x32xf32> to vector<16x32xf32>
    %406 = arith.addf %405, %404 : vector<16x32xf32>
    %407 = vector.extract_strided_slice %400 {offsets = [2, 0, 0], sizes = [2, 8, 8], strides = [1, 1, 1]} : vector<8x8x8xf32> to vector<2x8x8xf32>
    %408 = vector.shape_cast %407 : vector<2x8x8xf32> to vector<16x8xf32>
    %409 = vector.extract_strided_slice %7 {offsets = [8, 0], sizes = [8, 32], strides = [1, 1]} : vector<32x32xf32> to vector<8x32xf32>
    %cst_122 = arith.constant dense<0.000000e+00> : vector<16x32xf32>
    %410 = tpu.matmul %408, %409, %cst_122 {dimension_numbers = #tpu.dot_dimension_numbers<[1], [0], [0], [1], [0, 0, 1, 1], [], []>} : vector<16x8xf32>, vector<8x32xf32>, vector<16x32xf32> -> vector<16x32xf32>
    %411 = arith.addf %406, %410 : vector<16x32xf32>
    %412 = vector.extract_strided_slice %400 {offsets = [4, 0, 0], sizes = [2, 8, 8], strides = [1, 1, 1]} : vector<8x8x8xf32> to vector<2x8x8xf32>
    %413 = vector.shape_cast %412 : vector<2x8x8xf32> to vector<16x8xf32>
    %414 = vector.extract_strided_slice %7 {offsets = [16, 0], sizes = [8, 32], strides = [1, 1]} : vector<32x32xf32> to vector<8x32xf32>
    %cst_123 = arith.constant dense<0.000000e+00> : vector<16x32xf32>
    %415 = tpu.matmul %413, %414, %cst_123 {dimension_numbers = #tpu.dot_dimension_numbers<[1], [0], [0], [1], [0, 0, 1, 1], [], []>} : vector<16x8xf32>, vector<8x32xf32>, vector<16x32xf32> -> vector<16x32xf32>
    %416 = arith.addf %411, %415 : vector<16x32xf32>
    %417 = vector.extract_strided_slice %400 {offsets = [6, 0, 0], sizes = [2, 8, 8], strides = [1, 1, 1]} : vector<8x8x8xf32> to vector<2x8x8xf32>
    %418 = vector.shape_cast %417 : vector<2x8x8xf32> to vector<16x8xf32>
    %419 = vector.extract_strided_slice %7 {offsets = [24, 0], sizes = [8, 32], strides = [1, 1]} : vector<32x32xf32> to vector<8x32xf32>
    %cst_124 = arith.constant dense<0.000000e+00> : vector<16x32xf32>
    %420 = tpu.matmul %418, %419, %cst_124 {dimension_numbers = #tpu.dot_dimension_numbers<[1], [0], [0], [1], [0, 0, 1, 1], [], []>} : vector<16x8xf32>, vector<8x32xf32>, vector<16x32xf32> -> vector<16x32xf32>
    %421 = arith.addf %416, %420 : vector<16x32xf32>
    %422 = arith.addf %328, %421 : vector<16x32xf32>
    %cst_125 = arith.constant dense<0.000000e+00> : vector<16xf32>
    %423 = vector.multi_reduction <add>, %422, %cst_125 [1] : vector<16x32xf32> to vector<16xf32>
    %424 = vector.shape_cast %423 : vector<16xf32> to vector<16x1xf32>
    %cst_126 = arith.constant 3.200000e+01 : f32
    %425 = vector.broadcast %cst_126 : f32 to vector<16x1xf32>
    %426 = arith.divf %424, %425 : vector<16x1xf32>
    %427 = vector.broadcast %426 : vector<16x1xf32> to vector<16x32xf32>
    %428 = arith.subf %422, %427 : vector<16x32xf32>
    %429 = arith.mulf %428, %428 : vector<16x32xf32>
    %cst_127 = arith.constant dense<0.000000e+00> : vector<16xf32>
    %430 = vector.multi_reduction <add>, %429, %cst_127 [1] : vector<16x32xf32> to vector<16xf32>
    %431 = vector.shape_cast %430 : vector<16xf32> to vector<16x1xf32>
    %cst_128 = arith.constant 3.200000e+01 : f32
    %432 = vector.broadcast %cst_128 : f32 to vector<16x1xf32>
    %433 = arith.divf %431, %432 : vector<16x1xf32>
    %cst_129 = arith.constant 9.99999997E-7 : f32
    %434 = vector.broadcast %cst_129 : f32 to vector<16x1xf32>
    %435 = arith.addf %433, %434 : vector<16x1xf32>
    %436 = math.rsqrt %435 : vector<16x1xf32>
    %437 = vector.broadcast %436 : vector<16x1xf32> to vector<16x32xf32>
    %438 = arith.mulf %428, %437 : vector<16x32xf32>
    %439 = vector.broadcast %15 : vector<1x32xf32> to vector<16x32xf32>
    %440 = arith.mulf %438, %439 : vector<16x32xf32>
    %441 = vector.broadcast %14 : vector<1x32xf32> to vector<16x32xf32>
    %442 = arith.addf %440, %441 : vector<16x32xf32>
    %cst_130 = arith.constant dense<0.000000e+00> : vector<16x64xf32>
    %443 = tpu.matmul %442, %26, %cst_130 {dimension_numbers = #tpu.dot_dimension_numbers<[1], [0], [0], [1], [0, 0, 1, 1], [], []>} : vector<16x32xf32>, vector<32x64xf32>, vector<16x64xf32> -> vector<16x64xf32>
    %444 = vector.broadcast %0 : vector<1x64xf32> to vector<16x64xf32>
    %445 = arith.addf %443, %444 : vector<16x64xf32>
    %cst_131 = arith.constant 0.000000e+00 : f32
    %446 = vector.broadcast %cst_131 : f32 to vector<16x64xf32>
    %447 = arith.maximumf %445, %446 : vector<16x64xf32>
    %cst_132 = arith.constant dense<0.000000e+00> : vector<16x32xf32>
    %448 = tpu.matmul %447, %27, %cst_132 {dimension_numbers = #tpu.dot_dimension_numbers<[1], [0], [0], [1], [0, 0, 1, 1], [], []>} : vector<16x64xf32>, vector<64x32xf32>, vector<16x32xf32> -> vector<16x32xf32>
    %449 = vector.broadcast %1 : vector<1x32xf32> to vector<16x32xf32>
    %450 = arith.addf %448, %449 : vector<16x32xf32>
    %451 = arith.addf %422, %450 : vector<16x32xf32>
    %cst_133 = arith.constant dense<0.000000e+00> : vector<16xf32>
    %452 = vector.multi_reduction <add>, %451, %cst_133 [1] : vector<16x32xf32> to vector<16xf32>
    %453 = vector.shape_cast %452 : vector<16xf32> to vector<16x1xf32>
    %cst_134 = arith.constant 3.200000e+01 : f32
    %454 = vector.broadcast %cst_134 : f32 to vector<16x1xf32>
    %455 = arith.divf %453, %454 : vector<16x1xf32>
    %456 = vector.broadcast %455 : vector<16x1xf32> to vector<16x32xf32>
    %457 = arith.subf %451, %456 : vector<16x32xf32>
    %458 = arith.mulf %457, %457 : vector<16x32xf32>
    %cst_135 = arith.constant dense<0.000000e+00> : vector<16xf32>
    %459 = vector.multi_reduction <add>, %458, %cst_135 [1] : vector<16x32xf32> to vector<16xf32>
    %460 = vector.shape_cast %459 : vector<16xf32> to vector<16x1xf32>
    %cst_136 = arith.constant 3.200000e+01 : f32
    %461 = vector.broadcast %cst_136 : f32 to vector<16x1xf32>
    %462 = arith.divf %460, %461 : vector<16x1xf32>
    %cst_137 = arith.constant 9.99999997E-7 : f32
    %463 = vector.broadcast %cst_137 : f32 to vector<16x1xf32>
    %464 = arith.addf %462, %463 : vector<16x1xf32>
    %465 = math.rsqrt %464 : vector<16x1xf32>
    %466 = vector.broadcast %465 : vector<16x1xf32> to vector<16x32xf32>
    %467 = arith.mulf %457, %466 : vector<16x32xf32>
    %468 = vector.broadcast %17 : vector<1x32xf32> to vector<16x32xf32>
    %469 = arith.mulf %467, %468 : vector<16x32xf32>
    %470 = vector.broadcast %16 : vector<1x32xf32> to vector<16x32xf32>
    %471 = arith.addf %469, %470 : vector<16x32xf32>
    %cst_138 = arith.constant dense<0.000000e+00> : vector<16x128xf32>
    %472 = tpu.matmul %471, %47, %cst_138 {dimension_numbers = #tpu.dot_dimension_numbers<[1], [0], [0], [1], [0, 0, 1, 1], [], []>} : vector<16x32xf32>, vector<32x128xf32>, vector<16x128xf32> -> vector<16x128xf32>
    %473 = vector.broadcast %46 : vector<1x128xf32> to vector<16x128xf32>
    %474 = arith.addf %472, %473 : vector<16x128xf32>
    %c0_139 = arith.constant 0 : index
    %c0_140 = arith.constant 0 : index
    %475 = vector.load %arg3[%c0_139, %c0_140] : memref<16x128xf32, #tpu.memory_space<vmem>>, vector<16x128xf32>
    tpu.vector_store %arg3[%c0_139, %c0_140], %474 {strides = array<i32>} : memref<16x128xf32, #tpu.memory_space<vmem>>, vector<16x128xf32>,
    %cst_141 = arith.constant dense<0xFF800000> : vector<16xf32>
    %476 = vector.multi_reduction <maximumf>, %474, %cst_141 [1] : vector<16x128xf32> to vector<16xf32>
    %477 = vector.shape_cast %476 : vector<16xf32> to vector<16x1xf32>
    %478 = vector.broadcast %477 : vector<16x1xf32> to vector<16x128xf32>
    %479 = arith.subf %474, %478 : vector<16x128xf32>
    %480 = math.exp %479 : vector<16x128xf32>
    %cst_142 = arith.constant dense<0.000000e+00> : vector<16xf32>
    %481 = vector.multi_reduction <add>, %480, %cst_142 [1] : vector<16x128xf32> to vector<16xf32>
    %482 = vector.shape_cast %481 : vector<16xf32> to vector<16x1xf32>
    %483 = math.log %482 : vector<16x1xf32>
    %484 = tpu.iota {dimensions = array<i32: 1>} : vector<16x128xi32>
    %485 = vector.broadcast %54 : vector<16x1xi32> to vector<16x128xi32>
    %486 = arith.cmpi eq, %484, %485 : vector<16x128xi32>
    %487 = arith.extui %486 : vector<16x128xi1> to vector<16x128xi32>
    %488 = arith.sitofp %487 : vector<16x128xi32> to vector<16x128xf32>
    %489 = arith.mulf %479, %488 : vector<16x128xf32>
    %cst_143 = arith.constant dense<0.000000e+00> : vector<16xf32>
    %490 = vector.multi_reduction <add>, %489, %cst_143 [1] : vector<16x128xf32> to vector<16xf32>
    %491 = vector.shape_cast %490 : vector<16xf32> to vector<16x1xf32>
    %492 = arith.subf %483, %491 : vector<16x1xf32>
    %493 = arith.mulf %492, %56 : vector<16x1xf32>
    %494 = vector.shape_cast %493 : vector<16x1xf32> to vector<1x16x1xf32>
    %cst_144 = arith.constant dense<0.000000e+00> : vector<1xf32>
    %495 = vector.multi_reduction <add>, %494, %cst_144 [1, 2] : vector<1x16x1xf32> to vector<1xf32>
    %496 = vector.shape_cast %495 : vector<1xf32> to vector<1x1x1xf32>
    %497 = vector.extract %496[0, 0, 0] : f32 from vector<1x1x1xf32>
    %498 = vector.shape_cast %56 : vector<16x1xf32> to vector<1x16x1xf32>
    %cst_145 = arith.constant dense<0.000000e+00> : vector<1xf32>
    %499 = vector.multi_reduction <add>, %498, %cst_145 [1, 2] : vector<1x16x1xf32> to vector<1xf32>
    %500 = vector.shape_cast %499 : vector<1xf32> to vector<1x1x1xf32>
    %501 = vector.extract %500[0, 0, 0] : f32 from vector<1x1x1xf32>
    %cst_146 = arith.constant 1.000000e+00 : f32
    %502 = arith.maximumf %501, %cst_146 : f32
    %503 = arith.divf %497, %502 : f32
    %504 = vector.broadcast %503 : f32 to vector<1x1xf32>
    %c0_147 = arith.constant 0 : index
    %c0_148 = arith.constant 0 : index
    %505 = vector.load %arg4[%c0_147, %c0_148] : memref<1x1xf32, #tpu.memory_space<vmem>>, vector<1x1xf32>
    tpu.vector_store %arg4[%c0_147, %c0_148], %504 {strides = array<i32>} : memref<1x1xf32, #tpu.memory_space<vmem>>, vector<1x1xf32>,
    return
  }
}

</mosaic_0001>

<bundles_post_ra>
// kernel: seq2seq_forward.1
= control target key start
LH: loop header
LB: loop body
LE: loop exit
PB: predicated region body
PF: predicated region fallthrough
CT: control target
= control target key end

     0   :  { %10 = vsyncpa [#allocation3], 0  ;;  %s9117_s0 = inlined_call_operand.vmem [shape: s32[16,4], index: 0, kind: input, shape index: {}]   ;;  %s9118_s1 = inlined_call_operand.vmem [shape: f32[2,2,8], index: 1, kind: input, shape index: {}]   ;;  %s9119_s2 = inlined_call_operand.hbm [shape: f32[1016,128], index: 2, kind: input, shape index: {}]   ;;  %s9120_s3 = inlined_call_operand.hbm [shape: f32[16,128], index: 3, kind: output, shape index: {0}]   ;;  %s9121_s4 = inlined_call_operand.hbm [shape: f32[1,1], index: 4, kind: output, shape index: {1}]  }
   0x1   :  { %11 = vsyncpa [#allocation4], 0 }
   0x2   :  { %12 = vsyncpa [#allocation7], 0  ;;  %s8347_s15 = smov [#allocation2]   ;;  %s8275_s19 = scalar_lea.hbm %s9119_s2, 16256 }
   0x3   :  { %s22_s16 = sshll.u32 %s8347_s15, 4  ;;  %p8276_p0 = scmp.ne.s32.totalorder %s9119_s2, %s8275_s19  ;;  %s23_s16 = int_to_ptr.vmem [resolvable:$true] %s22_s16 }
   0x4   :  { %p8279_p1 = scmp.lt.u32.totalorder %s8275_s19, %s9119_s2 }
   0x6   :  { %p8281_p2 = pnand %p8279_p1, %p8276_p0 }
   0x8   :  { %8284 = shalt.err (!%p8281_p2)
}
   0x9   :  { %s8285_s24 = scalar_lea.vmem %s23_s16, 16256  ;;  %p8290_p4 = scmp.lt.s32.totalorder %s23_s16, %s23_s16 }
   0xa   :  { %p8286_p3 = scmp.ne.s32.totalorder %s23_s16, %s8285_s24  ;;  %p8291_p5 = scmp.lt.s32.totalorder %s8285_s24, %s8285_s24 }
   0xc   :  { %p8292_p6 = por %p8291_p5, %p8290_p4 }
   0xe   :  { %p8293_p7 = pnand %p8292_p6, %p8286_p3 }
  0x10   :  { %8296 = shalt.err (!%p8293_p7)
}
  0x11   :  { %s8348_s25 = smov 128   ;;  %s8349_s26 = smov 8  }
  0x12   :  { %28 = dma.hbm_to_vmem [thread:$0]  %s9119_s2, 16256, %s23_s16, [#allocation3], %s8348_s25, %s8348_s25, %s8349_s26  }
  0x13   :  { %8341 = dma.done.wait [#allocation3], 16256  }
  0x14   :  { %8342 = vsyncadd [#allocation3], 4294951040  ;;  %v8350_v0 = vmov 0   ;;  %v8406_v1 = vld [vmem:[%s9117_s0] sm:$0xff]  ;;  %v143_v2 = vld [vmem:[#allocation2 + $0x378] sm:$0xff]  ;;  %v169_v27 = vlaneseq  ;;  %v8351_v30 = vmov 1.0  }
  0x15   :  { %8134 = vset.pattern.permute.xlu0 %v8350_v0  ;;  %v144_v3 = vld [vmem:[#allocation2 + $0x380] sm:$0xff]  ;;  %v145_v4 = vld [vmem:[#allocation2 + $0x388] sm:$0xff]  ;;  %v146_v5 = vld [vmem:[#allocation2 + $0x390] sm:$0xff]  ;;  %vm277_vm2 = vcmask 261120   ;;  %vm8353_vm3 = vmmov 0   ;;  %s8354_s2 = smov 120  }
  0x16   :  { %191 = vperm.xlu0 %8134, %v8406_v1   ;;  %v8412_v6 = vld [vmem:[%s9117_s0 + $0x8] sm:$0xff]  ;;  %v8414_v7 = vpack.c.bf16 %v144_v3, %v143_v2  ;;  %v8416_v8 = vpack.c.bf16 %v146_v5, %v145_v4  ;;  %v147_v9 = vld [vmem:[#allocation2 + $0x398] sm:$0xff]  ;;  %v148_v10 = vld [vmem:[#allocation2 + $0x3a0] sm:$0xff]  ;;  %v8448_v28 = vand.u32 127, %v169_v27  ;;  %vm608_vm4 = vcmask 64512   ;;  %s8355_s7 = smov 112  }
  0x17   :  { %v8422_v11 = vpack.c.bf16 %v148_v10, %v147_v9  ;;  %v149_v12 = vld [vmem:[#allocation2 + $0x3a8] sm:$0xff]  ;;  %v150_v13 = vld [vmem:[#allocation2 + $0x3b0] sm:$0xff]  ;;  %v151_v15 = vld [vmem:[#allocation2 + $0x3b8] sm:$0xff]  ;;  %s8356_s8 = smov 104   ;;  %vm2364_vm7 = vcmask 523264   ;;  %vm6858_vm11 = vcmask 7168  }
  0x18   :  { %7897 = vmatprep.subr.bf16.mxu0 %v8414_v7  ;;  %v8426_v14 = vpack.c.bf16 %v150_v13, %v149_v12  ;;  %v152_v16 = vld [vmem:[#allocation2 + $0x3c0] sm:$0xff]  ;;  %v153_v18 = vld [vmem:[#allocation2 + $0x3c8] sm:$0xff]  ;;  %v154_v19 = vld [vmem:[#allocation2 + $0x3d0] sm:$0xff]  ;;  %s8360_s16 = smov [#allocation5]  }
  0x19   :  { %7899 = vmatpush3.bf16.msra.mxu0 %v8414_v7  ;;  %v8430_v17 = vpack.c.bf16 %v152_v16, %v151_v15  ;;  %v8434_v20 = vpack.c.bf16 %v154_v19, %v153_v18  ;;  %v155_v21 = vld [vmem:[#allocation2 + $0x3d8] sm:$0xff]  ;;  %v156_v22 = vld [vmem:[#allocation2 + $0x3e0] sm:$0xff]  ;;  %v157_v24 = vld [vmem:[#allocation2 + $0x3e8] sm:$0xff]  ;;  %s6904_s17 = sshll.u32 %s8360_s16, 4  ;;  %s6905_s17 = int_to_ptr.vmem [resolvable:$true] %s6904_s17 }
  0x1a   :  { %194 = vperm.xlu0 %8134, %v8412_v6   ;;  %7901 = vmatprep.subr.bf16.mxu0 %v8416_v8  ;;  %v8438_v23 = vpack.c.bf16 %v156_v22, %v155_v21  ;;  %v158_v25 = vld [vmem:[#allocation2 + $0x3f0] sm:$0xff]  ;;  %v141_v32 = vld [vmem:[#allocation2 + $0x368] sm:$0xff]  ;;  %v107_v51 = vld [vmem:[#allocation2 + $0x258] sm:$0xff]  ;;  %s8297_s18 = scalar_lea.vmem %s6905_s17, 256  ;;  %p8302_p9 = scmp.lt.s32.totalorder %s6905_s17, %s6905_s17 }
  0x1b   :  { %v8442_v26 = vpack.c.bf16 %v158_v25, %v157_v24  ;;  %v142_v34 = vld [vmem:[#allocation2 + $0x370] sm:$0xff]  ;;  %v108_v52 = vld [vmem:[#allocation2 + $0x260] sm:$0xff]  ;;  %v109_v54 = vld [vmem:[#allocation2 + $0x268] sm:$0xff]  ;;  %p8298_p8 = scmp.ne.s32.totalorder %s6905_s17, %s8297_s18  ;;  %p8303_p10 = scmp.lt.s32.totalorder %s8297_s18, %s8297_s18 }
  0x1c   :  { %v106_v50 = vld [vmem:[#allocation2 + $0x250] sm:$0xff]  ;;  %v7932_v55 = vpack.c.bf16 %v109_v54, %v108_v52  ;;  %v99_v57 = vld [vmem:[#allocation2 + $0x218] sm:$0xff]  ;;  %v6935_v3 = vld [vmem:[#allocation2 + $0x2a8] ss:$0 sm:$0xff] }
  0x1d   :  { %7903 = vmatpush3.bf16.msra.mxu0 %v8416_v8  ;;  %v7928_v53 = vpack.c.bf16 %v107_v51, %v106_v50  ;;  %v98_v56 = vld [vmem:[#allocation2 + $0x210] sm:$0xff]  ;;  %v6936_v5 = vld [vmem:[#allocation2 + $0x2a0] ss:$0 sm:$0xff]  ;;  %v101_v16 = vld [vmem:[#allocation2 + $0x228] sm:$0xff]  ;;  %p8304_p11 = por %p8303_p10, %p8302_p9 }
  0x1e   :  { %7905 = vmatprep.subr.bf16.mxu0 %v8422_v11  ;;  %v7936_v58 = vpack.c.bf16 %v99_v57, %v98_v56  ;;  %v100_v15 = vld [vmem:[#allocation2 + $0x220] sm:$0xff]  ;;  %v110_v22 = vld [vmem:[#allocation2 + $0x270] sm:$0xff]  ;;  %v111_v24 = vld [vmem:[#allocation2 + $0x278] sm:$0xff] }
  0x1f   :  { %7929 = vmatprep.subr.bf16.mxu1 %v7928_v53  ;;  %v7940_v21 = vpack.c.bf16 %v101_v16, %v100_v15  ;;  %v7944_v25 = vpack.c.bf16 %v111_v24, %v110_v22  ;;  %v6943_v57 = vld [vmem:[#allocation2 + $0x208] ss:$0 sm:$0xff]  ;;  %p8305_p12 = pnand %p8304_p11, %p8298_p8 }
  0x20   :  { %7931 = vmatpush3.bf16.msra.mxu1 %v7928_v53 }
  0x21   :  { %7907 = vmatpush3.bf16.msra.mxu0 %v8422_v11  ;;  %7933 = vmatprep.subr.bf16.mxu1 %v7932_v55 }
  0x22   :  { %7909 = vmatprep.subr.bf16.mxu0 %v8426_v14 }
  0x24   :  { %7935 = vmatpush3.bf16.msra.mxu1 %v7932_v55 }
  0x25   :  { %7911 = vmatpush3.bf16.msra.mxu0 %v8426_v14  ;;  %7937 = vmatprep.subr.bf16.mxu1 %v7936_v58 }
  0x26   :  { %7913 = vmatprep.subr.bf16.mxu0 %v8430_v17 }
  0x29   :  { %7915 = vmatpush3.bf16.msra.mxu0 %v8430_v17 }
  0x2a   :  { %7917 = vmatprep.subr.bf16.mxu0 %v8434_v20 }
  0x2d   :  { %7919 = vmatpush3.bf16.msra.mxu0 %v8434_v20 }
  0x2e   :  { %7921 = vmatprep.subr.bf16.mxu0 %v8438_v23 }
  0x31   :  { %7923 = vmatpush3.bf16.msra.mxu0 %v8438_v23 }
  0x32   :  { %7925 = vmatprep.subr.bf16.mxu0 %v8442_v26 }
  0x35   :  { %7927 = vmatpush3.bf16.msra.mxu0 %v8442_v26 }
  0x95   :  { %v192_v29 = vpop.permute.xlu0 %191 }
  0x96   :  { %vm196_vm0 = vcmp.eq.s32.totalorder %v8448_v28, %v192_v29  ;;  %v112_v29 = vld [vmem:[#allocation2 + $0x280] sm:$0xff] }
  0x97   :  { %7388 = vmatprep.mubr.msk.f32.mxu0 %vm196_vm0, %v8351_v30 }
  0x99   :  { %v195_v31 = vpop.permute.xlu0 %194 }
  0x9a   :  { %vm197_vm1 = vcmp.eq.s32.totalorder %v8448_v28, %v195_v31  ;;  %v113_v31 = vld [vmem:[#allocation2 + $0x288] sm:$0xff] }
  0x9b   :  { %7389 = vmatmul.mubr.msk.f32.vlgmr.msra.gmra.mrb[0].mxu0 %vm197_vm1, %v8351_v30 }
 0x16e   :  { %v7390_v33 = vpop.f32.mrb[0].mxu0 }
 0x16f   :  { %v268_v35 = vpop.f32.mrb[1].mxu0  ;;  %v8456_v37 = vadd.f32 %v7390_v33, %v142_v34  ;;  %v8352_v33 = vmov 0.0   ;;  %v6937_v34 = vld [vmem:[#allocation2 + $0x200] ss:$0 sm:$0xff] }
 0x170   :  { %v8454_v36 = vadd.f32 %v268_v35, %v141_v32  ;;  %v7948_v32 = vpack.c.bf16 %v113_v31, %v112_v29  ;;  %7434 = vmatprep.subr.mxu0 %v8352_v33  ;;  %7436 = vmatprep.mubr.msk.f32.mxu0 %vm8353_vm3, %v8352_v33 }
 0x171   :  { %v281_v39 = vsel %vm277_vm2, %v8456_v37, 0.0 }
 0x172   :  { %v278_v38 = vsel %vm277_vm2, %v8454_v36, 0.0 }
 0x173   :  { %279 = vadd.xlane.f32.xlu1 %v278_v38 }
 0x177   :  { %282 = vadd.xlane.f32.xlu1 %v281_v39 }
 0x200   :  { %v280_v40 = vpop.xlane.xlu1 %279 }
 0x201   :  { %v285_v41 = vmul.f32 0.03125, %v280_v40 }
 0x203   :  { %v287_v42 = vsub.f32 %v8454_v36, %v285_v41  ;;  %v6940_v41 = vld [vmem:[#allocation2 + $0x1f0] ss:$0 sm:$0xff] }
 0x204   :  { %v283_v43 = vpop.xlane.xlu1 %282 }
 0x205   :  { %v286_v44 = vmul.f32 0.03125, %v283_v43  ;;  %v289_v45 = vmul.f32 %v287_v42, %v287_v42 }
 0x207   :  { %v288_v46 = vsub.f32 %v8456_v37, %v286_v44  ;;  %v291_v47 = vsel %vm277_vm2, %v289_v45, 0.0 }
 0x208   :  { %292 = vadd.xlane.f32.xlu0 %v291_v47 }
 0x209   :  { %v290_v48 = vmul.f32 %v288_v46, %v288_v46 }
 0x20b   :  { %v294_v49 = vsel %vm277_vm2, %v290_v48, 0.0 }
 0x20c   :  { %295 = vadd.xlane.f32.xlu1 %v294_v49 }
 0x295   :  { %v293_v59 = vpop.xlane.xlu0 %292 }
 0x296   :  { %v297_v60 = vmul.f32 0.03125, %v293_v59 }
 0x298   :  { %v299_v61 = vadd.f32 1e-06, %v297_v60 }
 0x299   :  { %v296_v62 = vpop.xlane.xlu1 %295 }
 0x29a   :  { %8139 = vrsqrt.f32 %v299_v61  ;;  %v298_v63 = vmul.f32 0.03125, %v296_v62 }
 0x29c   :  { %v300_v0 = vadd.f32 1e-06, %v298_v63  ;;  %v8541_v63 = vld [vmem:[%s9118_s1] sm:$0x3] }
 0x29e   :  { %8141 = vrsqrt.f32 %v300_v0  ;;  %v8544_v0 = vshrl.u32 %v169_v27, 7 }
 0x2a0   :  { %vm173_vm8 = vcmp.le.s32.totalorder %v8448_v28, %v8544_v0 }
 0x2a4   :  { %v8140_v2 = vpop.eup %8139 }
 0x2a5   :  { %v303_v4 = vmul.f32 %v8140_v2, %v287_v42  ;;  %v165_v2 = vsub.f32 1.0, %v8541_v63 }
 0x2a7   :  { %v309_v9 = vmul.f32 %v6935_v3, %v303_v4  ;;  %v1211_v4 = vsub.s32 0, %v8544_v0 }
 0x2a8   :  { %v8142_v10 = vpop.eup %8141 }
 0x2a9   :  { %v304_v12 = vmul.f32 %v8142_v10, %v288_v46  ;;  %v315_v13 = vadd.f32 %v6936_v5, %v309_v9 }
 0x2ab   :  { %v310_v18 = vmul.f32 %v6935_v3, %v304_v12  ;;  %7399 = vmatprep.mubr.msk.f32.mxu1 %vm277_vm2, %v315_v13  ;;  %v8550_v3 = vld [vmem:[%s9118_s1 + $0x2] sm:$0x3] }
 0x2ac   :  { %v166_v9 = vsub.f32 1.0, %v8550_v3 }
 0x2ad   :  { %v316_v19 = vadd.f32 %v6936_v5, %v310_v18  ;;  %v167_v5 = vmul.f32 -1e+09, %v165_v2 }
 0x2ae   :  { %v168_v12 = vmul.f32 -1e+09, %v166_v9 }
 0x2af   :  { %7400 = vmatmul.mubr.msk.f32.vlgmr.msra.gmra.mrb[0].mxu1 %vm277_vm2, %v316_v19  ;;  %v8554_v10 = vrot.slane %v167_v5, %v1211_v4 }
 0x2b0   :  { %7939 = vmatpush3.bf16.msra.mxu1 %v7936_v58  ;;  %7410 = vmatprep.mubr.msk.f32.mxu1 %vm277_vm2, %v315_v13  ;;  %v8557_v18 = vrot.slane %v168_v12, %v1211_v4 }
 0x2b1   :  { %7941 = vmatprep.subr.bf16.mxu1 %v7940_v21 }
 0x2b4   :  { %7943 = vmatpush3.bf16.msra.mxu1 %v7940_v21 }
 0x2b5   :  { %7945 = vmatprep.subr.bf16.mxu1 %v7944_v25 }
 0x2b7   :  { %7411 = vmatmul.mubr.msk.f32.vlgmr.msra.gmra.mrb[2].mxu1 %vm277_vm2, %v316_v19 }
 0x2b8   :  { %7947 = vmatpush3.bf16.msra.mxu1 %v7944_v25  ;;  %7421 = vmatprep.mubr.msk.f32.mxu1 %vm277_vm2, %v315_v13 }
 0x2b9   :  { %7949 = vmatprep.subr.bf16.mxu1 %v7948_v32 }
 0x2bc   :  { %7951 = vmatpush3.bf16.msra.mxu1 %v7948_v32 }
 0x2bd   :  { %7424 = vmatprep.subr.mxu1 %v8352_v33 }
 0x2bf   :  { %7422 = vmatmul.mubr.msk.f32.vlgmr.msra.gmra.mrb[4].mxu1 %vm277_vm2, %v316_v19 }
 0x2c0   :  { %7426 = vmatprep.mubr.msk.f32.mxu1 %vm8353_vm3, %v8352_v33 }
 0x382   :  { %v7401_v35 = vpop.f32.mrb[0].mxu1 }
 0x383   :  { %v399_v38 = vadd.f32 %v7401_v35, %v6937_v34  ;;  %v393_v39 = vpop.f32.mrb[1].mxu1 }
 0x384   :  { %v394_v40 = vadd.f32 %v6937_v34, %v393_v39 }
 0x385   :  { %564 = vrot.lane.b32.xlu1 %v399_v38, %s8354_s2 }
 0x389   :  { %562 = vrot.lane.b32.xlu1 %v394_v40, %s8354_s2 }
 0x38a   :  { %v7412_v42 = vpop.f32.mrb[2].mxu1 }
 0x38b   :  { %v478_v43 = vadd.f32 %v7412_v42, %v6940_v41  ;;  %v472_v44 = vpop.f32.mrb[3].mxu1 }
 0x38c   :  { %v473_v45 = vadd.f32 %v6940_v41, %v472_v44 }
 0x38d   :  { %578 = vrot.lane.b32.xlu1 %v478_v43, %s8354_s2 }
 0x38e   :  { %580 = vrot.lane.b32.xlu0 %v473_v45, %s8355_s7  ;;  %7425 = vmatpush3.xpose.msk.msra.mxu1 %vm608_vm4, %v473_v45 }
 0x38f   :  { %7429 = vmatprep.subr.mxu1 %v8352_v33 }
 0x391   :  { %7427 = vmatmul.mubr.msk.f32.vlgmr.msra.gmra.mrb[6].mxu1 %vm608_vm4, %v394_v40  ;;  %576 = vrot.lane.b32.xlu1 %v473_v45, %s8354_s2 }
 0x392   :  { %v7423_v46 = vpop.f32.mrb[4].mxu1  ;;  %570 = vrot.lane.b32.xlu0 %v394_v40, %s8356_s8  ;;  %7430 = vmatpush3.xpose.msk.msra.mxu1 %vm608_vm4, %v478_v43 }
 0x393   :  { %v551_v47 = vpop.f32.mrb[5].mxu1  ;;  %7431 = vmatprep.mubr.msk.f32.mxu1 %vm8353_vm3, %v8352_v33  ;;  %7439 = vmatprep.subr.mxu1 %v8352_v33  ;;  %v8526_v61 = vadd.f32 %v7423_v46, %v6943_v57 }
 0x394   :  { %v8524_v59 = vadd.f32 %v6943_v57, %v551_v47 }
 0x395   :  { %7432 = vmatmul.mubr.msk.f32.vlgmr.msra.gmra.mrb[8].mxu1 %vm608_vm4, %v399_v38  ;;  %582 = vrot.lane.b32.xlu1 %v478_v43, %s8355_s7 }
 0x396   :  { %7441 = vmatprep.mubr.msk.f32.mxu1 %vm8353_vm3, %v8352_v33 }
 0x399   :  { %566 = vrot.lane.b32.xlu1 %v394_v40, %s8355_s7 }
 0x39d   :  { %568 = vrot.lane.b32.xlu1 %v399_v38, %s8355_s7 }
 0x3a1   :  { %586 = vrot.lane.b32.xlu1 %v478_v43, %s8356_s8 }
 0x3a5   :  { %584 = vrot.lane.b32.xlu1 %v473_v45, %s8356_s8 }
 0x3a9   :  { %572 = vrot.lane.b32.xlu1 %v399_v38, %s8356_s8 }
 0x3f7   :  { %v565_v48 = vpop.permute.xlu1 %564 }
 0x3fb   :  { %v563_v49 = vpop.permute.xlu1 %562 }
 0x3ff   :  { %v579_v50 = vpop.permute.xlu1 %578 }
 0x400   :  { %7440 = vmatpush3.xpose.msk.msra.mxu1 %vm608_vm4, %v579_v50  ;;  %v581_v52 = vpop.permute.xlu0 %580 }
 0x401   :  { %7449 = vmatprep.subr.mxu1 %v8352_v33 }
 0x403   :  { %v577_v51 = vpop.permute.xlu1 %576  ;;  %7442 = vmatmul.mubr.msk.f32.vlgmr.msra.gmra.mrb[10].mxu1 %vm608_vm4, %v565_v48 }
 0x404   :  { %7435 = vmatpush3.xpose.msk.msra.mxu0 %vm608_vm4, %v577_v51  ;;  %7451 = vmatprep.mubr.msk.f32.mxu1 %vm8353_vm3, %v8352_v33  ;;  %v571_v60 = vpop.permute.xlu0 %570 }
 0x405   :  { %7444 = vmatprep.subr.mxu0 %v8352_v33 }
 0x407   :  { %7437 = vmatmul.mubr.msk.f32.vlgmr.msra.gmra.mrb[2].mxu0 %vm608_vm4, %v563_v49  ;;  %v583_v53 = vpop.permute.xlu1 %582 }
 0x408   :  { %7445 = vmatpush3.xpose.msk.msra.mxu0 %vm608_vm4, %v581_v52  ;;  %7450 = vmatpush3.xpose.msk.msra.mxu1 %vm608_vm4, %v583_v53 }
 0x409   :  { %7446 = vmatprep.mubr.msk.f32.mxu0 %vm8353_vm3, %v8352_v33  ;;  %7459 = vmatprep.subr.mxu1 %v8352_v33 }
 0x40a   :  { %7454 = vmatprep.subr.mxu0 %v8352_v33 }
 0x40b   :  { %v567_v54 = vpop.permute.xlu1 %566 }
 0x40c   :  { %7447 = vmatmul.mubr.msk.f32.vlgmr.msra.gmra.mrb[4].mxu0 %vm608_vm4, %v567_v54 }
 0x40d   :  { %7456 = vmatprep.mubr.msk.f32.mxu0 %vm8353_vm3, %v8352_v33 }
 0x40f   :  { %v569_v55 = vpop.permute.xlu1 %568 }
 0x410   :  { %7452 = vmatmul.mubr.msk.f32.vlgmr.msra.gmra.mrb[12].mxu1 %vm608_vm4, %v569_v55 }
 0x411   :  { %7461 = vmatprep.mubr.msk.f32.mxu1 %vm8353_vm3, %v8352_v33 }
 0x413   :  { %v587_v56 = vpop.permute.xlu1 %586 }
 0x414   :  { %7460 = vmatpush3.xpose.msk.msra.mxu1 %vm608_vm4, %v587_v56 }
 0x415   :  { %7469 = vmatprep.subr.mxu1 %v8352_v33 }
 0x417   :  { %v585_v58 = vpop.permute.xlu1 %584 }
 0x418   :  { %7455 = vmatpush3.xpose.msk.msra.mxu0 %vm608_vm4, %v585_v58 }
 0x419   :  { %7464 = vmatprep.subr.mxu0 %v8352_v33 }
 0x41b   :  { %7457 = vmatmul.mubr.msk.f32.vlgmr.msra.gmra.mrb[6].mxu0 %vm608_vm4, %v571_v60  ;;  %v573_v62 = vpop.permute.xlu1 %572 }
 0x41c   :  { %7462 = vmatmul.mubr.msk.f32.vlgmr.msra.gmra.mrb[14].mxu1 %vm608_vm4, %v573_v62  ;;  %7465 = vmatpush3.msra.mxu0 %v8524_v59 }
 0x41d   :  { %7470 = vmatpush3.msra.mxu1 %v8526_v61  ;;  %7471 = vmatprep.mubr.msk.f32.mxu1 %vm8353_vm3, %v8352_v33 }
 0x41e   :  { %7466 = vmatprep.mubr.msk.f32.mxu0 %vm8353_vm3, %v8352_v33  ;;  %7474 = vmatprep.subr.mxu0 %v8352_v33 }
 0x41f   :  { %7479 = vmatprep.subr.mxu1 %v8352_v33 }
 0x464   :  { %v679_v13 = vpop.f32.mrb[6].mxu1 }
 0x465   :  { %v1201_v15 = vmul.f32 0.35355338, %v679_v13  ;;  %v7428_v16 = vpop.f32.mrb[7].mxu1 }
 0x467   :  { %v1217_v27 = vadd.f32 %v8554_v10, %v1201_v15 }
 0x468   :  { %v753_v19 = vpop.f32.mrb[8].mxu1 }
 0x469   :  { %v1202_v21 = vmul.f32 0.35355338, %v753_v19  ;;  %v7433_v22 = vpop.f32.mrb[9].mxu1  ;;  %v1225_v24 = vsel %vm608_vm4, %v1217_v27, -inf }
 0x46a   :  { %1226 = vmax.xlane.f32.xlu0 %v1225_v24 }
 0x46b   :  { %v1218_v25 = vadd.f32 %v8557_v18, %v1202_v21 }
 0x46d   :  { %v1228_v29 = vsel %vm608_vm4, %v1218_v25, -inf }
 0x46e   :  { %1229 = vmax.xlane.f32.xlu1 %v1228_v29 }
 0x4d6   :  { %v901_v31 = vpop.f32.mrb[10].mxu1 }
 0x4d7   :  { %v7443_v32 = vpop.f32.mrb[11].mxu1  ;;  %v1204_v35 = vmul.f32 0.35355338, %v901_v31 }
 0x4d9   :  { %v1220_v43 = vadd.f32 %v8557_v18, %v1204_v35 }
 0x4da   :  { %v827_v34 = vpop.f32.mrb[2].mxu0 }
 0x4db   :  { %v1203_v38 = vmul.f32 0.35355338, %v827_v34  ;;  %v7438_v39 = vpop.f32.mrb[3].mxu0  ;;  %v1234_v48 = vsel %vm608_vm4, %v1220_v43, -inf }
 0x4dd   :  { %v1219_v40 = vadd.f32 %v8554_v10, %v1203_v38 }
 0x4df   :  { %v975_v41 = vpop.f32.mrb[4].mxu0  ;;  %v1231_v42 = vsel %vm608_vm4, %v1219_v40, -inf }
 0x4e0   :  { %v1205_v44 = vmul.f32 0.35355338, %v975_v41  ;;  %v7448_v45 = vpop.f32.mrb[5].mxu0  ;;  %1232 = vmax.xlane.f32.xlu0 %v1231_v42 }
 0x4e2   :  { %v1221_v46 = vadd.f32 %v8554_v10, %v1205_v44 }
 0x4e3   :  { %v1049_v47 = vpop.f32.mrb[12].mxu1 }
 0x4e4   :  { %v1206_v49 = vmul.f32 0.35355338, %v1049_v47  ;;  %1235 = vmax.xlane.f32.xlu0 %v1234_v48  ;;  %v7453_v50 = vpop.f32.mrb[13].mxu1  ;;  %v1237_v51 = vsel %vm608_vm4, %v1221_v46, -inf }
 0x4e5   :  { %1238 = vmax.xlane.f32.xlu1 %v1237_v51 }
 0x4e6   :  { %v8569_v52 = vadd.f32 %v8557_v18, %v1206_v49 }
 0x4e8   :  { %v1240_v53 = vsel %vm608_vm4, %v8569_v52, -inf }
 0x4e9   :  { %1241 = vmax.xlane.f32.xlu0 %v1240_v53 }
 0x4ee   :  { %v1123_v54 = vpop.f32.mrb[6].mxu0 }
 0x4ef   :  { %v1207_v55 = vmul.f32 0.35355338, %v1123_v54  ;;  %v7458_v56 = vpop.f32.mrb[7].mxu0  ;;  %v1197_v57 = vpop.f32.mrb[14].mxu1 }
 0x4f0   :  { %v1208_v58 = vmul.f32 0.35355338, %v1197_v57  ;;  %v7463_v60 = vpop.f32.mrb[15].mxu1 }
 0x4f1   :  { %v1223_v62 = vadd.f32 %v8554_v10, %v1207_v55 }
 0x4f2   :  { %v8575_v2 = vadd.f32 %v8557_v18, %v1208_v58 }
 0x4f3   :  { %v1243_v4 = vsel %vm608_vm4, %v1223_v62, -inf }
 0x4f4   :  { %1244 = vmax.xlane.f32.xlu1 %v1243_v4  ;;  %v1246_v5 = vsel %vm608_vm4, %v8575_v2, -inf }
 0x4f5   :  { %1247 = vmax.xlane.f32.xlu0 %v1246_v5 }
 0x4f7   :  { %v1227_v19 = vpop.xlane.xlu0 %1226 }
 0x4f8   :  { %v1249_v21 = vsub.f32 %v1217_v27, %v1227_v19 }
 0x4fa   :  { %v1257_v22 = vmul.f32 1.442695, %v1249_v21 }
 0x4fb   :  { %v1230_v9 = vpop.xlane.xlu1 %1229 }
 0x4fc   :  { %v1250_v12 = vsub.f32 %v1218_v25, %v1230_v9 }
 0x4fe   :  { %v1259_v13 = vmul.f32 1.442695, %v1250_v12 }
 0x500   :  { %8143 = vpow2.f32 %v1259_v13 }
 0x501   :  { %8145 = vpow2.f32 %v1257_v22 }
 0x505   :  { %590 = vrot.lane.b32.xlu1 %v8524_v59, %s8354_s2 }
 0x50a   :  { %v8144_v15 = vpop.eup %8143 }
 0x50b   :  { %v1276_v16 = vsel %vm608_vm4, %v8144_v15, 0.0  ;;  %v8146_v24 = vpop.eup %8145 }
 0x50c   :  { %1277 = vadd.xlane.f32.xlu0 %v1276_v16  ;;  %v1273_v29 = vsel %vm608_vm4, %v8146_v24, 0.0 }
 0x529   :  { %1274 = vadd.xlane.f32.xlu1 %v1273_v29 }
 0x53a   :  { %596 = vrot.lane.b32.xlu1 %v8524_v59, %s8355_s7 }
 0x53e   :  { %598 = vrot.lane.b32.xlu1 %v8526_v61, %s8355_s7 }
 0x56d   :  { %v1233_v25 = vpop.xlane.xlu0 %1232 }
 0x56e   :  { %v1251_v31 = vsub.f32 %v1219_v40, %v1233_v25 }
 0x570   :  { %v1261_v32 = vmul.f32 1.442695, %v1251_v31 }
 0x571   :  { %v1236_v34 = vpop.xlane.xlu0 %1235 }
 0x572   :  { %8147 = vpow2.f32 %v1261_v32  ;;  %v1252_v35 = vsub.f32 %v1220_v43, %v1236_v34  ;;  %v1239_v38 = vpop.xlane.xlu1 %1238 }
 0x573   :  { %v1253_v27 = vsub.f32 %v1221_v46, %v1239_v38 }
 0x574   :  { %v1263_v39 = vmul.f32 1.442695, %v1252_v35 }
 0x575   :  { %v1265_v41 = vmul.f32 1.442695, %v1253_v27 }
 0x576   :  { %8149 = vpow2.f32 %v1263_v39  ;;  %v1242_v51 = vpop.xlane.xlu0 %1241 }
 0x577   :  { %8151 = vpow2.f32 %v1265_v41  ;;  %v1254_v56 = vsub.f32 %v8569_v52, %v1242_v51 }
 0x579   :  { %v1267_v58 = vmul.f32 1.442695, %v1254_v56  ;;  %v8357_v56 = vmov 1  }
 0x57a   :  { %8135 = vset.pattern.permute.xlu0 %v8357_v56  ;;  %8136 = vset.pattern.permute.xlu1 %v8357_v56 }
 0x57c   :  { %v8148_v42 = vpop.eup %8147 }
 0x57d   :  { %v1279_v44 = vsel %vm608_vm4, %v8148_v42, 0.0 }
 0x57e   :  { %1280 = vadd.xlane.f32.xlu1 %v1279_v44 }
 0x580   :  { %v8589_v45 = vpop.eup %8149 }
 0x581   :  { %v8591_v47 = vpop.eup %8151  ;;  %v1245_v48 = vpop.xlane.xlu1 %1244  ;;  %v1282_v40 = vsel %vm608_vm4, %v8589_v45, 0.0 }
 0x582   :  { %v1255_v49 = vsub.f32 %v1223_v62, %v1245_v48  ;;  %1283 = vadd.xlane.f32.xlu0 %v1282_v40  ;;  %v1285_v43 = vsel %vm608_vm4, %v8591_v47, 0.0  ;;  %v1248_v54 = vpop.xlane.xlu0 %1247 }
 0x583   :  { %1286 = vadd.xlane.f32.xlu1 %v1285_v43  ;;  %v1256_v60 = vsub.f32 %v8575_v2, %v1248_v54 }
 0x584   :  { %v1269_v46 = vmul.f32 1.442695, %v1255_v49 }
 0x585   :  { %v1271_v4 = vmul.f32 1.442695, %v1256_v60  ;;  %v591_v5 = vpop.permute.xlu1 %590 }
 0x586   :  { %8153 = vpow2.f32 %v1269_v46  ;;  %v103_v46 = vld [vmem:[#allocation2 + $0x238] sm:$0xff] }
 0x590   :  { %v8597_v50 = vpop.eup %8153 }
 0x591   :  { %v1291_v53 = vsel %vm608_vm4, %v8597_v50, 0.0 }
 0x592   :  { %1292 = vadd.xlane.f32.xlu1 %v1291_v53 }
 0x598   :  { %592 = vrot.lane.b32.xlu0 %v8526_v61, %s8354_s2 }
 0x599   :  { %v1278_v55 = vpop.xlane.xlu0 %1277 }
 0x59a   :  { %8155 = vrcp.f32 %v1278_v55  ;;  %v104_v55 = vld [vmem:[#allocation2 + $0x240] sm:$0xff] }
 0x59b   :  { %8157 = vpow2.f32 %v1267_v58 }
 0x59c   :  { %8159 = vpow2.f32 %v1271_v4 }
 0x5a3   :  { %604 = vrot.lane.b32.xlu1 %v8526_v61, %s8356_s8 }
 0x5a4   :  { %v8156_v57 = vpop.eup %8155 }
 0x5a5   :  { %v1306_v62 = vmul.f32 %v8156_v57, %v8144_v15  ;;  %v8158_v9 = vpop.eup %8157 }
 0x5a6   :  { %v1288_v52 = vsel %vm608_vm4, %v8158_v9, 0.0  ;;  %v8160_v13 = vpop.eup %8159 }
 0x5a7   :  { %7472 = vmatmul.mubr.msk.f32.vlgmr.msra.gmra.mrb[16].mxu1 %vm608_vm4, %v1306_v62  ;;  %v1294_v61 = vsel %vm608_vm4, %v8160_v13, 0.0  ;;  %2490 = vperm.xlu1 %8136, %v8412_v6   ;;  %v105_v62 = vld [vmem:[#allocation2 + $0x248] sm:$0xff] }
 0x5a8   :  { %7481 = vmatprep.mubr.msk.f32.mxu1 %vm8353_vm3, %v8352_v33 }
 0x5b6   :  { %v1275_v12 = vpop.xlane.xlu1 %1274 }
 0x5b7   :  { %8161 = vrcp.f32 %v1275_v12  ;;  %1289 = vadd.xlane.f32.xlu0 %v1288_v52 }
 0x5ba   :  { %v597_v16 = vpop.permute.xlu1 %596 }
 0x5bb   :  { %1295 = vadd.xlane.f32.xlu0 %v1294_v61 }
 0x5be   :  { %v599_v19 = vpop.permute.xlu1 %598 }
 0x5c1   :  { %v8162_v2 = vpop.eup %8161 }
 0x5c2   :  { %v1305_v15 = vmul.f32 %v8162_v2, %v8146_v24 }
 0x5c4   :  { %7467 = vmatmul.mubr.msk.f32.vlgmr.msra.gmra.mrb[8].mxu0 %vm608_vm4, %v1305_v15 }
 0x5c5   :  { %7475 = vmatpush3.msra.mxu0 %v591_v5  ;;  %7476 = vmatprep.mubr.msk.f32.mxu0 %vm8353_vm3, %v8352_v33 }
 0x5c6   :  { %7484 = vmatprep.subr.mxu0 %v8352_v33 }
 0x5d1   :  { %602 = vrot.lane.b32.xlu0 %v8524_v59, %s8356_s8 }
 0x5d5   :  { %2487 = vperm.xlu0 %8135, %v8406_v1  }
 0x60b   :  { %v1281_v21 = vpop.xlane.xlu1 %1280 }
 0x60c   :  { %8163 = vrcp.f32 %v1281_v21 }
 0x60f   :  { %v1284_v22 = vpop.xlane.xlu0 %1283 }
 0x610   :  { %8165 = vrcp.f32 %v1284_v22  ;;  %v1287_v29 = vpop.xlane.xlu1 %1286 }
 0x611   :  { %8167 = vrcp.f32 %v1287_v29 }
 0x613   :  { %v593_v24 = vpop.permute.xlu0 %592 }
 0x614   :  { %7480 = vmatpush3.msra.mxu1 %v593_v24 }
 0x615   :  { %7489 = vmatprep.subr.mxu1 %v8352_v33 }
 0x616   :  { %v8164_v25 = vpop.eup %8163 }
 0x617   :  { %v1307_v31 = vmul.f32 %v8164_v25, %v8148_v42  ;;  %v102_v42 = vld [vmem:[#allocation2 + $0x230] sm:$0xff]  ;;  %v140_v25 = vld [vmem:[#allocation2 + $0x360] sm:$0xff] }
 0x619   :  { %7477 = vmatmul.mubr.msk.f32.vlgmr.msra.gmra.mrb[10].mxu0 %vm608_vm4, %v1307_v31  ;;  %v139_v31 = vld [vmem:[#allocation2 + $0x358] sm:$0xff] }
 0x61a   :  { %v8166_v32 = vpop.eup %8165  ;;  %7485 = vmatpush3.msra.mxu0 %v597_v16  ;;  %7486 = vmatprep.mubr.msk.f32.mxu0 %vm8353_vm3, %v8352_v33 }
 0x61b   :  { %v8168_v59 = vpop.eup %8167  ;;  %v1308_v34 = vmul.f32 %v8166_v32, %v8589_v45  ;;  %7494 = vmatprep.subr.mxu0 %v8352_v33 }
 0x61c   :  { %v1309_v35 = vmul.f32 %v8168_v59, %v8591_v47 }
 0x61d   :  { %7482 = vmatmul.mubr.msk.f32.vlgmr.msra.gmra.mrb[18].mxu1 %vm608_vm4, %v1308_v34 }
 0x61e   :  { %7490 = vmatpush3.msra.mxu1 %v599_v19  ;;  %7487 = vmatmul.mubr.msk.f32.vlgmr.msra.gmra.mrb[12].mxu0 %vm608_vm4, %v1309_v35 }
 0x61f   :  { %7496 = vmatprep.mubr.msk.f32.mxu0 %vm8353_vm3, %v8352_v33  ;;  %7491 = vmatprep.mubr.msk.f32.mxu1 %vm8353_vm3, %v8352_v33  ;;  %v1293_v38 = vpop.xlane.xlu1 %1292 }
 0x620   :  { %7499 = vmatprep.subr.mxu1 %v8352_v33  ;;  %8169 = vrcp.f32 %v1293_v38 }
 0x623   :  { %v605_v40 = vpop.permute.xlu1 %604 }
 0x62a   :  { %v8170_v41 = vpop.eup %8169 }
 0x62b   :  { %v1311_v45 = vmul.f32 %v8170_v41, %v8597_v50 }
 0x644   :  { %v1290_v27 = vpop.xlane.xlu0 %1289 }
 0x645   :  { %8171 = vrcp.f32 %v1290_v27 }
 0x648   :  { %v1296_v39 = vpop.xlane.xlu0 %1295 }
 0x649   :  { %8173 = vrcp.f32 %v1296_v39 }
 0x64c   :  { %v603_v44 = vpop.permute.xlu0 %602 }
 0x64d   :  { %7495 = vmatpush3.msra.mxu0 %v603_v44  ;;  %v123_v44 = vld [vmem:[#allocation2 + $0x2d8] sm:$0xff] }
 0x64e   :  { %7497 = vmatmul.mubr.msk.f32.vlgmr.msra.gmra.mrb[14].mxu0 %vm608_vm4, %v1311_v45  ;;  %7504 = vmatprep.subr.mxu0 %v102_v42  ;;  %v124_v45 = vld [vmem:[#allocation2 + $0x2e0] sm:$0xff] }
 0x64f   :  { %v8172_v47 = vpop.eup %8171  ;;  %7505 = vmatpush3.msra.mxu0 %v102_v42  ;;  %v122_v42 = vld [vmem:[#allocation2 + $0x2d0] sm:$0xff] }
 0x650   :  { %v1310_v48 = vmul.f32 %v8172_v47, %v8158_v9  ;;  %7509 = vmatprep.subr.mxu0 %v103_v46  ;;  %v7952_v47 = vpack.c.bf16 %v123_v44, %v122_v42  ;;  %v6981_v44 = vld [vmem:[#allocation2 + $0x290] ss:$0 sm:$0xff] }
 0x652   :  { %7492 = vmatmul.mubr.msk.f32.vlgmr.msra.gmra.mrb[20].mxu1 %vm608_vm4, %v1310_v48  ;;  %v125_v48 = vld [vmem:[#allocation2 + $0x2e8] sm:$0xff] }
 0x653   :  { %v8174_v49 = vpop.eup %8173  ;;  %7500 = vmatpush3.msra.mxu1 %v605_v40  ;;  %7501 = vmatprep.mubr.msk.f32.mxu1 %vm8353_vm3, %v8352_v33  ;;  %v7956_v40 = vpack.c.bf16 %v125_v48, %v124_v45 }
 0x654   :  { %v1312_v43 = vmul.f32 %v8174_v49, %v8160_v13  ;;  %v2488_v2 = vpop.permute.xlu0 %2487  ;;  %7953 = vmatprep.subr.bf16.mxu1 %v7952_v47 }
 0x655   :  { %vm2492_vm5 = vcmp.eq.s32.totalorder %v8448_v28, %v2488_v2 }
 0x656   :  { %7502 = vmatmul.mubr.msk.f32.vlgmr.msra.gmra.mrb[22].mxu1 %vm608_vm4, %v1312_v43 }
 0x657   :  { %7955 = vmatpush3.bf16.msra.mxu1 %v7952_v47  ;;  %v6993_v47 = vld [vmem:[#allocation2 + $0xb8] ss:$0 sm:$0xff] }
 0x658   :  { %7957 = vmatprep.subr.bf16.mxu1 %v7956_v40 }
 0x65b   :  { %7959 = vmatpush3.bf16.msra.mxu1 %v7956_v40 }
 0x67a   :  { %v1455_v50 = vpop.f32.mrb[16].mxu1 }
 0x67b   :  { %v7473_v51 = vpop.f32.mrb[17].mxu1 }
 0x697   :  { %v1382_v53 = vpop.f32.mrb[8].mxu0 }
 0x698   :  { %v7468_v54 = vpop.f32.mrb[9].mxu0  ;;  %7506 = vmatprep.mubr.msk.f32.mxu0 %vm608_vm4, %v1382_v53 }
 0x699   :  { %7507 = vmatmul.mubr.msk.f32.vlgmr.msra.gmra.mrb[16].mxu0 %vm608_vm4, %v1455_v50 }
 0x69a   :  { %7510 = vmatpush3.msra.mxu0 %v103_v46 }
 0x69b   :  { %7514 = vmatprep.subr.mxu0 %v104_v55 }
 0x6ec   :  { %v1528_v57 = vpop.f32.mrb[10].mxu0 }
 0x6ed   :  { %v7478_v58 = vpop.f32.mrb[11].mxu0  ;;  %7511 = vmatprep.mubr.msk.f32.mxu0 %vm608_vm4, %v1528_v57 }
 0x6f0   :  { %v1601_v60 = vpop.f32.mrb[18].mxu1 }
 0x6f1   :  { %v7483_v4 = vpop.f32.mrb[19].mxu1  ;;  %v1674_v5 = vpop.f32.mrb[12].mxu0  ;;  %7512 = vmatmul.mubr.msk.f32.vlgmr.msra.gmra.mrb[16].mxu0 %vm608_vm4, %v1601_v60 }
 0x6f2   :  { %v7488_v9 = vpop.f32.mrb[13].mxu0  ;;  %7516 = vmatprep.mubr.msk.f32.mxu0 %vm608_vm4, %v1674_v5  ;;  %7515 = vmatpush3.msra.mxu0 %v104_v55 }
 0x6f3   :  { %7519 = vmatprep.subr.mxu0 %v105_v62 }
 0x721   :  { %v1820_v12 = vpop.f32.mrb[14].mxu0 }
 0x722   :  { %v7498_v52 = vpop.f32.mrb[15].mxu0 }
 0x723   :  { %v6979_v52 = vld [vmem:[#allocation2 + $0x2b8] ss:$0 sm:$0xff] }
 0x725   :  { %v1747_v1 = vpop.f32.mrb[20].mxu1 }
 0x726   :  { %v7493_v13 = vpop.f32.mrb[21].mxu1  ;;  %7517 = vmatmul.mubr.msk.f32.vlgmr.msra.gmra.mrb[16].mxu0 %vm608_vm4, %v1747_v1 }
 0x727   :  { %7520 = vmatpush3.msra.mxu0 %v105_v62  ;;  %7521 = vmatprep.mubr.msk.f32.mxu0 %vm608_vm4, %v1820_v12 }
 0x728   :  { %7977 = vmatprep.subr.bf16.mxu0 %v8414_v7 }
 0x729   :  { %v1893_v6 = vpop.f32.mrb[22].mxu1 }
 0x72a   :  { %v7503_v61 = vpop.f32.mrb[23].mxu1 }
 0x72b   :  { %v6980_v61 = vld [vmem:[#allocation2 + $0x2b0] ss:$0 sm:$0xff] }
 0x72e   :  { %7522 = vmatmul.mubr.msk.f32.vlgmr.msra.gmra.mrb[16].mxu0 %vm608_vm4, %v1893_v6 }
 0x72f   :  { %7979 = vmatpush3.bf16.msra.mxu0 %v8414_v7  ;;  %7586 = vmatprep.mubr.msk.f32.mxu0 %vm2492_vm5, %v8351_v30  ;;  %v2491_v7 = vpop.permute.xlu1 %2490 }
 0x730   :  { %7981 = vmatprep.subr.bf16.mxu0 %v8416_v8  ;;  %vm2493_vm6 = vcmp.eq.s32.totalorder %v8448_v28, %v2491_v7 }
 0x733   :  { %7983 = vmatpush3.bf16.msra.mxu0 %v8416_v8  ;;  %v6972_v8 = vld [vmem:[#allocation2 + $0x1f8] ss:$0 sm:$0xff] }
 0x734   :  { %7985 = vmatprep.subr.bf16.mxu0 %v8422_v11 }
 0x737   :  { %7987 = vmatpush3.bf16.msra.mxu0 %v8422_v11 }
 0x738   :  { %7989 = vmatprep.subr.bf16.mxu0 %v8426_v14 }
 0x73b   :  { %7991 = vmatpush3.bf16.msra.mxu0 %v8426_v14 }
 0x73c   :  { %7993 = vmatprep.subr.bf16.mxu0 %v8430_v17 }
 0x73f   :  { %7995 = vmatpush3.bf16.msra.mxu0 %v8430_v17 }
 0x740   :  { %7997 = vmatprep.subr.bf16.mxu0 %v8434_v20 }
 0x743   :  { %7999 = vmatpush3.bf16.msra.mxu0 %v8434_v20 }
 0x744   :  { %8001 = vmatprep.subr.bf16.mxu0 %v8438_v23 }
 0x747   :  { %8003 = vmatpush3.bf16.msra.mxu0 %v8438_v23 }
 0x748   :  { %8005 = vmatprep.subr.bf16.mxu0 %v8442_v26 }
 0x74b   :  { %8007 = vmatpush3.bf16.msra.mxu0 %v8442_v26 }
 0x74c   :  { %7622 = vmatprep.subr.mxu0 %v8352_v33 }
 0x74e   :  { %7587 = vmatmul.mubr.msk.f32.vlgmr.msra.gmra.mrb[18].mxu0 %vm2493_vm6, %v8351_v30 }
 0x74f   :  { %7624 = vmatprep.mubr.msk.f32.mxu0 %vm8353_vm3, %v8352_v33 }
 0x801   :  { %v7523_v11 = vpop.f32.mrb[16].mxu0 }
 0x802   :  { %v8088_v14 = vadd.f32 %v7523_v11, %v6972_v8  ;;  %v2222_v17 = vpop.f32.mrb[17].mxu0 }
 0x803   :  { %v8089_v20 = vadd.f32 %v6972_v8, %v2222_v17  ;;  %v127_v17 = vld [vmem:[#allocation2 + $0x2f8] sm:$0xff] }
 0x804   :  { %v8672_v23 = vadd.f32 %v8088_v14, %v8456_v37  ;;  %v126_v14 = vld [vmem:[#allocation2 + $0x2f0] sm:$0xff] }
 0x805   :  { %v8675_v15 = vadd.f32 %v8089_v20, %v8454_v36  ;;  %v128_v20 = vld [vmem:[#allocation2 + $0x300] sm:$0xff] }
 0x806   :  { %v2238_v26 = vsel %vm277_vm2, %v8672_v23, 0.0 }
 0x807   :  { %2239 = vadd.xlane.f32.xlu0 %v2238_v26  ;;  %v2235_v30 = vsel %vm277_vm2, %v8675_v15, 0.0  ;;  %v7960_v26 = vpack.c.bf16 %v127_v17, %v126_v14 }
 0x808   :  { %2236 = vadd.xlane.f32.xlu1 %v2235_v30  ;;  %v129_v30 = vld [vmem:[#allocation2 + $0x308] sm:$0xff] }
 0x809   :  { %7961 = vmatprep.subr.bf16.mxu1 %v7960_v26 }
 0x821   :  { %v7588_v16 = vpop.f32.mrb[18].mxu0 }
 0x822   :  { %v2564_v19 = vpop.f32.mrb[19].mxu0  ;;  %v8683_v32 = vadd.f32 %v7588_v16, %v140_v25  ;;  %v7964_v16 = vpack.c.bf16 %v129_v30, %v128_v20  ;;  %v6998_v30 = vld [vmem:[#allocation2 + $0xf0] ss:$0 sm:$0xff] }
 0x823   :  { %v8685_v34 = vadd.f32 %v2564_v19, %v139_v31  ;;  %v130_v19 = vld [vmem:[#allocation2 + $0x310] sm:$0xff]  ;;  %v75_v31 = vld [vmem:[#allocation2 + $0x158] sm:$0xff] }
 0x824   :  { %v2576_v39 = vsel %vm277_vm2, %v8683_v32, 0.0 }
 0x825   :  { %v2573_v41 = vsel %vm277_vm2, %v8685_v34, 0.0 }
 0x894   :  { %v2240_v21 = vpop.xlane.xlu0 %2239 }
 0x895   :  { %v2242_v22 = vmul.f32 0.03125, %v2240_v21  ;;  %v2237_v29 = vpop.xlane.xlu1 %2236  ;;  %v131_v21 = vld [vmem:[#allocation2 + $0x318] sm:$0xff] }
 0x896   :  { %v2241_v24 = vmul.f32 0.03125, %v2237_v29  ;;  %v132_v29 = vld [vmem:[#allocation2 + $0x320] sm:$0xff] }
 0x897   :  { %v2244_v37 = vsub.f32 %v8672_v23, %v2242_v22  ;;  %v7968_v22 = vpack.c.bf16 %v131_v21, %v130_v19  ;;  %v6995_v19 = vld [vmem:[#allocation2 + $0x100] ss:$0 sm:$0xff] }
 0x898   :  { %v2243_v36 = vsub.f32 %v8675_v15, %v2241_v24  ;;  %v133_v24 = vld [vmem:[#allocation2 + $0x328] sm:$0xff] }
 0x899   :  { %v2246_v59 = vmul.f32 %v2244_v37, %v2244_v37  ;;  %v7972_v25 = vpack.c.bf16 %v133_v24, %v132_v29 }
 0x89a   :  { %v2245_v35 = vmul.f32 %v2243_v36, %v2243_v36 }
 0x89b   :  { %v2250_v38 = vsel %vm277_vm2, %v2246_v59, 0.0 }
 0x89c   :  { %2251 = vadd.xlane.f32.xlu1 %v2250_v38  ;;  %v2247_v27 = vsel %vm277_vm2, %v2245_v35, 0.0 }
 0x89d   :  { %2248 = vadd.xlane.f32.xlu0 %v2247_v27 }
 0x8a0   :  { %2577 = vadd.xlane.f32.xlu1 %v2576_v39 }
 0x8a1   :  { %2574 = vadd.xlane.f32.xlu0 %v2573_v41 }
 0x929   :  { %v2252_v49 = vpop.xlane.xlu1 %2251 }
 0x92a   :  { %v2254_v43 = vmul.f32 0.03125, %v2252_v49  ;;  %v2249_v46 = vpop.xlane.xlu0 %2248 }
 0x92b   :  { %v2253_v50 = vmul.f32 0.03125, %v2249_v46 }
 0x92c   :  { %v2256_v51 = vadd.f32 1e-06, %v2254_v43 }
 0x92d   :  { %v2255_v53 = vadd.f32 1e-06, %v2253_v50  ;;  %v2578_v54 = vpop.xlane.xlu1 %2577 }
 0x92e   :  { %8175 = vrsqrt.f32 %v2256_v51  ;;  %v2580_v55 = vmul.f32 0.03125, %v2578_v54  ;;  %v2575_v56 = vpop.xlane.xlu0 %2574  ;;  %v76_v51 = vld [vmem:[#allocation2 + $0x160] sm:$0xff]  ;;  %v6994_v54 = vld [vmem:[#allocation2 + $0xb0] ss:$0 sm:$0xff] }
 0x92f   :  { %8177 = vrsqrt.f32 %v2255_v53  ;;  %v2579_v57 = vmul.f32 0.03125, %v2575_v56  ;;  %v77_v53 = vld [vmem:[#allocation2 + $0x168] sm:$0xff] }
 0x930   :  { %v8694_v58 = vsub.f32 %v8683_v32, %v2580_v55 }
 0x931   :  { %v2581_v60 = vsub.f32 %v8685_v34, %v2579_v57 }
 0x932   :  { %v2584_v62 = vmul.f32 %v8694_v58, %v8694_v58 }
 0x933   :  { %v2583_v4 = vmul.f32 %v2581_v60, %v2581_v60 }
 0x934   :  { %v2588_v5 = vsel %vm277_vm2, %v2584_v62, 0.0  ;;  %v8012_v62 = vpack.c.bf16 %v77_v53, %v76_v51  ;;  %v6930_v51 = vsel %vm173_vm8, 1.0, %v8352_v33 }
 0x935   :  { %2589 = vadd.xlane.f32.xlu1 %v2588_v5  ;;  %v2585_v9 = vsel %vm277_vm2, %v2583_v4, 0.0  ;;  %v67_v5 = vld [vmem:[#allocation2 + $0x118] sm:$0xff] }
 0x936   :  { %2586 = vadd.xlane.f32.xlu0 %v2585_v9 }
 0x938   :  { %v8176_v12 = vpop.eup %8175 }
 0x939   :  { %v8178_v1 = vpop.eup %8177  ;;  %v2260_v13 = vmul.f32 %v8176_v12, %v2244_v37  ;;  %v74_v37 = vld [vmem:[#allocation2 + $0x150] sm:$0xff] }
 0x93a   :  { %v2259_v6 = vmul.f32 %v8178_v1, %v2243_v36  ;;  %v8008_v36 = vpack.c.bf16 %v75_v31, %v74_v37  ;;  %v69_v1 = vld [vmem:[#allocation2 + $0x128] sm:$0xff] }
 0x93b   :  { %v2266_v2 = vmul.f32 %v6979_v52, %v2260_v13 }
 0x93c   :  { %v2265_v7 = vmul.f32 %v6979_v52, %v2259_v6  ;;  %v68_v52 = vld [vmem:[#allocation2 + $0x120] sm:$0xff]  ;;  %v78_v6 = vld [vmem:[#allocation2 + $0x170] sm:$0xff] }
 0x93d   :  { %v2272_v11 = vadd.f32 %v6980_v61, %v2266_v2 }
 0x93e   :  { %v2271_v8 = vadd.f32 %v6980_v61, %v2265_v7  ;;  %v79_v61 = vld [vmem:[#allocation2 + $0x178] sm:$0xff]  ;;  %v80_v7 = vld [vmem:[#allocation2 + $0x180] sm:$0xff] }
 0x93f   :  { %v8024_v2 = vpack.c.bf16 %v79_v61, %v78_v6 }
 0x940   :  { %7532 = vmatprep.mubr.msk.f32.mxu1 %vm277_vm2, %v2271_v8  ;;  %v81_v8 = vld [vmem:[#allocation2 + $0x188] sm:$0xff] }
 0x941   :  { %7533 = vmatmul.mubr.msk.f32.vlgmr.msra.gmra.mrb[24].mxu1 %vm277_vm2, %v2272_v11  ;;  %v8028_v11 = vpack.c.bf16 %v81_v8, %v80_v7 }
 0x942   :  { %7963 = vmatpush3.bf16.msra.mxu1 %v7960_v26 }
 0x943   :  { %7965 = vmatprep.subr.bf16.mxu1 %v7964_v16 }
 0x946   :  { %7967 = vmatpush3.bf16.msra.mxu1 %v7964_v16 }
 0x947   :  { %7969 = vmatprep.subr.bf16.mxu1 %v7968_v22 }
 0x94a   :  { %7971 = vmatpush3.bf16.msra.mxu1 %v7968_v22 }
 0x94b   :  { %7973 = vmatprep.subr.bf16.mxu1 %v7972_v25 }
 0x94e   :  { %7975 = vmatpush3.bf16.msra.mxu1 %v7972_v25 }
 0x94f   :  { %8009 = vmatprep.subr.bf16.mxu1 %v8008_v36 }
 0x9c2   :  { %v2590_v38 = vpop.xlane.xlu1 %2589 }
 0x9c3   :  { %v2587_v59 = vpop.xlane.xlu0 %2586  ;;  %v2592_v39 = vmul.f32 0.03125, %v2590_v38 }
 0x9c4   :  { %v2591_v35 = vmul.f32 0.03125, %v2587_v59 }
 0x9c5   :  { %v2594_v41 = vadd.f32 1e-06, %v2592_v39 }
 0x9c6   :  { %v2593_v27 = vadd.f32 1e-06, %v2591_v35 }
 0x9c8   :  { %8179 = vrsqrt.f32 %v2593_v27 }
 0x9c9   :  { %8181 = vrsqrt.f32 %v2594_v41 }
 0x9d2   :  { %v8180_v42 = vpop.eup %8179 }
 0x9d3   :  { %v2597_v45 = vmul.f32 %v8180_v42, %v2581_v60  ;;  %v8182_v43 = vpop.eup %8181  ;;  %v66_v60 = vld [vmem:[#allocation2 + $0x110] sm:$0xff] }
 0x9d4   :  { %v2598_v57 = vmul.f32 %v8182_v43, %v8694_v58  ;;  %v8016_v12 = vpack.c.bf16 %v67_v5, %v66_v60  ;;  %v8020_v58 = vpack.c.bf16 %v69_v1, %v68_v52 }
 0x9d5   :  { %v2603_v50 = vmul.f32 %v6993_v47, %v2597_v45  ;;  %v7001_v45 = vld [vmem:[#allocation2 + $0x108] ss:$0 sm:$0xff] }
 0x9d6   :  { %v2604_v9 = vmul.f32 %v6993_v47, %v2598_v57 }
 0x9d7   :  { %v2609_v4 = vadd.f32 %v6994_v54, %v2603_v50 }
 0x9d8   :  { %v2610_v13 = vadd.f32 %v6994_v54, %v2604_v9 }
 0xa14   :  { %v7534_v48 = vpop.f32.mrb[24].mxu1 }
 0xa15   :  { %v2355_v40 = vadd.f32 %v7534_v48, %v6981_v44  ;;  %v2349_v49 = vpop.f32.mrb[25].mxu1 }
 0xa16   :  { %v2350_v46 = vadd.f32 %v6981_v44, %v2349_v49 }
 0xa17   :  { %v2359_v56 = vmax.f32 %v2355_v40, 0.0 }
 0xa18   :  { %v2358_v55 = vmax.f32 %v2350_v46, 0.0  ;;  %v178_v46 = vsub.s32 1, %v8544_v0 }
 0xa1a   :  { %7551 = vmatprep.mubr.msk.f32.mxu1 %vm2364_vm7, %v2358_v55  ;;  %v183_v50 = vrot.slane %v8550_v3, %v178_v46  ;;  %v179_v53 = vrot.slane %v8541_v63, %v178_v46 }
 0xa1b   :  { %7552 = vmatmul.mubr.msk.f32.vlgmr.msra.gmra.mrb[26].mxu1 %vm2364_vm7, %v2359_v56 }
 0xa1c   :  { %8011 = vmatpush3.bf16.msra.mxu1 %v8008_v36  ;;  %7597 = vmatprep.mubr.msk.f32.mxu1 %vm277_vm2, %v2609_v4  ;;  %v185_v54 = vmul.f32 %v6930_v51, %v183_v50  ;;  %v184_v55 = vmul.f32 %v6930_v51, %v179_v53 }
 0xa1d   :  { %8013 = vmatprep.subr.bf16.mxu1 %v8012_v62 }
 0xa1e   :  { %v187_v56 = vsub.f32 1.0, %v185_v54  ;;  %v186_v57 = vsub.f32 1.0, %v184_v55 }
 0xa20   :  { %8015 = vmatpush3.bf16.msra.mxu1 %v8012_v62  ;;  %v189_v62 = vmul.f32 -1e+09, %v187_v56  ;;  %v188_v60 = vmul.f32 -1e+09, %v186_v57 }
 0xa21   :  { %8017 = vmatprep.subr.bf16.mxu1 %v8016_v12 }
 0xa23   :  { %7598 = vmatmul.mubr.msk.f32.vlgmr.msra.gmra.mrb[28].mxu1 %vm277_vm2, %v2610_v13 }
 0xa24   :  { %8019 = vmatpush3.bf16.msra.mxu1 %v8016_v12  ;;  %7608 = vmatprep.mubr.msk.f32.mxu1 %vm277_vm2, %v2609_v4 }
 0xa25   :  { %8021 = vmatprep.subr.bf16.mxu1 %v8020_v58 }
 0xa28   :  { %8023 = vmatpush3.bf16.msra.mxu1 %v8020_v58 }
 0xa29   :  { %8025 = vmatprep.subr.bf16.mxu1 %v8024_v2 }
 0xa2b   :  { %7609 = vmatmul.mubr.msk.f32.vlgmr.msra.gmra.mrb[30].mxu1 %vm277_vm2, %v2610_v13 }
 0xa2c   :  { %8027 = vmatpush3.bf16.msra.mxu1 %v8024_v2  ;;  %7619 = vmatprep.mubr.msk.f32.mxu1 %vm277_vm2, %v2609_v4 }
 0xa2d   :  { %8029 = vmatprep.subr.bf16.mxu1 %v8028_v11 }
 0xa30   :  { %8031 = vmatpush3.bf16.msra.mxu1 %v8028_v11 }
 0xa31   :  { %7627 = vmatprep.subr.mxu1 %v8352_v33 }
 0xa33   :  { %7620 = vmatmul.mubr.msk.f32.vlgmr.msra.gmra.mrb[32].mxu1 %vm277_vm2, %v2610_v13 }
 0xa34   :  { %7629 = vmatprep.mubr.msk.f32.mxu1 %vm8353_vm3, %v8352_v33 }
 0xaee   :  { %v8715_v14 = vpop.f32.mrb[26].mxu1 }
 0xaef   :  { %v8717_v17 = vpop.f32.mrb[27].mxu1 }
 0xaf6   :  { %v7599_v20 = vpop.f32.mrb[28].mxu1 }
 0xaf7   :  { %v2687_v26 = vpop.f32.mrb[29].mxu1  ;;  %v2693_v24 = vadd.f32 %v7599_v20, %v6995_v19 }
 0xaf8   :  { %v2688_v25 = vadd.f32 %v6995_v19, %v2687_v26 }
 0xafe   :  { %v7610_v16 = vpop.f32.mrb[30].mxu1 }
 0xaff   :  { %v2772_v21 = vadd.f32 %v7610_v16, %v6998_v30  ;;  %v2766_v22 = vpop.f32.mrb[31].mxu1 }
 0xb00   :  { %v2767_v29 = vadd.f32 %v6998_v30, %v2766_v22 }
 0xb01   :  { %2872 = vrot.lane.b32.xlu1 %v2772_v21, %s8354_s2  ;;  %7628 = vmatpush3.xpose.msk.msra.mxu1 %vm608_vm4, %v2772_v21 }
 0xb02   :  { %2870 = vrot.lane.b32.xlu0 %v2767_v29, %s8354_s2  ;;  %7623 = vmatpush3.xpose.msk.msra.mxu0 %vm608_vm4, %v2767_v29 }
 0xb03   :  { %7637 = vmatprep.subr.mxu1 %v8352_v33  ;;  %7632 = vmatprep.subr.mxu0 %v8352_v33 }
 0xb04   :  { %7630 = vmatmul.mubr.msk.f32.vlgmr.msra.gmra.mrb[34].mxu1 %vm608_vm4, %v2693_v24 }
 0xb05   :  { %2856 = vrot.lane.b32.xlu1 %v2688_v25, %s8354_s2  ;;  %7625 = vmatmul.mubr.msk.f32.vlgmr.msra.gmra.mrb[20].mxu0 %vm608_vm4, %v2688_v25 }
 0xb06   :  { %v7621_v37 = vpop.f32.mrb[32].mxu1  ;;  %2858 = vrot.lane.b32.xlu0 %v2693_v24, %s8354_s2  ;;  %7634 = vmatprep.mubr.msk.f32.mxu0 %vm8353_vm3, %v8352_v33 }
 0xb07   :  { %v2845_v31 = vpop.f32.mrb[33].mxu1  ;;  %7639 = vmatprep.mubr.msk.f32.mxu1 %vm8353_vm3, %v8352_v33  ;;  %v8767_v49 = vadd.f32 %v7621_v37, %v7001_v45 }
 0xb08   :  { %v8765_v48 = vadd.f32 %v7001_v45, %v2845_v31 }
 0xb09   :  { %2874 = vrot.lane.b32.xlu1 %v2767_v29, %s8355_s7 }
 0xb0a   :  { %2876 = vrot.lane.b32.xlu0 %v2772_v21, %s8355_s7 }
 0xb0d   :  { %2860 = vrot.lane.b32.xlu1 %v2688_v25, %s8355_s7 }
 0xb0e   :  { %2862 = vrot.lane.b32.xlu0 %v2693_v24, %s8355_s7 }
 0xb11   :  { %2878 = vrot.lane.b32.xlu1 %v2767_v29, %s8356_s8 }
 0xb12   :  { %2880 = vrot.lane.b32.xlu0 %v2772_v21, %s8356_s8 }
 0xb15   :  { %2864 = vrot.lane.b32.xlu1 %v2688_v25, %s8356_s8 }
 0xb16   :  { %2866 = vrot.lane.b32.xlu0 %v2693_v24, %s8356_s8 }
 0xb73   :  { %v2873_v36 = vpop.permute.xlu1 %2872 }
 0xb74   :  { %7638 = vmatpush3.xpose.msk.msra.mxu1 %vm608_vm4, %v2873_v36  ;;  %v2871_v59 = vpop.permute.xlu0 %2870 }
 0xb75   :  { %7633 = vmatpush3.xpose.msk.msra.mxu0 %vm608_vm4, %v2871_v59  ;;  %7647 = vmatprep.subr.mxu1 %v8352_v33 }
 0xb76   :  { %7642 = vmatprep.subr.mxu0 %v8352_v33 }
 0xb77   :  { %v2857_v35 = vpop.permute.xlu1 %2856 }
 0xb78   :  { %v2859_v38 = vpop.permute.xlu0 %2858  ;;  %7635 = vmatmul.mubr.msk.f32.vlgmr.msra.gmra.mrb[22].mxu0 %vm608_vm4, %v2857_v35 }
 0xb79   :  { %7640 = vmatmul.mubr.msk.f32.vlgmr.msra.gmra.mrb[36].mxu1 %vm608_vm4, %v2859_v38  ;;  %7644 = vmatprep.mubr.msk.f32.mxu0 %vm8353_vm3, %v8352_v33 }
 0xb7a   :  { %7649 = vmatprep.mubr.msk.f32.mxu1 %vm8353_vm3, %v8352_v33 }
 0xb7b   :  { %v2875_v27 = vpop.permute.xlu1 %2874 }
 0xb7c   :  { %v2877_v39 = vpop.permute.xlu0 %2876  ;;  %7643 = vmatpush3.xpose.msk.msra.mxu0 %vm608_vm4, %v2875_v27 }
 0xb7d   :  { %7648 = vmatpush3.xpose.msk.msra.mxu1 %vm608_vm4, %v2877_v39  ;;  %7652 = vmatprep.subr.mxu0 %v8352_v33 }
 0xb7e   :  { %7657 = vmatprep.subr.mxu1 %v8352_v33 }
 0xb7f   :  { %v2861_v41 = vpop.permute.xlu1 %2860 }
 0xb80   :  { %v2863_v42 = vpop.permute.xlu0 %2862  ;;  %7645 = vmatmul.mubr.msk.f32.vlgmr.msra.gmra.mrb[24].mxu0 %vm608_vm4, %v2861_v41 }
 0xb81   :  { %7650 = vmatmul.mubr.msk.f32.vlgmr.msra.gmra.mrb[38].mxu1 %vm608_vm4, %v2863_v42  ;;  %7654 = vmatprep.mubr.msk.f32.mxu0 %vm8353_vm3, %v8352_v33 }
 0xb82   :  { %7659 = vmatprep.mubr.msk.f32.mxu1 %vm8353_vm3, %v8352_v33 }
 0xb83   :  { %v2879_v44 = vpop.permute.xlu1 %2878 }
 0xb84   :  { %v2881_v47 = vpop.permute.xlu0 %2880  ;;  %7653 = vmatpush3.xpose.msk.msra.mxu0 %vm608_vm4, %v2879_v44 }
 0xb85   :  { %7658 = vmatpush3.xpose.msk.msra.mxu1 %vm608_vm4, %v2881_v47  ;;  %7662 = vmatprep.subr.mxu0 %v8352_v33 }
 0xb86   :  { %7667 = vmatprep.subr.mxu1 %v8352_v33 }
 0xb87   :  { %v2865_v40 = vpop.permute.xlu1 %2864 }
 0xb88   :  { %v2867_v43 = vpop.permute.xlu0 %2866  ;;  %7655 = vmatmul.mubr.msk.f32.vlgmr.msra.gmra.mrb[26].mxu0 %vm608_vm4, %v2865_v40 }
 0xb89   :  { %7663 = vmatpush3.msra.mxu0 %v8765_v48  ;;  %7660 = vmatmul.mubr.msk.f32.vlgmr.msra.gmra.mrb[40].mxu1 %vm608_vm4, %v2867_v43 }
 0xb8a   :  { %7668 = vmatpush3.msra.mxu1 %v8767_v49  ;;  %7664 = vmatprep.mubr.msk.f32.mxu0 %vm8353_vm3, %v8352_v33 }
 0xb8b   :  { %7672 = vmatprep.subr.mxu0 %v8352_v33  ;;  %7669 = vmatprep.mubr.msk.f32.mxu1 %vm8353_vm3, %v8352_v33 }
 0xb8c   :  { %7677 = vmatprep.subr.mxu1 %v8352_v33 }
 0xbd7   :  { %v3046_v4 = vpop.f32.mrb[34].mxu1 }
 0xbd8   :  { %v3495_v5 = vmul.f32 0.35355338, %v3046_v4  ;;  %v2972_v9 = vpop.f32.mrb[20].mxu0  ;;  %v7631_v12 = vpop.f32.mrb[35].mxu1 }
 0xbd9   :  { %v3494_v52 = vmul.f32 0.35355338, %v2972_v9  ;;  %v7626_v1 = vpop.f32.mrb[21].mxu0 }
 0xbda   :  { %v3503_v13 = vadd.f32 %v3495_v5, %v189_v62 }
 0xbdb   :  { %v3502_v0 = vadd.f32 %v3494_v52, %v188_v60 }
 0xbdc   :  { %v3513_v3 = vsel %vm608_vm4, %v3503_v13, -inf }
 0xbdd   :  { %3514 = vmax.xlane.f32.xlu0 %v3513_v3  ;;  %v3510_v58 = vsel %vm608_vm4, %v3502_v0, -inf }
 0xbde   :  { %3511 = vmax.xlane.f32.xlu1 %v3510_v58 }
 0xc4b   :  { %v3120_v63 = vpop.f32.mrb[22].mxu0 }
 0xc4c   :  { %v3496_v6 = vmul.f32 0.35355338, %v3120_v63  ;;  %v7636_v61 = vpop.f32.mrb[23].mxu0  ;;  %v3194_v2 = vpop.f32.mrb[36].mxu1 }
 0xc4d   :  { %v3497_v7 = vmul.f32 0.35355338, %v3194_v2  ;;  %v7641_v8 = vpop.f32.mrb[37].mxu1 }
 0xc4e   :  { %v3504_v11 = vadd.f32 %v3496_v6, %v188_v60 }
 0xc4f   :  { %v3505_v20 = vadd.f32 %v3497_v7, %v189_v62 }
 0xc50   :  { %v3516_v26 = vsel %vm608_vm4, %v3504_v11, -inf }
 0xc51   :  { %3517 = vmax.xlane.f32.xlu0 %v3516_v26  ;;  %v3519_v30 = vsel %vm608_vm4, %v3505_v20, -inf }
 0xc52   :  { %3520 = vmax.xlane.f32.xlu1 %v3519_v30 }
 0xc53   :  { %v3268_v16 = vpop.f32.mrb[24].mxu0 }
 0xc54   :  { %v3498_v19 = vmul.f32 0.35355338, %v3268_v16  ;;  %v7646_v21 = vpop.f32.mrb[25].mxu0  ;;  %v3342_v22 = vpop.f32.mrb[38].mxu1 }
 0xc55   :  { %v3499_v29 = vmul.f32 0.35355338, %v3342_v22  ;;  %v7651_v24 = vpop.f32.mrb[39].mxu1 }
 0xc56   :  { %v8789_v25 = vadd.f32 %v3498_v19, %v188_v60 }
 0xc57   :  { %v3507_v37 = vadd.f32 %v3499_v29, %v189_v62 }
 0xc58   :  { %v3522_v31 = vsel %vm608_vm4, %v8789_v25, -inf }
 0xc59   :  { %3523 = vmax.xlane.f32.xlu0 %v3522_v31  ;;  %v3525_v36 = vsel %vm608_vm4, %v3507_v37, -inf }
 0xc5a   :  { %3526 = vmax.xlane.f32.xlu1 %v3525_v36 }
 0xc5b   :  { %v3416_v59 = vpop.f32.mrb[26].mxu0 }
 0xc5c   :  { %v3500_v35 = vmul.f32 0.35355338, %v3416_v59  ;;  %v7656_v38 = vpop.f32.mrb[27].mxu0  ;;  %v3490_v27 = vpop.f32.mrb[40].mxu1 }
 0xc5d   :  { %v3501_v39 = vmul.f32 0.35355338, %v3490_v27  ;;  %v7661_v41 = vpop.f32.mrb[41].mxu1 }
 0xc5e   :  { %v3508_v42 = vadd.f32 %v3500_v35, %v188_v60 }
 0xc5f   :  { %v3509_v44 = vadd.f32 %v3501_v39, %v189_v62 }
 0xc60   :  { %v3528_v45 = vsel %vm608_vm4, %v3508_v42, -inf }
 0xc61   :  { %3529 = vmax.xlane.f32.xlu0 %v3528_v45  ;;  %v3531_v47 = vsel %vm608_vm4, %v3509_v44, -inf }
 0xc62   :  { %3532 = vmax.xlane.f32.xlu1 %v3531_v47 }
 0xc6a   :  { %v3515_v43 = vpop.xlane.xlu0 %3514 }
 0xc6b   :  { %v3512_v40 = vpop.xlane.xlu1 %3511  ;;  %v3535_v50 = vsub.f32 %v3503_v13, %v3515_v43 }
 0xc6c   :  { %v3534_v46 = vsub.f32 %v3502_v0, %v3512_v40 }
 0xc6d   :  { %v3544_v53 = vmul.f32 1.442695, %v3535_v50 }
 0xc6e   :  { %v3542_v51 = vmul.f32 1.442695, %v3534_v46 }
 0xc70   :  { %8183 = vpow2.f32 %v3542_v51 }
 0xc71   :  { %8185 = vpow2.f32 %v3544_v53 }
 0xc73   :  { %2886 = vrot.lane.b32.xlu1 %v8767_v49, %s8354_s2 }
 0xc77   :  { %2884 = vrot.lane.b32.xlu0 %v8765_v48, %s8354_s2 }
 0xc7a   :  { %v8184_v54 = vpop.eup %8183 }
 0xc7b   :  { %v8186_v55 = vpop.eup %8185  ;;  %v3558_v56 = vsel %vm608_vm4, %v8184_v54, 0.0 }
 0xc7c   :  { %v3561_v57 = vsel %vm608_vm4, %v8186_v55, 0.0 }
 0xc96   :  { %3559 = vadd.xlane.f32.xlu0 %v3558_v56 }
 0xc97   :  { %3562 = vadd.xlane.f32.xlu1 %v3561_v57 }
 0xca8   :  { %2890 = vrot.lane.b32.xlu1 %v8765_v48, %s8355_s7 }
 0xcde   :  { %v3518_v62 = vpop.xlane.xlu0 %3517 }
 0xcdf   :  { %v3536_v4 = vsub.f32 %v3504_v11, %v3518_v62  ;;  %v3521_v60 = vpop.xlane.xlu1 %3520 }
 0xce0   :  { %v3537_v5 = vsub.f32 %v3505_v20, %v3521_v60 }
 0xce1   :  { %v3546_v9 = vmul.f32 1.442695, %v3536_v4 }
 0xce2   :  { %v3548_v12 = vmul.f32 1.442695, %v3537_v5  ;;  %v70_v5 = vld [vmem:[#allocation2 + $0x130] sm:$0xff] }
 0xce3   :  { %8187 = vpow2.f32 %v3546_v9 }
 0xce4   :  { %8189 = vpow2.f32 %v3548_v12 }
 0xce6   :  { %v3524_v26 = vpop.xlane.xlu0 %3523 }
 0xce7   :  { %v3527_v52 = vpop.xlane.xlu1 %3526  ;;  %v3538_v30 = vsub.f32 %v8789_v25, %v3524_v26 }
 0xce8   :  { %v3539_v1 = vsub.f32 %v3507_v37, %v3527_v52 }
 0xce9   :  { %v3550_v19 = vmul.f32 1.442695, %v3538_v30 }
 0xcea   :  { %v3552_v13 = vmul.f32 1.442695, %v3539_v1  ;;  %v71_v1 = vld [vmem:[#allocation2 + $0x138] sm:$0xff] }
 0xcec   :  { %8191 = vpow2.f32 %v3552_v13 }
 0xced   :  { %v8188_v0 = vpop.eup %8187 }
 0xcee   :  { %v8190_v3 = vpop.eup %8189  ;;  %v3564_v58 = vsel %vm608_vm4, %v8188_v0, 0.0  ;;  %v3530_v16 = vpop.xlane.xlu0 %3529 }
 0xcef   :  { %v3533_v63 = vpop.xlane.xlu1 %3532  ;;  %3565 = vadd.xlane.f32.xlu0 %v3564_v58  ;;  %v3567_v6 = vsel %vm608_vm4, %v8190_v3, 0.0  ;;  %v3540_v21 = vsub.f32 %v3508_v42, %v3530_v16  ;;  %v72_v58 = vld [vmem:[#allocation2 + $0x140] sm:$0xff] }
 0xcf0   :  { %v3541_v61 = vsub.f32 %v3509_v44, %v3533_v63  ;;  %3568 = vadd.xlane.f32.xlu1 %v3567_v6 }
 0xcf1   :  { %v3554_v22 = vmul.f32 1.442695, %v3540_v21 }
 0xcf2   :  { %v3556_v2 = vmul.f32 1.442695, %v3541_v61  ;;  %v2885_v29 = vpop.permute.xlu0 %2884 }
 0xcf3   :  { %v2887_v37 = vpop.permute.xlu1 %2886 }
 0xcf4   :  { %8193 = vpow2.f32 %v3556_v2 }
 0xcf5   :  { %8195 = vpow2.f32 %v3550_v19 }
 0xcf6   :  { %v8192_v7 = vpop.eup %8191  ;;  %8197 = vpow2.f32 %v3554_v22 }
 0xcf7   :  { %v3573_v8 = vsel %vm608_vm4, %v8192_v7, 0.0 }
 0xcf8   :  { %3574 = vadd.xlane.f32.xlu1 %v3573_v8 }
 0xcfe   :  { %v8807_v11 = vpop.eup %8193 }
 0xcff   :  { %v3579_v20 = vsel %vm608_vm4, %v8807_v11, 0.0  ;;  %v8196_v24 = vpop.eup %8195 }
 0xd00   :  { %3580 = vadd.xlane.f32.xlu1 %v3579_v20  ;;  %v3570_v36 = vsel %vm608_vm4, %v8196_v24, 0.0  ;;  %v8817_v59 = vpop.eup %8197 }
 0xd05   :  { %2892 = vrot.lane.b32.xlu0 %v8767_v49, %s8355_s7 }
 0xd11   :  { %2896 = vrot.lane.b32.xlu1 %v8765_v48, %s8356_s8  ;;  %v3576_v48 = vsel %vm608_vm4, %v8817_v59, 0.0 }
 0xd23   :  { %v3560_v31 = vpop.xlane.xlu0 %3559 }
 0xd24   :  { %8199 = vrcp.f32 %v3560_v31  ;;  %v3563_v35 = vpop.xlane.xlu1 %3562  ;;  %3571 = vadd.xlane.f32.xlu0 %v3570_v36 }
 0xd25   :  { %8201 = vrcp.f32 %v3563_v35 }
 0xd28   :  { %3577 = vadd.xlane.f32.xlu0 %v3576_v48  ;;  %v2891_v41 = vpop.permute.xlu1 %2890 }
 0xd2e   :  { %v8200_v25 = vpop.eup %8199 }
 0xd2f   :  { %v8202_v38 = vpop.eup %8201  ;;  %v3590_v27 = vmul.f32 %v8200_v25, %v8184_v54 }
 0xd30   :  { %v3591_v39 = vmul.f32 %v8202_v38, %v8186_v55 }
 0xd31   :  { %7665 = vmatmul.mubr.msk.f32.vlgmr.msra.gmra.mrb[28].mxu0 %vm608_vm4, %v3590_v27 }
 0xd32   :  { %7673 = vmatpush3.msra.mxu0 %v2885_v29  ;;  %7670 = vmatmul.mubr.msk.f32.vlgmr.msra.gmra.mrb[42].mxu1 %vm608_vm4, %v3591_v39  ;;  %v6984_v29 = vld [vmem:[#allocation2 + $0x298] ss:$0 sm:$0xff] }
 0xd33   :  { %7678 = vmatpush3.msra.mxu1 %v2887_v37  ;;  %7674 = vmatprep.mubr.msk.f32.mxu0 %vm8353_vm3, %v8352_v33  ;;  %v2438_v31 = vadd.f32 %v6984_v29, %v8717_v17  ;;  %v2443_v35 = vadd.f32 %v8715_v14, %v6984_v29 }
 0xd34   :  { %7682 = vmatprep.subr.mxu0 %v8352_v33  ;;  %7679 = vmatprep.mubr.msk.f32.mxu1 %vm8353_vm3, %v8352_v33 }
 0xd35   :  { %7687 = vmatprep.subr.mxu1 %v8352_v33  ;;  %v2446_v39 = vadd.f32 %v2438_v31, %v8675_v15 }
 0xd37   :  { %v2448_v14 = vsel %vm277_vm2, %v2446_v39, 0.0 }
 0xd3e   :  { %2898 = vrot.lane.b32.xlu0 %v8767_v49, %s8356_s8 }
 0xd7c   :  { %v3566_v42 = vpop.xlane.xlu0 %3565 }
 0xd7d   :  { %8203 = vrcp.f32 %v3566_v42  ;;  %v3569_v44 = vpop.xlane.xlu1 %3568 }
 0xd7e   :  { %8205 = vrcp.f32 %v3569_v44 }
 0xd80   :  { %v2893_v50 = vpop.permute.xlu0 %2892 }
 0xd85   :  { %v3575_v45 = vpop.xlane.xlu1 %3574 }
 0xd86   :  { %8207 = vrcp.f32 %v3575_v45 }
 0xd87   :  { %v8204_v47 = vpop.eup %8203 }
 0xd88   :  { %v8206_v40 = vpop.eup %8205  ;;  %v3592_v43 = vmul.f32 %v8204_v47, %v8188_v0 }
 0xd89   :  { %v3593_v46 = vmul.f32 %v8206_v40, %v8190_v3 }
 0xd8a   :  { %7675 = vmatmul.mubr.msk.f32.vlgmr.msra.gmra.mrb[30].mxu0 %vm608_vm4, %v3592_v43 }
 0xd8b   :  { %7683 = vmatpush3.msra.mxu0 %v2891_v41  ;;  %7680 = vmatmul.mubr.msk.f32.vlgmr.msra.gmra.mrb[44].mxu1 %vm608_vm4, %v3593_v46  ;;  %v2447_v41 = vadd.f32 %v2443_v35, %v8672_v23 }
 0xd8c   :  { %7688 = vmatpush3.msra.mxu1 %v2893_v50  ;;  %7689 = vmatprep.mubr.msk.f32.mxu1 %vm8353_vm3, %v8352_v33 }
 0xd8d   :  { %7697 = vmatprep.subr.mxu1 %v8352_v33  ;;  %7684 = vmatprep.mubr.msk.f32.mxu0 %vm8353_vm3, %v8352_v33  ;;  %v3581_v53 = vpop.xlane.xlu1 %3580 }
 0xd8e   :  { %7692 = vmatprep.subr.mxu0 %v8352_v33  ;;  %8209 = vrcp.f32 %v3581_v53 }
 0xd90   :  { %v8208_v49 = vpop.eup %8207 }
 0xd91   :  { %v3595_v51 = vmul.f32 %v8208_v49, %v8192_v7  ;;  %v2897_v9 = vpop.permute.xlu1 %2896  ;;  %v73_v7 = vld [vmem:[#allocation2 + $0x148] sm:$0xff] }
 0xd93   :  { %7690 = vmatmul.mubr.msk.f32.vlgmr.msra.gmra.mrb[46].mxu1 %vm608_vm4, %v3595_v51 }
 0xd94   :  { %7699 = vmatprep.mubr.msk.f32.mxu1 %vm8353_vm3, %v8352_v33 }
 0xd98   :  { %v8210_v56 = vpop.eup %8209 }
 0xd99   :  { %v3597_v57 = vmul.f32 %v8210_v56, %v8807_v11 }
 0xdb1   :  { %v3572_v54 = vpop.xlane.xlu0 %3571 }
 0xdb2   :  { %8211 = vrcp.f32 %v3572_v54 }
 0xdb5   :  { %v3578_v55 = vpop.xlane.xlu0 %3577 }
 0xdb6   :  { %8213 = vrcp.f32 %v3578_v55 }
 0xdb9   :  { %v2899_v62 = vpop.permute.xlu0 %2898 }
 0xdba   :  { %7698 = vmatpush3.msra.mxu1 %v2899_v62 }
 0xdbb   :  { %7700 = vmatmul.mubr.msk.f32.vlgmr.msra.gmra.mrb[48].mxu1 %vm608_vm4, %v3597_v57 }
 0xdbc   :  { %v8212_v4 = vpop.eup %8211 }
 0xdbd   :  { %v3594_v60 = vmul.f32 %v8212_v4, %v8196_v24  ;;  %v7030_v24 = vld [vmem:[#allocation2 + $0xf8] ss:$0 sm:$0xff] }
 0xdbf   :  { %7685 = vmatmul.mubr.msk.f32.vlgmr.msra.gmra.mrb[32].mxu0 %vm608_vm4, %v3594_v60  ;;  %v46_v60 = vld [vmem:[#allocation2 + $0x70] sm:$0xff] }
 0xdc0   :  { %v8214_v12 = vpop.eup %8213  ;;  %7693 = vmatpush3.msra.mxu0 %v2897_v9  ;;  %7694 = vmatprep.mubr.msk.f32.mxu0 %vm8353_vm3, %v8352_v33 }
 0xdc1   :  { %v3596_v52 = vmul.f32 %v8214_v12, %v8817_v59  ;;  %7702 = vmatprep.subr.mxu0 %v70_v5  ;;  %v48_v12 = vld [vmem:[#allocation2 + $0x80] sm:$0xff] }
 0xdc3   :  { %7695 = vmatmul.mubr.msk.f32.vlgmr.msra.gmra.mrb[34].mxu0 %vm608_vm4, %v3596_v52  ;;  %v49_v52 = vld [vmem:[#allocation2 + $0x88] sm:$0xff] }
 0xdc4   :  { %7703 = vmatpush3.msra.mxu0 %v70_v5  ;;  %v47_v5 = vld [vmem:[#allocation2 + $0x78] sm:$0xff] }
 0xdc5   :  { %7707 = vmatprep.subr.mxu0 %v71_v1  ;;  %v8032_v9 = vpack.c.bf16 %v47_v5, %v46_v60  ;;  %v7039_v60 = vld [vmem:[#allocation2 + $0x20] ss:$0 sm:$0xff] }
 0xdc7   :  { %8033 = vmatprep.subr.bf16.mxu1 %v8032_v9 }
 0xdc8   :  { %8035 = vmatpush3.bf16.msra.mxu1 %v8032_v9 }
 0xe04   :  { %v3667_v13 = vpop.f32.mrb[28].mxu0 }
 0xe05   :  { %v7666_v0 = vpop.f32.mrb[29].mxu0  ;;  %v3740_v3 = vpop.f32.mrb[42].mxu1  ;;  %7704 = vmatprep.mubr.msk.f32.mxu0 %vm608_vm4, %v3667_v13  ;;  %v50_v13 = vld [vmem:[#allocation2 + $0x90] sm:$0xff] }
 0xe06   :  { %v7671_v63 = vpop.f32.mrb[43].mxu1  ;;  %7705 = vmatmul.mubr.msk.f32.vlgmr.msra.gmra.mrb[36].mxu0 %vm608_vm4, %v3740_v3  ;;  %v51_v0 = vld [vmem:[#allocation2 + $0x98] sm:$0xff] }
 0xe07   :  { %7708 = vmatpush3.msra.mxu0 %v71_v1  ;;  %v8036_v1 = vpack.c.bf16 %v49_v52, %v48_v12  ;;  %v8048_v3 = vpack.c.bf16 %v51_v0, %v50_v13  ;;  %v39_v63 = vld [vmem:[#allocation2 + $0x38] sm:$0xff] }
 0xe08   :  { %7712 = vmatprep.subr.mxu0 %v72_v58 }
 0xe09   :  { %8037 = vmatprep.subr.bf16.mxu1 %v8036_v1 }
 0xe0a   :  { %8039 = vmatpush3.bf16.msra.mxu1 %v8036_v1 }
 0xe5d   :  { %v3813_v6 = vpop.f32.mrb[30].mxu0 }
 0xe5e   :  { %v7676_v61 = vpop.f32.mrb[31].mxu0  ;;  %v3886_v2 = vpop.f32.mrb[44].mxu1  ;;  %7709 = vmatprep.mubr.msk.f32.mxu0 %vm608_vm4, %v3813_v6 }
 0xe5f   :  { %v7681_v8 = vpop.f32.mrb[45].mxu1  ;;  %7710 = vmatmul.mubr.msk.f32.vlgmr.msra.gmra.mrb[36].mxu0 %vm608_vm4, %v3886_v2  ;;  %v52_v61 = vld [vmem:[#allocation2 + $0xa0] sm:$0xff]  ;;  %v53_v2 = vld [vmem:[#allocation2 + $0xa8] sm:$0xff] }
 0xe60   :  { %7713 = vmatpush3.msra.mxu0 %v72_v58  ;;  %v38_v58 = vld [vmem:[#allocation2 + $0x30] sm:$0xff] }
 0xe61   :  { %7717 = vmatprep.subr.mxu0 %v73_v7  ;;  %v8040_v6 = vpack.c.bf16 %v39_v63, %v38_v58 }
 0xe63   :  { %8041 = vmatprep.subr.bf16.mxu1 %v8040_v6 }
 0xe66   :  { %v4032_v11 = vpop.f32.mrb[46].mxu1 }
 0xe67   :  { %v7691_v20 = vpop.f32.mrb[47].mxu1 }
 0xe8e   :  { %v4178_v26 = vpop.f32.mrb[48].mxu1 }
 0xe8f   :  { %v7701_v30 = vpop.f32.mrb[49].mxu1 }
 0xe92   :  { %v3959_v16 = vpop.f32.mrb[32].mxu0 }
 0xe93   :  { %v7686_v19 = vpop.f32.mrb[33].mxu0  ;;  %7714 = vmatprep.mubr.msk.f32.mxu0 %vm608_vm4, %v3959_v16 }
 0xe94   :  { %7715 = vmatmul.mubr.msk.f32.vlgmr.msra.gmra.mrb[36].mxu0 %vm608_vm4, %v4032_v11 }
 0xe95   :  { %7718 = vmatpush3.msra.mxu0 %v73_v7  ;;  %v8052_v7 = vpack.c.bf16 %v53_v2, %v52_v61  ;;  %v7045_v2 = vld [vmem:[#allocation2 + $0x28] ss:$0 sm:$0xff] }
 0xe96   :  { %v4105_v21 = vpop.f32.mrb[34].mxu0  ;;  %8049 = vmatprep.subr.bf16.mxu0 %v8048_v3 }
 0xe97   :  { %v7696_v22 = vpop.f32.mrb[35].mxu0  ;;  %7719 = vmatprep.mubr.msk.f32.mxu0 %vm608_vm4, %v4105_v21 }
 0xe9c   :  { %7720 = vmatmul.mubr.msk.f32.vlgmr.msra.gmra.mrb[36].mxu0 %vm608_vm4, %v4178_v26 }
 0xe9d   :  { %8051 = vmatpush3.bf16.msra.mxu0 %v8048_v3 }
 0xe9e   :  { %8053 = vmatprep.subr.bf16.mxu0 %v8052_v7 }
 0xea1   :  { %8055 = vmatpush3.bf16.msra.mxu0 %v8052_v7 }
 0xea2   :  { %7765 = vmatprep.subr.mxu0 %v8352_v33 }
 0xf6f   :  { %v7721_v37 = vpop.f32.mrb[36].mxu0 }
 0xf70   :  { %v8090_v36 = vadd.f32 %v7721_v37, %v7030_v24  ;;  %v4507_v59 = vpop.f32.mrb[37].mxu0 }
 0xf71   :  { %v8091_v48 = vadd.f32 %v7030_v24, %v4507_v59 }
 0xf72   :  { %v8860_v25 = vadd.f32 %v8090_v36, %v8683_v32  ;;  %v2451_v32 = vsel %vm277_vm2, %v2447_v41, 0.0  ;;  %v7037_v36 = vld [vmem:[#allocation2 + $0xc8] ss:$0 sm:$0xff] }
 0xf73   :  { %v8863_v38 = vadd.f32 %v8091_v48, %v8685_v34 }
 0xf74   :  { %v4523_v27 = vsel %vm277_vm2, %v8860_v25, 0.0 }
 0xf75   :  { %4524 = vadd.xlane.f32.xlu0 %v4523_v27  ;;  %v4520_v17 = vsel %vm277_vm2, %v8863_v38, 0.0  ;;  %v7038_v27 = vld [vmem:[#allocation2 + $0xc0] ss:$0 sm:$0xff] }
 0xf76   :  { %4521 = vadd.xlane.f32.xlu1 %v4520_v17 }
 0xf79   :  { %2449 = vadd.xlane.f32.xlu0 %v2448_v14  ;;  %v41_v14 = vld [vmem:[#allocation2 + $0x48] sm:$0xff] }
 0xf7a   :  { %2452 = vadd.xlane.f32.xlu1 %v2451_v32 }
0x1002   :  { %v4525_v34 = vpop.xlane.xlu0 %4524 }
0x1003   :  { %v4527_v42 = vmul.f32 0.03125, %v4525_v34  ;;  %v4522_v44 = vpop.xlane.xlu1 %4521  ;;  %v6987_v34 = vld [vmem:[#allocation2 + $0x2c8] ss:$0 sm:$0xff] }
0x1004   :  { %v4526_v45 = vmul.f32 0.03125, %v4522_v44 }
0x1005   :  { %v8874_v47 = vsub.f32 %v8860_v25, %v4527_v42 }
0x1006   :  { %v8877_v15 = vsub.f32 %v8863_v38, %v4526_v45  ;;  %v2450_v40 = vpop.xlane.xlu0 %2449 }
0x1007   :  { %v2454_v43 = vmul.f32 0.03125, %v2450_v40  ;;  %v2453_v23 = vpop.xlane.xlu1 %2452  ;;  %v4531_v46 = vmul.f32 %v8874_v47, %v8874_v47 }
0x1008   :  { %v2455_v50 = vmul.f32 0.03125, %v2453_v23  ;;  %v4530_v49 = vmul.f32 %v8877_v15, %v8877_v15 }
0x1009   :  { %v8883_v51 = vsub.f32 %v2446_v39, %v2454_v43  ;;  %v4535_v53 = vsel %vm277_vm2, %v4531_v46, 0.0  ;;  %v6988_v46 = vld [vmem:[#allocation2 + $0x2c0] ss:$0 sm:$0xff] }
0x100a   :  { %v8886_v54 = vsub.f32 %v2447_v41, %v2455_v50  ;;  %4536 = vadd.xlane.f32.xlu1 %v4535_v53  ;;  %v4532_v55 = vsel %vm277_vm2, %v4530_v49, 0.0  ;;  %v40_v41 = vld [vmem:[#allocation2 + $0x40] sm:$0xff] }
0x100b   :  { %4533 = vadd.xlane.f32.xlu0 %v4532_v55  ;;  %v2458_v56 = vmul.f32 %v8883_v51, %v8883_v51  ;;  %v8044_v23 = vpack.c.bf16 %v41_v14, %v40_v41 }
0x100c   :  { %v2459_v57 = vmul.f32 %v8886_v54, %v8886_v54 }
0x100d   :  { %v2460_v62 = vsel %vm277_vm2, %v2458_v56, 0.0  ;;  %v7042_v56 = vld [vmem:[#allocation2 + $0x10] ss:$0 sm:$0xff] }
0x100e   :  { %v2463_v4 = vsel %vm277_vm2, %v2459_v57, 0.0 }
0x100f   :  { %2461 = vadd.xlane.f32.xlu0 %v2460_v62  ;;  %2464 = vadd.xlane.f32.xlu1 %v2463_v4 }
0x1097   :  { %v4537_v8 = vpop.xlane.xlu1 %4536 }
0x1098   :  { %v4539_v11 = vmul.f32 0.03125, %v4537_v8  ;;  %v4534_v20 = vpop.xlane.xlu0 %4533 }
0x1099   :  { %v4538_v26 = vmul.f32 0.03125, %v4534_v20 }
0x109a   :  { %v4541_v30 = vadd.f32 1e-06, %v4539_v11 }
0x109b   :  { %v4540_v16 = vadd.f32 1e-06, %v4538_v26 }
0x109c   :  { %8215 = vrsqrt.f32 %v4541_v30  ;;  %v2462_v19 = vpop.xlane.xlu0 %2461  ;;  %v2465_v21 = vpop.xlane.xlu1 %2464 }
0x109d   :  { %8217 = vrsqrt.f32 %v4540_v16  ;;  %v2466_v22 = vmul.f32 0.03125, %v2462_v19  ;;  %v2467_v29 = vmul.f32 0.03125, %v2465_v21 }
0x109f   :  { %v2468_v24 = vadd.f32 1e-06, %v2466_v22  ;;  %v2469_v37 = vadd.f32 1e-06, %v2467_v29 }
0x10a1   :  { %8219 = vrsqrt.f32 %v2468_v24 }
0x10a2   :  { %8221 = vrsqrt.f32 %v2469_v37 }
0x10a6   :  { %v8216_v31 = vpop.eup %8215 }
0x10a7   :  { %v8218_v59 = vpop.eup %8217  ;;  %v4545_v35 = vmul.f32 %v8216_v31, %v8874_v47 }
0x10a8   :  { %v4544_v48 = vmul.f32 %v8218_v59, %v8877_v15 }
0x10a9   :  { %v4551_v39 = vmul.f32 %v7037_v36, %v4545_v35 }
0x10aa   :  { %v4550_v17 = vmul.f32 %v7037_v36, %v4544_v48 }
0x10ab   :  { %v8220_v32 = vpop.eup %8219  ;;  %v4557_v43 = vadd.f32 %v7038_v27, %v4551_v39 }
0x10ac   :  { %v8222_v42 = vpop.eup %8221  ;;  %v4556_v44 = vadd.f32 %v7038_v27, %v4550_v17  ;;  %v2472_v45 = vmul.f32 %v8220_v32, %v8883_v51 }
0x10ad   :  { %v2473_v40 = vmul.f32 %v8222_v42, %v8886_v54 }
0x10ae   :  { %7730 = vmatprep.mubr.msk.f32.mxu1 %vm277_vm2, %v4556_v44  ;;  %v2478_v47 = vmul.f32 %v6987_v34, %v2472_v45 }
0x10af   :  { %7731 = vmatmul.mubr.msk.f32.vlgmr.msra.gmra.mrb[50].mxu1 %vm277_vm2, %v4557_v43  ;;  %v2479_v15 = vmul.f32 %v6987_v34, %v2473_v40 }
0x10b0   :  { %8043 = vmatpush3.bf16.msra.mxu1 %v8040_v6  ;;  %v2484_v50 = vadd.f32 %v6988_v46, %v2478_v47 }
0x10b1   :  { %8045 = vmatprep.subr.bf16.mxu1 %v8044_v23  ;;  %v2485_v49 = vadd.f32 %v6988_v46, %v2479_v15 }
0x10b2   :  { %7741 = vmatprep.mubr.msk.f32.mxu1 %vm277_vm2, %v2484_v50  ;;  %7752 = vmatprep.mubr.msk.f32.mxu0 %vm277_vm2, %v2484_v50 }
0x10b3   :  { %7753 = vmatmul.mubr.msk.f32.vlgmr.msra.gmra.mrb[38].mxu0 %vm277_vm2, %v2485_v49 }
0x10b4   :  { %8047 = vmatpush3.bf16.msra.mxu1 %v8044_v23  ;;  %7767 = vmatprep.mubr.msk.f32.mxu0 %vm8353_vm3, %v8352_v33 }
0x10b5   :  { %7755 = vmatprep.subr.mxu1 %v8352_v33 }
0x10b7   :  { %7742 = vmatmul.mubr.msk.f32.vlgmr.msra.gmra.mrb[52].mxu1 %vm277_vm2, %v2485_v49 }
0x10b8   :  { %7757 = vmatprep.mubr.msk.f32.mxu1 %vm8353_vm3, %v8352_v33 }
0x1182   :  { %v7732_v51 = vpop.f32.mrb[50].mxu1 }
0x1183   :  { %v4634_v53 = vpop.f32.mrb[51].mxu1  ;;  %v4640_v12 = vadd.f32 %v7732_v51, %v7039_v60 }
0x1184   :  { %v4635_v9 = vadd.f32 %v7039_v60, %v4634_v53 }
0x1186   :  { %v8911_v54 = vpop.f32.mrb[38].mxu0 }
0x1187   :  { %v4798_v55 = vpop.f32.mrb[39].mxu0  ;;  %v8962_v20 = vadd.f32 %v8911_v54, %v7045_v2 }
0x1188   :  { %v8959_v8 = vadd.f32 %v7045_v2, %v4798_v55 }
0x118a   :  { %v7743_v57 = vpop.f32.mrb[52].mxu1 }
0x118b   :  { %v4725_v62 = vadd.f32 %v7743_v57, %v7042_v56  ;;  %v4719_v4 = vpop.f32.mrb[53].mxu1 }
0x118c   :  { %v4720_v5 = vadd.f32 %v7042_v56, %v4719_v4 }
0x118d   :  { %4825 = vrot.lane.b32.xlu1 %v4725_v62, %s8354_s2 }
0x118e   :  { %4823 = vrot.lane.b32.xlu0 %v4720_v5, %s8354_s2  ;;  %7756 = vmatpush3.xpose.msk.msra.mxu1 %vm608_vm4, %v4720_v5 }
0x118f   :  { %7760 = vmatprep.subr.mxu1 %v8352_v33 }
0x1191   :  { %4809 = vrot.lane.b32.xlu1 %v4635_v9, %s8354_s2  ;;  %7758 = vmatmul.mubr.msk.f32.vlgmr.msra.gmra.mrb[54].mxu1 %vm608_vm4, %v4635_v9 }
0x1192   :  { %4811 = vrot.lane.b32.xlu0 %v4640_v12, %s8354_s2  ;;  %7761 = vmatpush3.xpose.msk.msra.mxu1 %vm608_vm4, %v4725_v62 }
0x1193   :  { %7762 = vmatprep.mubr.msk.f32.mxu1 %vm8353_vm3, %v8352_v33  ;;  %7770 = vmatprep.subr.mxu1 %v8352_v33 }
0x1195   :  { %4827 = vrot.lane.b32.xlu1 %v4720_v5, %s8355_s7  ;;  %7763 = vmatmul.mubr.msk.f32.vlgmr.msra.gmra.mrb[56].mxu1 %vm608_vm4, %v4640_v12 }
0x1196   :  { %4829 = vrot.lane.b32.xlu0 %v4725_v62, %s8355_s7  ;;  %7772 = vmatprep.mubr.msk.f32.mxu1 %vm8353_vm3, %v8352_v33 }
0x1199   :  { %4813 = vrot.lane.b32.xlu1 %v4635_v9, %s8355_s7 }
0x119a   :  { %4815 = vrot.lane.b32.xlu0 %v4640_v12, %s8355_s7 }
0x119d   :  { %4831 = vrot.lane.b32.xlu1 %v4720_v5, %s8356_s8 }
0x119e   :  { %4833 = vrot.lane.b32.xlu0 %v4725_v62, %s8356_s8 }
0x11a1   :  { %4817 = vrot.lane.b32.xlu1 %v4635_v9, %s8356_s8 }
0x11a2   :  { %4819 = vrot.lane.b32.xlu0 %v4640_v12, %s8356_s8 }
0x11ff   :  { %v4826_v52 = vpop.permute.xlu1 %4825 }
0x1200   :  { %v4824_v1 = vpop.permute.xlu0 %4823  ;;  %7771 = vmatpush3.xpose.msk.msra.mxu1 %vm608_vm4, %v4826_v52 }
0x1201   :  { %7766 = vmatpush3.xpose.msk.msra.mxu0 %vm608_vm4, %v4824_v1  ;;  %7780 = vmatprep.subr.mxu1 %v8352_v33 }
0x1202   :  { %7775 = vmatprep.subr.mxu0 %v8352_v33 }
0x1203   :  { %v4810_v13 = vpop.permute.xlu1 %4809 }
0x1204   :  { %7768 = vmatmul.mubr.msk.f32.vlgmr.msra.gmra.mrb[40].mxu0 %vm608_vm4, %v4810_v13  ;;  %v4812_v0 = vpop.permute.xlu0 %4811 }
0x1205   :  { %7773 = vmatmul.mubr.msk.f32.vlgmr.msra.gmra.mrb[58].mxu1 %vm608_vm4, %v4812_v0  ;;  %7777 = vmatprep.mubr.msk.f32.mxu0 %vm8353_vm3, %v8352_v33 }
0x1206   :  { %7782 = vmatprep.mubr.msk.f32.mxu1 %vm8353_vm3, %v8352_v33 }
0x1207   :  { %v4828_v3 = vpop.permute.xlu1 %4827 }
0x1208   :  { %7776 = vmatpush3.xpose.msk.msra.mxu0 %vm608_vm4, %v4828_v3  ;;  %v4830_v58 = vpop.permute.xlu0 %4829 }
0x1209   :  { %7781 = vmatpush3.xpose.msk.msra.mxu1 %vm608_vm4, %v4830_v58  ;;  %7785 = vmatprep.subr.mxu0 %v8352_v33 }
0x120a   :  { %7790 = vmatprep.subr.mxu1 %v8352_v33 }
0x120b   :  { %v4814_v63 = vpop.permute.xlu1 %4813 }
0x120c   :  { %7778 = vmatmul.mubr.msk.f32.vlgmr.msra.gmra.mrb[42].mxu0 %vm608_vm4, %v4814_v63  ;;  %v4816_v6 = vpop.permute.xlu0 %4815 }
0x120d   :  { %7783 = vmatmul.mubr.msk.f32.vlgmr.msra.gmra.mrb[60].mxu1 %vm608_vm4, %v4816_v6  ;;  %7787 = vmatprep.mubr.msk.f32.mxu0 %vm8353_vm3, %v8352_v33 }
0x120e   :  { %7792 = vmatprep.mubr.msk.f32.mxu1 %vm8353_vm3, %v8352_v33 }
0x120f   :  { %v4832_v61 = vpop.permute.xlu1 %4831 }
0x1210   :  { %7786 = vmatpush3.xpose.msk.msra.mxu0 %vm608_vm4, %v4832_v61  ;;  %v4834_v7 = vpop.permute.xlu0 %4833 }
0x1211   :  { %7791 = vmatpush3.xpose.msk.msra.mxu1 %vm608_vm4, %v4834_v7  ;;  %7795 = vmatprep.subr.mxu0 %v8352_v33 }
0x1212   :  { %7800 = vmatprep.subr.mxu1 %v8352_v33 }
0x1213   :  { %v4818_v11 = vpop.permute.xlu1 %4817 }
0x1214   :  { %7788 = vmatmul.mubr.msk.f32.vlgmr.msra.gmra.mrb[44].mxu0 %vm608_vm4, %v4818_v11  ;;  %v4820_v26 = vpop.permute.xlu0 %4819 }
0x1215   :  { %7796 = vmatpush3.msra.mxu0 %v8959_v8  ;;  %7793 = vmatmul.mubr.msk.f32.vlgmr.msra.gmra.mrb[62].mxu1 %vm608_vm4, %v4820_v26 }
0x1216   :  { %7801 = vmatpush3.msra.mxu1 %v8962_v20  ;;  %7797 = vmatprep.mubr.msk.f32.mxu0 %vm8353_vm3, %v8352_v33 }
0x1217   :  { %7805 = vmatprep.subr.mxu0 %v8352_v33  ;;  %7802 = vmatprep.mubr.msk.f32.mxu1 %vm8353_vm3, %v8352_v33 }
0x1218   :  { %7810 = vmatprep.subr.mxu1 %v8352_v33 }
0x1264   :  { %v4925_v30 = vpop.f32.mrb[54].mxu1 }
0x1265   :  { %v5447_v16 = vmul.f32 0.35355338, %v4925_v30  ;;  %v7759_v19 = vpop.f32.mrb[55].mxu1 }
0x1267   :  { %v5455_v21 = vadd.f32 %v5447_v16, %v8554_v10 }
0x1268   :  { %v4999_v22 = vpop.f32.mrb[56].mxu1 }
0x1269   :  { %v5448_v29 = vmul.f32 0.35355338, %v4999_v22  ;;  %v7764_v24 = vpop.f32.mrb[57].mxu1  ;;  %v5463_v37 = vsel %vm608_vm4, %v5455_v21, -inf }
0x126a   :  { %5464 = vmax.xlane.f32.xlu1 %v5463_v37 }
0x126b   :  { %v5456_v31 = vadd.f32 %v5448_v29, %v8557_v18 }
0x126d   :  { %v5466_v36 = vsel %vm608_vm4, %v5456_v31, -inf }
0x126e   :  { %5467 = vmax.xlane.f32.xlu0 %v5466_v36 }
0x12d7   :  { %v5073_v59 = vpop.f32.mrb[40].mxu0 }
0x12d8   :  { %v5449_v35 = vmul.f32 0.35355338, %v5073_v59  ;;  %v7769_v48 = vpop.f32.mrb[41].mxu0  ;;  %v5147_v27 = vpop.f32.mrb[58].mxu1 }
0x12d9   :  { %v5450_v39 = vmul.f32 0.35355338, %v5147_v27  ;;  %v7774_v17 = vpop.f32.mrb[59].mxu1 }
0x12da   :  { %v5457_v41 = vadd.f32 %v5449_v35, %v8554_v10 }
0x12db   :  { %v5458_v14 = vadd.f32 %v5450_v39, %v8557_v18 }
0x12dc   :  { %v5469_v32 = vsel %vm608_vm4, %v5457_v41, -inf }
0x12dd   :  { %5470 = vmax.xlane.f32.xlu0 %v5469_v32  ;;  %v5472_v34 = vsel %vm608_vm4, %v5458_v14, -inf }
0x12de   :  { %5473 = vmax.xlane.f32.xlu1 %v5472_v34 }
0x12df   :  { %v5221_v42 = vpop.f32.mrb[42].mxu0 }
0x12e0   :  { %v5451_v44 = vmul.f32 0.35355338, %v5221_v42  ;;  %v7779_v45 = vpop.f32.mrb[43].mxu0  ;;  %v5295_v40 = vpop.f32.mrb[60].mxu1 }
0x12e1   :  { %v5452_v43 = vmul.f32 0.35355338, %v5295_v40  ;;  %v7784_v23 = vpop.f32.mrb[61].mxu1 }
0x12e2   :  { %v8983_v46 = vadd.f32 %v5451_v44, %v8554_v10 }
0x12e3   :  { %v5460_v47 = vadd.f32 %v5452_v43, %v8557_v18 }
0x12e4   :  { %v5475_v15 = vsel %vm608_vm4, %v8983_v46, -inf }
0x12e5   :  { %5476 = vmax.xlane.f32.xlu0 %v5475_v15  ;;  %v5478_v50 = vsel %vm608_vm4, %v5460_v47, -inf }
0x12e6   :  { %5479 = vmax.xlane.f32.xlu1 %v5478_v50 }
0x12e7   :  { %v5369_v49 = vpop.f32.mrb[44].mxu0 }
0x12e8   :  { %v5453_v51 = vmul.f32 0.35355338, %v5369_v49  ;;  %v7789_v53 = vpop.f32.mrb[45].mxu0  ;;  %v5443_v54 = vpop.f32.mrb[62].mxu1 }
0x12e9   :  { %v5454_v55 = vmul.f32 0.35355338, %v5443_v54  ;;  %v7794_v56 = vpop.f32.mrb[63].mxu1 }
0x12ea   :  { %v5461_v57 = vadd.f32 %v5453_v51, %v8554_v10 }
0x12eb   :  { %v5462_v62 = vadd.f32 %v5454_v55, %v8557_v18 }
0x12ec   :  { %v5481_v4 = vsel %vm608_vm4, %v5461_v57, -inf }
0x12ed   :  { %5482 = vmax.xlane.f32.xlu0 %v5481_v4  ;;  %v5484_v60 = vsel %vm608_vm4, %v5462_v62, -inf }
0x12ee   :  { %5485 = vmax.xlane.f32.xlu1 %v5484_v60 }
0x12f7   :  { %v5465_v5 = vpop.xlane.xlu1 %5464 }
0x12f8   :  { %v5487_v12 = vsub.f32 %v5455_v21, %v5465_v5 }
0x12fa   :  { %v5495_v1 = vmul.f32 1.442695, %v5487_v12 }
0x12fb   :  { %v5468_v9 = vpop.xlane.xlu0 %5467 }
0x12fc   :  { %v5488_v52 = vsub.f32 %v5456_v31, %v5468_v9  ;;  %8223 = vpow2.f32 %v5495_v1 }
0x12fe   :  { %v5497_v10 = vmul.f32 1.442695, %v5488_v52 }
0x12ff   :  { %4839 = vrot.lane.b32.xlu1 %v8962_v20, %s8354_s2 }
0x1300   :  { %8225 = vpow2.f32 %v5497_v10 }
0x1303   :  { %4837 = vrot.lane.b32.xlu0 %v8959_v8, %s8354_s2 }
0x1306   :  { %v8224_v18 = vpop.eup %8223 }
0x1307   :  { %v5511_v0 = vsel %vm608_vm4, %v8224_v18, 0.0 }
0x130a   :  { %v8226_v13 = vpop.eup %8225 }
0x130b   :  { %v5514_v3 = vsel %vm608_vm4, %v8226_v13, 0.0 }
0x1322   :  { %5512 = vadd.xlane.f32.xlu0 %v5511_v0 }
0x1323   :  { %5515 = vadd.xlane.f32.xlu1 %v5514_v3 }
0x1334   :  { %4843 = vrot.lane.b32.xlu1 %v8959_v8, %s8355_s7 }
0x136a   :  { %v5471_v58 = vpop.xlane.xlu0 %5470 }
0x136b   :  { %v5489_v63 = vsub.f32 %v5457_v41, %v5471_v58  ;;  %v5474_v6 = vpop.xlane.xlu1 %5473 }
0x136c   :  { %v5490_v61 = vsub.f32 %v5458_v14, %v5474_v6 }
0x136d   :  { %v5499_v2 = vmul.f32 1.442695, %v5489_v63  ;;  %v43_v63 = vld [vmem:[#allocation2 + $0x58] sm:$0xff] }
0x136e   :  { %v5501_v7 = vmul.f32 1.442695, %v5490_v61 }
0x136f   :  { %8227 = vpow2.f32 %v5499_v2 }
0x1370   :  { %8229 = vpow2.f32 %v5501_v7  ;;  %v44_v7 = vld [vmem:[#allocation2 + $0x60] sm:$0xff] }
0x1372   :  { %v5477_v48 = vpop.xlane.xlu0 %5476 }
0x1373   :  { %v5480_v11 = vpop.xlane.xlu1 %5479  ;;  %v5491_v27 = vsub.f32 %v8983_v46, %v5477_v48  ;;  %v7074_v48 = vld [vmem:[#allocation2 + $0x18] ss:$0 sm:$0xff] }
0x1374   :  { %v5492_v26 = vsub.f32 %v5460_v47, %v5480_v11 }
0x1375   :  { %v5503_v17 = vmul.f32 1.442695, %v5491_v27 }
0x1376   :  { %v5505_v30 = vmul.f32 1.442695, %v5492_v26 }
0x1378   :  { %8231 = vpow2.f32 %v5505_v30 }
0x1379   :  { %v8228_v16 = vpop.eup %8227 }
0x137a   :  { %v8230_v19 = vpop.eup %8229  ;;  %v5517_v21 = vsel %vm608_vm4, %v8228_v16, 0.0  ;;  %v5483_v39 = vpop.xlane.xlu0 %5482 }
0x137b   :  { %5518 = vadd.xlane.f32.xlu0 %v5517_v21  ;;  %v5486_v22 = vpop.xlane.xlu1 %5485  ;;  %v5520_v29 = vsel %vm608_vm4, %v8230_v19, 0.0  ;;  %v5493_v41 = vsub.f32 %v5461_v57, %v5483_v39 }
0x137c   :  { %v5494_v24 = vsub.f32 %v5462_v62, %v5486_v22  ;;  %5521 = vadd.xlane.f32.xlu1 %v5520_v29 }
0x137d   :  { %v5507_v14 = vmul.f32 1.442695, %v5493_v41 }
0x137e   :  { %v5509_v37 = vmul.f32 1.442695, %v5494_v24  ;;  %v4838_v32 = vpop.permute.xlu0 %4837 }
0x137f   :  { %v4840_v42 = vpop.permute.xlu1 %4839 }
0x1380   :  { %8233 = vpow2.f32 %v5509_v37 }
0x1381   :  { %8235 = vpow2.f32 %v5503_v17 }
0x1382   :  { %v8232_v31 = vpop.eup %8231  ;;  %8237 = vpow2.f32 %v5507_v14 }
0x1383   :  { %v5526_v36 = vsel %vm608_vm4, %v8232_v31, 0.0 }
0x1384   :  { %5527 = vadd.xlane.f32.xlu1 %v5526_v36 }
0x138a   :  { %v9004_v59 = vpop.eup %8233 }
0x138b   :  { %v5532_v35 = vsel %vm608_vm4, %v9004_v59, 0.0  ;;  %v8236_v34 = vpop.eup %8235 }
0x138c   :  { %5533 = vadd.xlane.f32.xlu1 %v5532_v35  ;;  %v5523_v45 = vsel %vm608_vm4, %v8236_v34, 0.0  ;;  %v9014_v40 = vpop.eup %8237 }
0x1391   :  { %4845 = vrot.lane.b32.xlu0 %v8962_v20, %s8355_s7 }
0x139d   :  { %4849 = vrot.lane.b32.xlu1 %v8959_v8, %s8356_s8  ;;  %v5529_v8 = vsel %vm608_vm4, %v9014_v40, 0.0 }
0x13af   :  { %v5513_v44 = vpop.xlane.xlu0 %5512 }
0x13b0   :  { %8239 = vrcp.f32 %v5513_v44  ;;  %5524 = vadd.xlane.f32.xlu0 %v5523_v45  ;;  %v5516_v43 = vpop.xlane.xlu1 %5515 }
0x13b1   :  { %8241 = vrcp.f32 %v5516_v43 }
0x13b4   :  { %5530 = vadd.xlane.f32.xlu0 %v5529_v8  ;;  %v4844_v50 = vpop.permute.xlu1 %4843 }
0x13ba   :  { %v8240_v23 = vpop.eup %8239 }
0x13bb   :  { %v8242_v46 = vpop.eup %8241  ;;  %v5543_v47 = vmul.f32 %v8240_v23, %v8224_v18 }
0x13bc   :  { %v5544_v15 = vmul.f32 %v8242_v46, %v8226_v13  ;;  %v42_v13 = vld [vmem:[#allocation2 + $0x50] sm:$0xff] }
0x13bd   :  { %7798 = vmatmul.mubr.msk.f32.vlgmr.msra.gmra.mrb[46].mxu0 %vm608_vm4, %v5543_v47 }
0x13be   :  { %7806 = vmatpush3.msra.mxu0 %v4838_v32  ;;  %7803 = vmatmul.mubr.msk.f32.vlgmr.msra.gmra.mrb[64].mxu1 %vm608_vm4, %v5544_v15  ;;  %v82_v15 = vld [vmem:[#allocation2 + $0x190] sm:$0xff] }
0x13bf   :  { %7811 = vmatpush3.msra.mxu1 %v4840_v42  ;;  %7807 = vmatprep.mubr.msk.f32.mxu0 %vm8353_vm3, %v8352_v33 }
0x13c0   :  { %7815 = vmatprep.subr.mxu0 %v8352_v33  ;;  %7812 = vmatprep.mubr.msk.f32.mxu1 %vm8353_vm3, %v8352_v33 }
0x13c1   :  { %7820 = vmatprep.subr.mxu1 %v8352_v33 }
0x13ca   :  { %4851 = vrot.lane.b32.xlu0 %v8962_v20, %s8356_s8 }
0x1408   :  { %v5519_v49 = vpop.xlane.xlu0 %5518 }
0x1409   :  { %8243 = vrcp.f32 %v5519_v49  ;;  %v5522_v51 = vpop.xlane.xlu1 %5521 }
0x140a   :  { %8245 = vrcp.f32 %v5522_v51  ;;  %v84_v51 = vld [vmem:[#allocation2 + $0x1a0] sm:$0xff] }
0x140c   :  { %v4846_v62 = vpop.permute.xlu0 %4845 }
0x1411   :  { %v5528_v53 = vpop.xlane.xlu1 %5527 }
0x1412   :  { %8247 = vrcp.f32 %v5528_v53  ;;  %v85_v53 = vld [vmem:[#allocation2 + $0x1a8] sm:$0xff] }
0x1413   :  { %v8244_v54 = vpop.eup %8243 }
0x1414   :  { %v8246_v55 = vpop.eup %8245  ;;  %v5545_v56 = vmul.f32 %v8244_v54, %v8228_v16  ;;  %v8060_v54 = vpack.c.bf16 %v85_v53, %v84_v51 }
0x1415   :  { %v5546_v57 = vmul.f32 %v8246_v55, %v8230_v19  ;;  %v45_v19 = vld [vmem:[#allocation2 + $0x68] sm:$0xff]  ;;  %v86_v55 = vld [vmem:[#allocation2 + $0x1b0] sm:$0xff] }
0x1416   :  { %7808 = vmatmul.mubr.msk.f32.vlgmr.msra.gmra.mrb[48].mxu0 %vm608_vm4, %v5545_v56  ;;  %v87_v56 = vld [vmem:[#allocation2 + $0x1b8] sm:$0xff] }
0x1417   :  { %7816 = vmatpush3.msra.mxu0 %v4844_v50  ;;  %7813 = vmatmul.mubr.msk.f32.vlgmr.msra.gmra.mrb[66].mxu1 %vm608_vm4, %v5546_v57  ;;  %v83_v50 = vld [vmem:[#allocation2 + $0x198] sm:$0xff]  ;;  %v8064_v57 = vpack.c.bf16 %v87_v56, %v86_v55 }
0x1418   :  { %7821 = vmatpush3.msra.mxu1 %v4846_v62  ;;  %7822 = vmatprep.mubr.msk.f32.mxu1 %vm8353_vm3, %v8352_v33  ;;  %v8056_v49 = vpack.c.bf16 %v83_v50, %v82_v15  ;;  %v137_v50 = vld [vmem:[#allocation2 + $0x348] sm:$0xff] }
0x1419   :  { %7830 = vmatprep.subr.mxu1 %v8352_v33  ;;  %7817 = vmatprep.mubr.msk.f32.mxu0 %vm8353_vm3, %v8352_v33  ;;  %v5534_v60 = vpop.xlane.xlu1 %5533 }
0x141a   :  { %7825 = vmatprep.subr.mxu0 %v8352_v33  ;;  %8249 = vrcp.f32 %v5534_v60 }
0x141c   :  { %v8248_v20 = vpop.eup %8247 }
0x141d   :  { %v5548_v4 = vmul.f32 %v8248_v20, %v8232_v31  ;;  %v4850_v0 = vpop.permute.xlu1 %4849 }
0x141f   :  { %7823 = vmatmul.mubr.msk.f32.vlgmr.msra.gmra.mrb[68].mxu1 %vm608_vm4, %v5548_v4 }
0x1420   :  { %7832 = vmatprep.mubr.msk.f32.mxu1 %vm8353_vm3, %v8352_v33 }
0x1424   :  { %v8250_v12 = vpop.eup %8249 }
0x1425   :  { %v5550_v52 = vmul.f32 %v8250_v12, %v9004_v59 }
0x143d   :  { %v5525_v5 = vpop.xlane.xlu0 %5524 }
0x143e   :  { %8251 = vrcp.f32 %v5525_v5 }
0x1441   :  { %v5531_v9 = vpop.xlane.xlu0 %5530 }
0x1442   :  { %8253 = vrcp.f32 %v5531_v9 }
0x1445   :  { %v4852_v1 = vpop.permute.xlu0 %4851 }
0x1446   :  { %7831 = vmatpush3.msra.mxu1 %v4852_v1 }
0x1447   :  { %7833 = vmatmul.mubr.msk.f32.vlgmr.msra.gmra.mrb[70].mxu1 %vm608_vm4, %v5550_v52  ;;  %8057 = vmatprep.subr.bf16.mxu1 %v8056_v49  ;;  %v7081_v52 = vld [vmem:[#allocation2 + $0xd8] ss:$0 sm:$0xff] }
0x1448   :  { %v8252_v10 = vpop.eup %8251  ;;  %8059 = vmatpush3.bf16.msra.mxu1 %v8056_v49  ;;  %v138_v49 = vld [vmem:[#allocation2 + $0x350] sm:$0xff] }
0x1449   :  { %v5547_v18 = vmul.f32 %v8252_v10, %v8236_v34  ;;  %8061 = vmatprep.subr.bf16.mxu1 %v8060_v54  ;;  %v8084_v51 = vpack.c.bf16 %v138_v49, %v137_v50 }
0x144b   :  { %7818 = vmatmul.mubr.msk.f32.vlgmr.msra.gmra.mrb[50].mxu0 %vm608_vm4, %v5547_v18 }
0x144c   :  { %v8254_v3 = vpop.eup %8253  ;;  %7826 = vmatpush3.msra.mxu0 %v4850_v0  ;;  %7827 = vmatprep.mubr.msk.f32.mxu0 %vm8353_vm3, %v8352_v33 }
0x144d   :  { %v5549_v58 = vmul.f32 %v8254_v3, %v9014_v40  ;;  %7835 = vmatprep.subr.mxu0 %v42_v13  ;;  %8063 = vmatpush3.bf16.msra.mxu1 %v8060_v54 }
0x144e   :  { %8065 = vmatprep.subr.bf16.mxu1 %v8064_v57 }
0x144f   :  { %7828 = vmatmul.mubr.msk.f32.vlgmr.msra.gmra.mrb[52].mxu0 %vm608_vm4, %v5549_v58  ;;  %v88_v58 = vld [vmem:[#allocation2 + $0x1c0] sm:$0xff] }
0x1450   :  { %7836 = vmatpush3.msra.mxu0 %v42_v13  ;;  %v7082_v13 = vld [vmem:[#allocation2 + $0xd0] ss:$0 sm:$0xff] }
0x1451   :  { %7840 = vmatprep.subr.mxu0 %v43_v63 }
0x1490   :  { %v5620_v6 = vpop.f32.mrb[46].mxu0 }
0x1491   :  { %v7799_v61 = vpop.f32.mrb[47].mxu0  ;;  %v5693_v2 = vpop.f32.mrb[64].mxu1  ;;  %7837 = vmatprep.mubr.msk.f32.mxu0 %vm608_vm4, %v5620_v6 }
0x1492   :  { %v7804_v11 = vpop.f32.mrb[65].mxu1  ;;  %7838 = vmatmul.mubr.msk.f32.vlgmr.msra.gmra.mrb[54].mxu0 %vm608_vm4, %v5693_v2 }
0x1493   :  { %7841 = vmatpush3.msra.mxu0 %v43_v63  ;;  %v89_v63 = vld [vmem:[#allocation2 + $0x1c8] sm:$0xff]  ;;  %v91_v11 = vld [vmem:[#allocation2 + $0x1d8] sm:$0xff] }
0x1494   :  { %7845 = vmatprep.subr.mxu0 %v44_v7  ;;  %v8068_v2 = vpack.c.bf16 %v89_v63, %v88_v58 }
0x14e9   :  { %v5766_v26 = vpop.f32.mrb[48].mxu0 }
0x14ea   :  { %v7809_v30 = vpop.f32.mrb[49].mxu0  ;;  %v5839_v16 = vpop.f32.mrb[66].mxu1  ;;  %7842 = vmatprep.mubr.msk.f32.mxu0 %vm608_vm4, %v5766_v26 }
0x14eb   :  { %v7814_v21 = vpop.f32.mrb[67].mxu1  ;;  %7843 = vmatmul.mubr.msk.f32.vlgmr.msra.gmra.mrb[54].mxu0 %vm608_vm4, %v5839_v16  ;;  %v92_v30 = vld [vmem:[#allocation2 + $0x1e0] sm:$0xff]  ;;  %v93_v16 = vld [vmem:[#allocation2 + $0x1e8] sm:$0xff] }
0x14ec   :  { %7846 = vmatpush3.msra.mxu0 %v44_v7  ;;  %v90_v7 = vld [vmem:[#allocation2 + $0x1d0] sm:$0xff]  ;;  %v7083_v21 = vld [vmem:[#allocation2] ss:$0 sm:$0xff] }
0x14ed   :  { %7850 = vmatprep.subr.mxu0 %v45_v19  ;;  %v8072_v26 = vpack.c.bf16 %v91_v11, %v90_v7 }
0x14f2   :  { %v5985_v22 = vpop.f32.mrb[68].mxu1 }
0x14f3   :  { %v7824_v29 = vpop.f32.mrb[69].mxu1 }
0x151a   :  { %v6131_v24 = vpop.f32.mrb[70].mxu1 }
0x151b   :  { %v7834_v37 = vpop.f32.mrb[71].mxu1 }
0x151e   :  { %v5912_v31 = vpop.f32.mrb[50].mxu0 }
0x151f   :  { %v7819_v36 = vpop.f32.mrb[51].mxu0  ;;  %7847 = vmatprep.mubr.msk.f32.mxu0 %vm608_vm4, %v5912_v31 }
0x1520   :  { %7848 = vmatmul.mubr.msk.f32.vlgmr.msra.gmra.mrb[54].mxu0 %vm608_vm4, %v5985_v22 }
0x1521   :  { %7851 = vmatpush3.msra.mxu0 %v45_v19  ;;  %v8076_v19 = vpack.c.bf16 %v93_v16, %v92_v30 }
0x1522   :  { %v6058_v59 = vpop.f32.mrb[52].mxu0 }
0x1523   :  { %v7829_v35 = vpop.f32.mrb[53].mxu0  ;;  %7852 = vmatprep.mubr.msk.f32.mxu0 %vm608_vm4, %v6058_v59  ;;  %v7086_v59 = vld [vmem:[#allocation2 + $0x8] ss:$0 sm:$0xff] }
0x1528   :  { %7853 = vmatmul.mubr.msk.f32.vlgmr.msra.gmra.mrb[54].mxu0 %vm608_vm4, %v6131_v24 }
0x15fb   :  { %v7854_v27 = vpop.f32.mrb[54].mxu0 }
0x15fc   :  { %v8092_v39 = vadd.f32 %v7854_v27, %v7074_v48  ;;  %v6460_v17 = vpop.f32.mrb[55].mxu0 }
0x15fd   :  { %v8093_v41 = vadd.f32 %v7074_v48, %v6460_v17 }
0x15fe   :  { %v9055_v14 = vadd.f32 %v8092_v39, %v8860_v25 }
0x15ff   :  { %v9058_v32 = vadd.f32 %v8093_v41, %v8863_v38 }
0x1600   :  { %v6476_v34 = vsel %vm277_vm2, %v9055_v14, 0.0 }
0x1601   :  { %6477 = vadd.xlane.f32.xlu0 %v6476_v34  ;;  %v6473_v42 = vsel %vm277_vm2, %v9058_v32, 0.0 }
0x1602   :  { %6474 = vadd.xlane.f32.xlu1 %v6473_v42 }
0x168e   :  { %v6478_v44 = vpop.xlane.xlu0 %6477 }
0x168f   :  { %v6480_v45 = vmul.f32 0.03125, %v6478_v44  ;;  %v6475_v40 = vpop.xlane.xlu1 %6474 }
0x1690   :  { %v6479_v43 = vmul.f32 0.03125, %v6475_v40 }
0x1691   :  { %v6482_v8 = vsub.f32 %v9055_v14, %v6480_v45 }
0x1692   :  { %v6481_v25 = vsub.f32 %v9058_v32, %v6479_v43 }
0x1693   :  { %v6484_v23 = vmul.f32 %v6482_v8, %v6482_v8 }
0x1694   :  { %v6483_v46 = vmul.f32 %v6481_v25, %v6481_v25 }
0x1695   :  { %v6488_v38 = vsel %vm277_vm2, %v6484_v23, 0.0 }
0x1696   :  { %6489 = vadd.xlane.f32.xlu1 %v6488_v38  ;;  %v6485_v47 = vsel %vm277_vm2, %v6483_v46, 0.0 }
0x1697   :  { %6486 = vadd.xlane.f32.xlu0 %v6485_v47  ;;  %v136_v47 = vld [vmem:[#allocation2 + $0x340] sm:$0xff] }
0x1723   :  { %v6490_v62 = vpop.xlane.xlu1 %6489 }
0x1724   :  { %v6492_v20 = vmul.f32 0.03125, %v6490_v62  ;;  %v6487_v4 = vpop.xlane.xlu0 %6486 }
0x1725   :  { %v6491_v60 = vmul.f32 0.03125, %v6487_v4  ;;  %v7089_v4 = vld [vmem:[#allocation2 + $0xe8] ss:$0 sm:$0xff] }
0x1726   :  { %v6494_v5 = vadd.f32 1e-06, %v6492_v20 }
0x1727   :  { %v6493_v9 = vadd.f32 1e-06, %v6491_v60 }
0x1728   :  { %8255 = vrsqrt.f32 %v6494_v5 }
0x1729   :  { %8257 = vrsqrt.f32 %v6493_v9 }
0x1732   :  { %v8256_v12 = vpop.eup %8255 }
0x1733   :  { %v8258_v1 = vpop.eup %8257  ;;  %v6498_v10 = vmul.f32 %v8256_v12, %v6482_v8  ;;  %v7090_v12 = vld [vmem:[#allocation2 + $0xe0] ss:$0 sm:$0xff] }
0x1734   :  { %v6497_v18 = vmul.f32 %v8258_v1, %v6481_v25 }
0x1735   :  { %v6504_v0 = vmul.f32 %v7081_v52, %v6498_v10 }
0x1736   :  { %v6503_v3 = vmul.f32 %v7081_v52, %v6497_v18 }
0x1737   :  { %v6510_v61 = vadd.f32 %v7082_v13, %v6504_v0  ;;  %v7091_v0 = vld [vmem:[#allocation2 + $0x330] ss:$0 sm:$0xff] }
0x1738   :  { %v6509_v6 = vadd.f32 %v7082_v13, %v6503_v3  ;;  %v8358_v13 = vmov 2  }
0x1739   :  { %8138 = vset.pattern.permute.xlu1 %v8358_v13  ;;  %8137 = vset.pattern.permute.xlu0 %v8358_v13 }
0x173a   :  { %7863 = vmatprep.mubr.msk.f32.mxu1 %vm277_vm2, %v6509_v6 }
0x173b   :  { %7864 = vmatmul.mubr.msk.f32.vlgmr.msra.gmra.mrb[72].mxu1 %vm277_vm2, %v6510_v61  ;;  %v8273_v61 = vld [vmem:[%s9117_s0 + $0x8] sm:$0xff] }
0x173c   :  { %8067 = vmatpush3.bf16.msra.mxu1 %v8064_v57 }
0x173d   :  { %8069 = vmatprep.subr.bf16.mxu1 %v8068_v2 }
0x1740   :  { %8071 = vmatpush3.bf16.msra.mxu1 %v8068_v2  ;;  %v8274_v2 = vld [vmem:[%s9117_s0] sm:$0xff]  ;;  %s8359_s0 = smov 125  }
0x1741   :  { %8073 = vmatprep.subr.bf16.mxu1 %v8072_v26 }
0x1744   :  { %8075 = vmatpush3.bf16.msra.mxu1 %v8072_v26 }
0x1745   :  { %8077 = vmatprep.subr.bf16.mxu1 %v8076_v19 }
0x1748   :  { %8079 = vmatpush3.bf16.msra.mxu1 %v8076_v19 }
0x180e   :  { %v7865_v22 = vpop.f32.mrb[72].mxu1 }
0x180f   :  { %v6593_v29 = vadd.f32 %v7865_v22, %v7083_v21  ;;  %v6587_v24 = vpop.f32.mrb[73].mxu1 }
0x1810   :  { %v6588_v37 = vadd.f32 %v7083_v21, %v6587_v24 }
0x1811   :  { %v6597_v36 = vmax.f32 %v6593_v29, 0.0 }
0x1812   :  { %v6596_v31 = vmax.f32 %v6588_v37, 0.0 }
0x1814   :  { %7882 = vmatprep.mubr.msk.f32.mxu1 %vm2364_vm7, %v6596_v31 }
0x1815   :  { %7883 = vmatmul.mubr.msk.f32.vlgmr.msra.gmra.mrb[74].mxu1 %vm2364_vm7, %v6597_v36 }
0x18e8   :  { %v7884_v35 = vpop.f32.mrb[74].mxu1 }
0x18e9   :  { %v6680_v48 = vadd.f32 %v7884_v35, %v7086_v59  ;;  %v6674_v27 = vpop.f32.mrb[75].mxu1  ;;  %v161_v35 = vcvt.s32.f32 %v8274_v2 }
0x18ea   :  { %v6675_v39 = vadd.f32 %v7086_v59, %v6674_v27 }
0x18eb   :  { %v6684_v17 = vadd.f32 %v6680_v48, %v9055_v14 }
0x18ec   :  { %v6683_v41 = vadd.f32 %v6675_v39, %v9058_v32  ;;  %v135_v32 = vld [vmem:[#allocation2 + $0x338] sm:$0xff] }
0x18ed   :  { %v6688_v34 = vsel %vm277_vm2, %v6684_v17, 0.0  ;;  %v8080_v15 = vpack.c.bf16 %v136_v47, %v135_v32 }
0x18ee   :  { %6689 = vadd.xlane.f32.xlu1 %v6688_v34  ;;  %v6685_v42 = vsel %vm277_vm2, %v6683_v41, 0.0  ;;  %v162_v34 = vcvt.s32.f32 %v8273_v61 }
0x18ef   :  { %6686 = vadd.xlane.f32.xlu0 %v6685_v42  ;;  %8081 = vmatprep.subr.bf16.mxu0 %v8080_v15 }
0x18f0   :  { %8083 = vmatpush3.bf16.msra.mxu0 %v8080_v15 }
0x18f1   :  { %8085 = vmatprep.subr.bf16.mxu0 %v8084_v51 }
0x18f4   :  { %8087 = vmatpush3.bf16.msra.mxu0 %v8084_v51 }
0x197b   :  { %v6690_v44 = vpop.xlane.xlu1 %6689 }
0x197c   :  { %v6692_v45 = vmul.f32 0.03125, %v6690_v44  ;;  %v6687_v40 = vpop.xlane.xlu0 %6686 }
0x197d   :  { %v6691_v43 = vmul.f32 0.03125, %v6687_v40 }
0x197e   :  { %v6694_v8 = vsub.f32 %v6684_v17, %v6692_v45 }
0x197f   :  { %v6693_v25 = vsub.f32 %v6683_v41, %v6691_v43 }
0x1980   :  { %v6696_v23 = vmul.f32 %v6694_v8, %v6694_v8 }
0x1981   :  { %v6695_v46 = vmul.f32 %v6693_v25, %v6693_v25 }
0x1982   :  { %v6700_v38 = vsel %vm277_vm2, %v6696_v23, 0.0 }
0x1983   :  { %6701 = vadd.xlane.f32.xlu1 %v6700_v38  ;;  %v6697_v14 = vsel %vm277_vm2, %v6695_v46, 0.0 }
0x1984   :  { %6698 = vadd.xlane.f32.xlu0 %v6697_v14 }
0x1a10   :  { %v6702_v53 = vpop.xlane.xlu1 %6701 }
0x1a11   :  { %v6704_v54 = vmul.f32 0.03125, %v6702_v53  ;;  %v6699_v55 = vpop.xlane.xlu0 %6698 }
0x1a12   :  { %v6703_v56 = vmul.f32 0.03125, %v6699_v55 }
0x1a13   :  { %v6706_v57 = vadd.f32 1e-06, %v6704_v54 }
0x1a14   :  { %v6705_v62 = vadd.f32 1e-06, %v6703_v56 }
0x1a15   :  { %8259 = vrsqrt.f32 %v6706_v57 }
0x1a16   :  { %8261 = vrsqrt.f32 %v6705_v62 }
0x1a1f   :  { %v8260_v20 = vpop.eup %8259 }
0x1a20   :  { %v8262_v60 = vpop.eup %8261  ;;  %v6710_v5 = vmul.f32 %v8260_v20, %v6694_v8 }
0x1a21   :  { %v6709_v9 = vmul.f32 %v8262_v60, %v6693_v25 }
0x1a22   :  { %v6716_v52 = vmul.f32 %v7089_v4, %v6710_v5 }
0x1a23   :  { %v6715_v1 = vmul.f32 %v7089_v4, %v6709_v9 }
0x1a24   :  { %v6722_v18 = vadd.f32 %v7090_v12, %v6716_v52 }
0x1a25   :  { %v6721_v10 = vadd.f32 %v7090_v12, %v6715_v1 }
0x1a27   :  { %7893 = vmatprep.mubr.msk.f32.mxu0 %vm277_vm2, %v6721_v10 }
0x1a28   :  { %7894 = vmatmul.mubr.msk.f32.vlgmr.msra.gmra.mrb[56].mxu0 %vm277_vm2, %v6722_v18 }
0x1afb   :  { %v7895_v3 = vpop.f32.mrb[56].mxu0 }
0x1afc   :  { %v6805_v58 = vadd.f32 %v7895_v3, %v7091_v0  ;;  %v6799_v63 = vpop.f32.mrb[57].mxu0 }
0x1afd   :  { %v6800_v6 = vadd.f32 %v7091_v0, %v6799_v63 }
0x1afe   :  { %6809 = vst [vmem:[#allocation5 + $0x8] sm:$0xff] %v6805_v58  ;;  %6812 = vmax.xlane.f32.xlu1 %v6805_v58 }
0x1aff   :  { %6808 = vst [vmem:[#allocation5] sm:$0xff] %v6800_v6  ;;  %6810 = vmax.xlane.f32.xlu0 %v6800_v6 }
0x1b0f   :  { %6832 = vperm.xlu1 %8138, %v8273_v61  }
0x1b15   :  { %6829 = vperm.xlu0 %8137, %v8274_v2  }
0x1b8b   :  { %v6813_v7 = vpop.xlane.xlu1 %6812 }
0x1b8c   :  { %v6815_v11 = vsub.f32 %v6805_v58, %v6813_v7  ;;  %v6811_v26 = vpop.xlane.xlu0 %6810 }
0x1b8d   :  { %v6814_v30 = vsub.f32 %v6800_v6, %v6811_v26 }
0x1b8e   :  { %v6818_v16 = vmul.f32 1.442695, %v6815_v11 }
0x1b8f   :  { %v6816_v19 = vmul.f32 1.442695, %v6814_v30  ;;  %v6833_v22 = vpop.permute.xlu1 %6832 }
0x1b90   :  { %8263 = vpow2.f32 %v6818_v16  ;;  %vm6835_vm10 = vcmp.eq.s32.totalorder %v8448_v28, %v6833_v22 }
0x1b91   :  { %8265 = vpow2.f32 %v6816_v19  ;;  %v7095_v36 = vsel %vm6835_vm10, 1.0, %v8352_v33 }
0x1b92   :  { %v6841_v59 = vmul.f32 %v7095_v36, %v6815_v11 }
0x1b94   :  { %v6830_v21 = vpop.permute.xlu0 %6829 }
0x1b95   :  { %vm6834_vm9 = vcmp.eq.s32.totalorder %v8448_v28, %v6830_v21 }
0x1b96   :  { %v7094_v37 = vsel %vm6834_vm9, 1.0, %v8352_v33 }
0x1b97   :  { %v6840_v31 = vmul.f32 %v7094_v37, %v6814_v30 }
0x1b9a   :  { %v8264_v29 = vpop.eup %8263 }
0x1b9b   :  { %v8266_v24 = vpop.eup %8265  ;;  %6822 = vadd.xlane.f32.xlu0 %v8264_v29 }
0x1b9c   :  { %6820 = vadd.xlane.f32.xlu1 %v8266_v24 }
0x1ba0   :  { %6842 = vadd.xlane.f32.xlu1 %v6840_v31 }
0x1ba4   :  { %6844 = vadd.xlane.f32.xlu1 %v6841_v59 }
0x1bb5   :  { %6873 = vrot.lane.b32.xlu1 %v161_v35, %s8359_s0 }
0x1c28   :  { %v6823_v48 = vpop.xlane.xlu0 %6822 }
0x1c29   :  { %8267 = vlog2.f32 %v6823_v48  ;;  %v6821_v27 = vpop.xlane.xlu1 %6820 }
0x1c2a   :  { %8269 = vlog2.f32 %v6821_v27 }
0x1c2d   :  { %v6843_v39 = vpop.xlane.xlu1 %6842 }
0x1c31   :  { %v6845_v44 = vpop.xlane.xlu1 %6844 }
0x1c33   :  { %v8268_v17 = vpop.eup %8267 }
0x1c34   :  { %v8270_v41 = vpop.eup %8269  ;;  %v6827_v42 = vmul.f32 0.6931472, %v8268_v17 }
0x1c35   :  { %v6825_v28 = vmul.f32 0.6931472, %v8270_v41  ;;  %v6874_v8 = vpop.permute.xlu1 %6873 }
0x1c36   :  { %v6847_v45 = vsub.f32 %v6827_v42, %v6845_v44  ;;  %v6879_v47 = vsel %vm6858_vm11, %v6874_v8, 0.0 }
0x1c37   :  { %v6846_v40 = vsub.f32 %v6825_v28, %v6843_v39 }
0x1c38   :  { %v6849_v33 = vmul.f32 %v6847_v45, %v162_v34 }
0x1c39   :  { %v6848_v43 = vmul.f32 %v6846_v40, %v161_v35 }
0x1c3a   :  { %6854 = vrot.lane.b32.xlu0 %v6849_v33, %s8359_s0 }
0x1c3b   :  { %6852 = vrot.lane.b32.xlu1 %v6848_v43, %s8359_s0 }
0x1c3f   :  { %6875 = vrot.lane.b32.xlu1 %v162_v34, %s8359_s0 }
0x1cac   :  { %v6855_v25 = vpop.permute.xlu0 %6854 }
0x1cad   :  { %v6860_v23 = vsel %vm6858_vm11, %v6855_v25, 0.0  ;;  %v6853_v46 = vpop.permute.xlu1 %6852 }
0x1cae   :  { %v6859_v38 = vsel %vm6858_vm11, %v6853_v46, 0.0 }
0x1caf   :  { %v6861_v14 = vadd.f32 %v6860_v23, %v6859_v38 }
0x1cb1   :  { %v6876_v32 = vpop.permute.xlu1 %6875  ;;  %6862 = vadd.xlane.f32.xlu1 %v6861_v14 }
0x1cb2   :  { %v6880_v15 = vsel %vm6858_vm11, %v6876_v32, 0.0 }
0x1cb3   :  { %v6881_v50 = vadd.f32 %v6880_v15, %v6879_v47 }
0x1cb5   :  { %6882 = vadd.xlane.f32.xlu0 %v6881_v50 }
0x1d3e   :  { %v6863_v49 = vpop.xlane.xlu1 %6862 }
0x1d3f   :  { %v6864_v51 = vrot.slane %v6863_v49, 4 }
0x1d41   :  { %v6865_v53 = vadd.f32 %v6864_v51, %v6863_v49 }
0x1d42   :  { %v6883_v54 = vpop.xlane.xlu0 %6882 }
0x1d43   :  { %v6866_v55 = vrot.slane %v6865_v53, 2  ;;  %v6884_v56 = vrot.slane %v6883_v54, 4 }
0x1d45   :  { %v6885_v57 = vadd.f32 %v6884_v56, %v6883_v54  ;;  %v6867_v62 = vadd.f32 %v6866_v55, %v6865_v53 }
0x1d46   :  { %8308 = shalt.err (!%p8305_p12)
}
0x1d47   :  { %s8309_s21 = scalar_lea.hbm %s9120_s3, 256 }
0x1d48   :  { %p8310_p13 = scmp.ne.s32.totalorder %s9120_s3, %s8309_s21  ;;  %p8313_p0 = scmp.lt.u32.totalorder %s8309_s21, %s9120_s3 }
0x1d4a   :  { %p8315_p1 = pnand %p8313_p0, %p8310_p13 }
0x1d4c   :  { %8318 = shalt.err (!%p8315_p1)
}
0x1d4d   :  { %6910 = dma.vmem_to_hbm [thread:$0]  %s6905_s17, 256, %s9120_s3, [#allocation4], %s8348_s25, %s8348_s25, %s8349_s26   ;;  %v6886_v20 = vrot.slane %v6885_v57, 2  ;;  %v6868_v4 = vrot.slane %v6867_v62, 1  ;;  %vm6897_vm12 = vcmask 0  }
0x1d4e   :  { %s8361_s6 = smov 1.0   ;;  %s8362_s7 = smov [#allocation6]  }
0x1d4f   :  { %v6887_v60 = vadd.f32 %v6886_v20, %v6885_v57  ;;  %v6869_v5 = vadd.f32 %v6868_v4, %v6867_v62  ;;  %s6917_s8 = sshll.u32 %s8362_s7, 4  ;;  %s6918_s8 = int_to_ptr.vmem [resolvable:$true] %s6917_s8 }
0x1d50   :  { %s8319_s25 = scalar_lea.vmem %s6918_s8, 16  ;;  %s8323_s26 = scalar_lea.vmem %s6918_s8, 32 }
0x1d51   :  { %8112 = vpush %v6869_v5  ;;  %v6888_v9 = vrot.slane %v6887_v60, 1  ;;  %p8320_p2 = scmp.ne.s32.totalorder %s6918_s8, %s8319_s25  ;;  %p8324_p3 = scmp.lt.s32.totalorder %s6918_s8, %s6918_s8 }
0x1d52   :  { %p8325_p4 = scmp.lt.s32.totalorder %s8323_s26, %s8319_s25 }
0x1d53   :  { %v6889_v12 = vadd.f32 %v6888_v9, %v6887_v60 }
0x1d54   :  { %p8326_p5 = por %p8325_p4, %p8324_p3 }
0x1d55   :  { %8114 = vpush %v6889_v12 }
0x1d56   :  { %p8327_p6 = pnand %p8326_p5, %p8320_p2 }
0x1d82   :  { %s8113_s30 = spop %8112 }
0x1d86   :  { %s8115_s5 = spop %8114 }
0x1d87   :  { %s6891_s2 = smax.f32 %s8361_s6, %s8115_s5 }
0x1d88   :  { %v6892_v52 = vstv %s6891_s2 }
0x1d89   :  { %8271 = vrcp.f32 %v6892_v52 }
0x1d93   :  { %v8272_v1 = vpop.eup %8271 }
0x1d94   :  { %8116 = vpush %v8272_v1 }
0x1dc5   :  { %s8117_s9 = spop %8116 }
0x1dc6   :  { %s6895_s3 = smul.f32 %s8117_s9, %s8113_s30 }
0x1dc8   :  { %v6896_v10 = vstv %s6895_s3 }
0x1dc9   :  { %6898 = vst.msk [vmem:[#allocation6] sm:$0x1] %vm6897_vm12, %v6896_v10 }
0x1dca   :  { %8330 = shalt.err (!%p8327_p6)
}
0x1dcb   :  { %s8331_s12 = scalar_lea.hbm %s9121_s4, 16 }
0x1dcc   :  { %p8332_p7 = scmp.ne.s32.totalorder %s9121_s4, %s8331_s12  ;;  %p8335_p8 = scmp.lt.u32.totalorder %s8331_s12, %s9121_s4 }
0x1dce   :  { %p8337_p9 = pnand %p8335_p8, %p8332_p7 }
0x1dd0   :  { %8340 = shalt.err (!%p8337_p9)
}
0x1dd1   :  { %6920 = dma.vmem_to_hbm [thread:$0]  %s6918_s8, 16, %s9121_s4, [#allocation7]  }
0x1dd2   :  { %8343 = dma.done.wait [#allocation4], 256  }
0x1dd3   :  { %8344 = vsyncadd [#allocation4], 4294967040 }
0x1dd4   :  { %8345 = dma.done.wait [#allocation7], 16  }
0x1dd5   :  { %8346 = vsyncadd [#allocation7], 4294967280 }
0x1dd6   :  { %6927 = vsyncpa [#allocation3], 1 }
0x1dd7   :  { %6928 = vsyncpa [#allocation4], 1 }
0x1dd8   :  { %6929 = vsyncpa [#allocation7], 1 }

</bundles_post_ra>
